<compile_context>
chip_gen: v6e
topology: v6e:2x2x1
jax: 0.10.0
libtpu: 0.0.40
codegen_flags: <defaults>
</compile_context>

<pallas_src>
import functools

import jax
import jax.numpy as jnp
from jax.experimental import pallas as pl
from jax.experimental.pallas import tpu as pltpu

LANE = 128
SUB = 8

# (out_channels, kernel, stride) -- fixed by the DQN spec.
CONV_CFG = ((32, 8, 4), (64, 4, 2), (64, 3, 1))


def _round_up(v, m):
    return (v + m - 1) // m * m


def _conv_out_hw(h, w):
    sizes = []
    for _, k, s in CONV_CFG:
        h = (h - k) // s + 1
        w = (w - k) // s + 1
        sizes.append((h, w))
    return sizes


# ----------------------------- fused Pallas kernel ---------------------------

def _make_fused_kernel(b_pad, hw_sizes, n_hidden):
    (oh1, ow1), (oh2, ow2), (oh3, ow3) = hw_sizes
    _, k2, s2 = CONV_CFG[1]
    _, k3, s3 = CONV_CFG[2]

    def conv_slab(y_bf, oh_in, ow_in, oh_out, ow_out, k, s):
        """y_bf: (oh_in*ow_in*b_pad, LANE) bf16, rows (pos_in, b).

        Returns (oh_out*ow_out*b_pad, k*k*LANE) bf16 patch slab with rows
        ordered (pos_out, b) and columns ordered (tap_i, tap_j, in_channel),
        matching the packed conv weight row order -> ONE matmul per layer.
        """
        col_blocks = []
        for i in range(k):
            for j in range(k):
                rows = []
                for r in range(oh_out):
                    for c in range(ow_out):
                        p_in = (r * s + i) * ow_in + (c * s + j)
                        rows.append(y_bf[p_in * b_pad:(p_in + 1) * b_pad, :])
                col_blocks.append(rows[0] if len(rows) == 1
                                  else jnp.concatenate(rows, axis=0))
        return jnp.concatenate(col_blocks, axis=1)

    def kernel(p1_ref, w1_ref, w2_ref, w3_ref, w4_ref, w5_ref, b_ref, out_ref):
        # Packed biases: row 0/1/2 = conv1/2/3 (first 128 lanes),
        # row 3 = fc1 (n_hidden lanes), row 4 = fc2 (first 128 lanes).
        b1 = b_ref[0:1, :LANE]
        b2 = b_ref[1:2, :LANE]
        b3 = b_ref[2:3, :LANE]
        b4 = b_ref[3:4, :n_hidden]
        b5 = b_ref[4:5, :LANE]

        # ---- conv1: one matmul over all (spatial_pos, batch) patch rows ----
        y1 = jnp.dot(p1_ref[...], w1_ref[...], preferred_element_type=jnp.float32)
        y1 = jnp.maximum(y1 + b1, 0.0).astype(jnp.bfloat16)   # (oh1*ow1*b_pad,128)

        # ---- conv2: ONE matmul over the full patch slab (M = oh2*ow2*b_pad) ----
        slab2 = conv_slab(y1, oh1, ow1, oh2, ow2, k2, s2)
        y2 = jnp.dot(slab2, w2_ref[...], preferred_element_type=jnp.float32)
        y2 = jnp.maximum(y2 + b2, 0.0).astype(jnp.bfloat16)   # (oh2*ow2*b_pad,128)

        # ---- conv3: ONE matmul ----
        slab3 = conv_slab(y2, oh2, ow2, oh3, ow3, k3, s3)
        y3 = jnp.dot(slab3, w3_ref[...], preferred_element_type=jnp.float32)
        y3 = jnp.maximum(y3 + b3, 0.0).astype(jnp.bfloat16)   # (oh3*ow3*b_pad,128)

        # ---- flatten: (pos3, b) row blocks -> (b, pos3*128) lane blocks ----
        # (the (h, w, c) layout permutation is baked into the packed fc1 weight)
        n3 = oh3 * ow3
        if n3 == 1:
            flat = y3
        else:
            flat = jnp.concatenate(
                [y3[p * b_pad:(p + 1) * b_pad, :] for p in range(n3)], axis=1)

        # ---- fc1 + ReLU ----
        h = jnp.dot(flat, w4_ref[...], preferred_element_type=jnp.float32)
        h = jnp.maximum(h + b4, 0.0).astype(jnp.bfloat16)      # (b_pad, n_hidden)

        # ---- fc2 ----
        q = jnp.dot(h, w5_ref[...], preferred_element_type=jnp.float32)
        out_ref[...] = q + b5                                  # (b_pad, 128) f32

    return kernel


# ------------------------- one-time parameter packing ------------------------

def pack_dqn_params(params, input_shape):
    """Pack weights once: transpose/flatten, lane-pad, fold 1/256, cast bf16."""
    _, h_in, w_in = input_shape
    oh3, ow3 = _conv_out_hw(h_in, w_in)[2]
    n_hidden = params["fc1_w"].shape[0]

    def pad2(a, rows, cols):
        out = jnp.zeros((rows, cols), jnp.float32)
        return out.at[:a.shape[0], :a.shape[1]].set(a.astype(jnp.float32))

    # conv1: (32, C, 8, 8) -> ((c,i,j), oc) with the /256 input scale folded in
    # (exact: power of two).
    w1 = params["conv1_w"].reshape(params["conv1_w"].shape[0], -1).T / 256.0
    k1p = _round_up(w1.shape[0], LANE)
    w1p = pad2(w1, k1p, LANE).astype(jnp.bfloat16)

    def pack_conv(w):
        # torch (oc, ic, kh, kw) -> ((kh, kw, ic_lane), oc_lane), lane-padded.
        oc, ic, kh, kw = w.shape
        wt = jnp.transpose(w, (2, 3, 1, 0)).astype(jnp.float32)   # (kh,kw,ic,oc)
        full = jnp.zeros((kh, kw, LANE, LANE), jnp.float32)
        full = full.at[:, :, :ic, :oc].set(wt)
        return full.reshape(kh * kw * LANE, LANE).astype(jnp.bfloat16)

    w2p = pack_conv(params["conv2_w"])
    w3p = pack_conv(params["conv3_w"])

    # fc1: torch flattens the conv3 output as (c, h, w); kernel layout is
    # (h, w, c_lane_block) -> permute + lane-pad the weight rows once here.
    fc1_w = params["fc1_w"]                                   # (512, 64*oh3*ow3)
    c3 = CONV_CFG[2][0]
    fc1_w = fc1_w.reshape(n_hidden, c3, oh3, ow3)
    fc1_w = jnp.transpose(fc1_w, (2, 3, 1, 0)).astype(jnp.float32)
    full = jnp.zeros((oh3, ow3, LANE, n_hidden), jnp.float32)
    full = full.at[:, :, :c3, :].set(fc1_w)
    w4p = full.reshape(oh3 * ow3 * LANE, n_hidden).astype(jnp.bfloat16)

    w5p = pad2(params["fc2_w"].T,
               params["fc2_w"].shape[1], LANE).astype(jnp.bfloat16)

    # All five biases packed into one sublane-aligned f32 tile (fewer DMAs).
    bias_w = max(n_hidden, LANE)
    b_all = jnp.zeros((SUB, bias_w), jnp.float32)
    b_all = b_all.at[0, :params["conv1_b"].shape[0]].set(
        params["conv1_b"].astype(jnp.float32))
    b_all = b_all.at[1, :params["conv2_b"].shape[0]].set(
        params["conv2_b"].astype(jnp.float32))
    b_all = b_all.at[2, :params["conv3_b"].shape[0]].set(
        params["conv3_b"].astype(jnp.float32))
    b_all = b_all.at[3, :n_hidden].set(params["fc1_b"].astype(jnp.float32))
    b_all = b_all.at[4, :params["fc2_b"].shape[0]].set(
        params["fc2_b"].astype(jnp.float32))

    return dict(w1=w1p, w2=w2p, w3=w3p, w4=w4p, w5=w5p, b=b_all)


# ------------------------------- glue (JAX) ----------------------------------

def _im2col_posmajor(x, k, stride, b_pad, k_pad):
    """x: (B,C,H,W) -> (oh*ow*b_pad, k_pad); rows (pos, b), cols (c, i, j)."""
    B, C, H, W = x.shape
    oh = (H - k) // stride + 1
    ow = (W - k) // stride + 1
    cols = []
    for i in range(k):
        for j in range(k):
            cols.append(x[:, :, i:i + stride * oh:stride, j:j + stride * ow:stride])
    p = jnp.stack(cols, axis=2).reshape(B, C * k * k, oh, ow)   # cols (c,i,j)
    p = p.transpose(2, 3, 0, 1)                                 # (oh, ow, B, K)
    out = jnp.zeros((oh, ow, b_pad, k_pad), x.dtype)
    out = out.at[:, :, :B, :C * k * k].set(p)
    return out.reshape(oh * ow * b_pad, k_pad)


def dqn_forward(packed, x_u8, *, n_actions):
    """Mirrors DQN.forward: x.float()/256 -> conv stack -> flatten -> fc head."""
    B, c_in, h_in, w_in = x_u8.shape
    hw = _conv_out_hw(h_in, w_in)
    b_pad = _round_up(max(B, 1), SUB)
    _, k1, s1 = CONV_CFG[0]
    k1_pad = _round_up(c_in * k1 * k1, LANE)
    n_hidden = packed["w4"].shape[1]

    # uint8 frames (0..255) are exact in bf16; the /256 is folded into conv1 w.
    x = x_u8.astype(jnp.bfloat16)
    # TODO(synk): at real Atari sizes move the conv1 im2col into the kernel
    # (DMA raw uint8 frames + static in-kernel slicing) to avoid the ~8x HBM
    # inflation of the XLA-side patch tensor; negligible at this toy size.
    patches = _im2col_posmajor(x, k1, s1, b_pad, k1_pad)

    kernel = _make_fused_kernel(b_pad, hw, n_hidden)

    # Scoped-VMEM limit sized from the actual resident footprint (weights +
    # patches + activations), with margin; capped so it is valid on v7x.
    args = (patches, packed["w1"], packed["w2"], packed["w3"],
            packed["w4"], packed["w5"], packed["b"])
    arg_bytes = sum(int(a.size) * a.dtype.itemsize for a in args)
    (oh1, ow1), (oh2, ow2), (oh3, ow3) = hw
    act_bytes = 4 * b_pad * (
        oh1 * ow1 * LANE
        + oh2 * ow2 * LANE * (1 + CONV_CFG[1][1] ** 2)
        + oh3 * ow3 * LANE * (1 + CONV_CFG[2][1] ** 2)
        + n_hidden + LANE)
    vmem_limit = int(min(48 * 2 ** 20, max(16 * 2 ** 20, 2 * (arg_bytes + act_bytes))))

    vmem = lambda: pl.BlockSpec(memory_space=pltpu.MemorySpace.VMEM)
    q_pad = pl.pallas_call(
        kernel,
        out_shape=jax.ShapeDtypeStruct((b_pad, LANE), jnp.float32),
        in_specs=[vmem() for _ in range(len(args))],
        out_specs=vmem(),
        compiler_params=pltpu.CompilerParams(vmem_limit_bytes=vmem_limit),
    )(*args)
    return q_pad[:B, :n_actions]


# ------------------------------- init & reference ----------------------------

def init_dqn_params(key, input_shape, n_actions):
    """Deterministic synthetic init (PyTorch-like uniform(-1/sqrt(fan_in), .))."""
    c = input_shape[0]
    oh3, ow3 = _conv_out_hw(input_shape[1], input_shape[2])[2]
    conv_out_size = CONV_CFG[2][0] * oh3 * ow3
    shapes = {
        "conv1_w": (32, c, 8, 8), "conv1_b": (32,),
        "conv2_w": (64, 32, 4, 4), "conv2_b": (64,),
        "conv3_w": (64, 64, 3, 3), "conv3_b": (64,),
        "fc1_w": (512, conv_out_size), "fc1_b": (512,),
        "fc2_w": (n_actions, 512), "fc2_b": (n_actions,),
    }
    params = {}
    keys = jax.random.split(key, len(shapes))
    for k_, (name, shp) in zip(keys, sorted(shapes.items())):
        if name.endswith("_w"):
            fan_in = int(jnp.prod(jnp.array(shp[1:])))
        else:
            fan_in = shp[0]
        bound = 1.0 / (fan_in ** 0.5)
        params[name] = jax.random.uniform(k_, shp, jnp.float32, -bound, bound)
    return params, conv_out_size


def _ref_forward(params, x_u8):
    x = x_u8.astype(jnp.float32) / 256.0

    def conv(x, w, b, s):
        y = jax.lax.conv_general_dilated(
            x, w, (s, s), "VALID", dimension_numbers=("NCHW", "OIHW", "NCHW"))
        return jax.nn.relu(y + b[None, :, None, None])

    y = conv(x, params["conv1_w"], params["conv1_b"], 4)
    y = conv(y, params["conv2_w"], params["conv2_b"], 2)
    y = conv(y, params["conv3_w"], params["conv3_b"], 1)
    flat = y.reshape(y.shape[0], -1)
    h = jax.nn.relu(flat @ params["fc1_w"].T + params["fc1_b"])
    return h @ params["fc2_w"].T + params["fc2_b"]


# ----------------------------------- main -------------------------------------

if __name__ == "__main__":
    key = jax.random.PRNGKey(0)
    k_param, k_in = jax.random.split(key)

    input_shape = (4, 36, 36)   # small Atari-like stack; conv tower -> 64*1*1
    n_actions = 6
    batch = 2

    params, conv_out_size = init_dqn_params(k_param, input_shape, n_actions)
    packed = pack_dqn_params(params, input_shape)   # one-time weight packing

    x = jax.random.randint(k_in, (batch,) + input_shape, 0, 256, dtype=jnp.int32)
    x = x.astype(jnp.uint8)                         # raw Atari-style frames

    fwd = jax.jit(functools.partial(dqn_forward, n_actions=n_actions))
    q = jax.block_until_ready(fwd(packed, x))
    assert q.shape == (batch, n_actions), q.shape

    q_ref = _ref_forward(params, x)
    # bf16 MXU operands with f32 accumulation -> loosened tolerance vs f32 ref.
    assert jnp.allclose(q, q_ref, atol=1e-2, rtol=1e-2), (
        "mismatch vs JAX reference", float(jnp.max(jnp.abs(q - q_ref))))

    print("KERNEL_OK")
</pallas_src>

<mosaic_0001>
module attributes {stable_mosaic.version = 11 : i64} {
  func.func @kernel(%arg0: memref<512x256xbf16, #tpu.memory_space<vmem>>, %arg1: memref<256x128xbf16, #tpu.memory_space<vmem>>, %arg2: memref<2048x128xbf16, #tpu.memory_space<vmem>>, %arg3: memref<1152x128xbf16, #tpu.memory_space<vmem>>, %arg4: memref<128x512xbf16, #tpu.memory_space<vmem>>, %arg5: memref<512x128xbf16, #tpu.memory_space<vmem>>, %arg6: memref<8x512xf32, #tpu.memory_space<vmem>>, %arg7: memref<8x128xf32, #tpu.memory_space<vmem>>) attributes {dimension_semantics = [], scalar_prefetch = 0 : i64, scratch_operands = 0 : i64, tpu.core_type = #tpu.core_type<tc>} {
    %c0 = arith.constant 0 : index
    %c0_0 = arith.constant 0 : index
    %0 = vector.load %arg6[%c0, %c0_0] : memref<8x512xf32, #tpu.memory_space<vmem>>, vector<1x128xf32>
    %c1 = arith.constant 1 : index
    %c0_1 = arith.constant 0 : index
    %1 = vector.load %arg6[%c1, %c0_1] : memref<8x512xf32, #tpu.memory_space<vmem>>, vector<1x128xf32>
    %c2 = arith.constant 2 : index
    %c0_2 = arith.constant 0 : index
    %2 = vector.load %arg6[%c2, %c0_2] : memref<8x512xf32, #tpu.memory_space<vmem>>, vector<1x128xf32>
    %c3 = arith.constant 3 : index
    %c0_3 = arith.constant 0 : index
    %3 = vector.load %arg6[%c3, %c0_3] : memref<8x512xf32, #tpu.memory_space<vmem>>, vector<1x512xf32>
    %c4 = arith.constant 4 : index
    %c0_4 = arith.constant 0 : index
    %4 = vector.load %arg6[%c4, %c0_4] : memref<8x512xf32, #tpu.memory_space<vmem>>, vector<1x128xf32>
    %c0_5 = arith.constant 0 : index
    %c0_6 = arith.constant 0 : index
    %5 = vector.load %arg0[%c0_5, %c0_6] : memref<512x256xbf16, #tpu.memory_space<vmem>>, vector<512x256xbf16>
    %c0_7 = arith.constant 0 : index
    %c0_8 = arith.constant 0 : index
    %6 = vector.load %arg1[%c0_7, %c0_8] : memref<256x128xbf16, #tpu.memory_space<vmem>>, vector<256x128xbf16>
    %cst = arith.constant dense<0.000000e+00> : vector<512x128xf32>
    %7 = tpu.matmul %5, %6, %cst {dimension_numbers = #tpu.dot_dimension_numbers<[1], [0], [0], [1], [0, 0, 1, 1], [], []>} : vector<512x256xbf16>, vector<256x128xbf16>, vector<512x128xf32> -> vector<512x128xf32>
    %8 = vector.broadcast %0 : vector<1x128xf32> to vector<512x128xf32>
    %9 = arith.addf %7, %8 : vector<512x128xf32>
    %cst_9 = arith.constant 0.000000e+00 : f32
    %10 = vector.broadcast %cst_9 : f32 to vector<512x128xf32>
    %11 = arith.maximumf %9, %10 : vector<512x128xf32>
    %12 = arith.truncf %11 : vector<512x128xf32> to vector<512x128xbf16>
    %13 = vector.extract_strided_slice %12 {offsets = [0, 0], sizes = [8, 128], strides = [1, 1]} : vector<512x128xbf16> to vector<8x128xbf16>
    %14 = vector.extract_strided_slice %12 {offsets = [16, 0], sizes = [8, 128], strides = [1, 1]} : vector<512x128xbf16> to vector<8x128xbf16>
    %15 = vector.extract_strided_slice %12 {offsets = [32, 0], sizes = [8, 128], strides = [1, 1]} : vector<512x128xbf16> to vector<8x128xbf16>
    %16 = vector.extract_strided_slice %12 {offsets = [128, 0], sizes = [8, 128], strides = [1, 1]} : vector<512x128xbf16> to vector<8x128xbf16>
    %17 = vector.extract_strided_slice %12 {offsets = [144, 0], sizes = [8, 128], strides = [1, 1]} : vector<512x128xbf16> to vector<8x128xbf16>
    %18 = vector.extract_strided_slice %12 {offsets = [160, 0], sizes = [8, 128], strides = [1, 1]} : vector<512x128xbf16> to vector<8x128xbf16>
    %19 = vector.extract_strided_slice %12 {offsets = [256, 0], sizes = [8, 128], strides = [1, 1]} : vector<512x128xbf16> to vector<8x128xbf16>
    %20 = vector.extract_strided_slice %12 {offsets = [272, 0], sizes = [8, 128], strides = [1, 1]} : vector<512x128xbf16> to vector<8x128xbf16>
    %21 = vector.extract_strided_slice %12 {offsets = [288, 0], sizes = [8, 128], strides = [1, 1]} : vector<512x128xbf16> to vector<8x128xbf16>
    %22 = tpu.concatenate %13, %14, %15, %16, %17, %18, %19, %20, %21 in 0 : vector<8x128xbf16>, vector<8x128xbf16>, vector<8x128xbf16>, vector<8x128xbf16>, vector<8x128xbf16>, vector<8x128xbf16>, vector<8x128xbf16>, vector<8x128xbf16>, vector<8x128xbf16> -> vector<72x128xbf16>
    %23 = vector.extract_strided_slice %12 {offsets = [8, 0], sizes = [8, 128], strides = [1, 1]} : vector<512x128xbf16> to vector<8x128xbf16>
    %24 = vector.extract_strided_slice %12 {offsets = [24, 0], sizes = [8, 128], strides = [1, 1]} : vector<512x128xbf16> to vector<8x128xbf16>
    %25 = vector.extract_strided_slice %12 {offsets = [40, 0], sizes = [8, 128], strides = [1, 1]} : vector<512x128xbf16> to vector<8x128xbf16>
    %26 = vector.extract_strided_slice %12 {offsets = [136, 0], sizes = [8, 128], strides = [1, 1]} : vector<512x128xbf16> to vector<8x128xbf16>
    %27 = vector.extract_strided_slice %12 {offsets = [152, 0], sizes = [8, 128], strides = [1, 1]} : vector<512x128xbf16> to vector<8x128xbf16>
    %28 = vector.extract_strided_slice %12 {offsets = [168, 0], sizes = [8, 128], strides = [1, 1]} : vector<512x128xbf16> to vector<8x128xbf16>
    %29 = vector.extract_strided_slice %12 {offsets = [264, 0], sizes = [8, 128], strides = [1, 1]} : vector<512x128xbf16> to vector<8x128xbf16>
    %30 = vector.extract_strided_slice %12 {offsets = [280, 0], sizes = [8, 128], strides = [1, 1]} : vector<512x128xbf16> to vector<8x128xbf16>
    %31 = vector.extract_strided_slice %12 {offsets = [296, 0], sizes = [8, 128], strides = [1, 1]} : vector<512x128xbf16> to vector<8x128xbf16>
    %32 = tpu.concatenate %23, %24, %25, %26, %27, %28, %29, %30, %31 in 0 : vector<8x128xbf16>, vector<8x128xbf16>, vector<8x128xbf16>, vector<8x128xbf16>, vector<8x128xbf16>, vector<8x128xbf16>, vector<8x128xbf16>, vector<8x128xbf16>, vector<8x128xbf16> -> vector<72x128xbf16>
    %33 = vector.extract_strided_slice %12 {offsets = [16, 0], sizes = [8, 128], strides = [1, 1]} : vector<512x128xbf16> to vector<8x128xbf16>
    %34 = vector.extract_strided_slice %12 {offsets = [32, 0], sizes = [8, 128], strides = [1, 1]} : vector<512x128xbf16> to vector<8x128xbf16>
    %35 = vector.extract_strided_slice %12 {offsets = [48, 0], sizes = [8, 128], strides = [1, 1]} : vector<512x128xbf16> to vector<8x128xbf16>
    %36 = vector.extract_strided_slice %12 {offsets = [144, 0], sizes = [8, 128], strides = [1, 1]} : vector<512x128xbf16> to vector<8x128xbf16>
    %37 = vector.extract_strided_slice %12 {offsets = [160, 0], sizes = [8, 128], strides = [1, 1]} : vector<512x128xbf16> to vector<8x128xbf16>
    %38 = vector.extract_strided_slice %12 {offsets = [176, 0], sizes = [8, 128], strides = [1, 1]} : vector<512x128xbf16> to vector<8x128xbf16>
    %39 = vector.extract_strided_slice %12 {offsets = [272, 0], sizes = [8, 128], strides = [1, 1]} : vector<512x128xbf16> to vector<8x128xbf16>
    %40 = vector.extract_strided_slice %12 {offsets = [288, 0], sizes = [8, 128], strides = [1, 1]} : vector<512x128xbf16> to vector<8x128xbf16>
    %41 = vector.extract_strided_slice %12 {offsets = [304, 0], sizes = [8, 128], strides = [1, 1]} : vector<512x128xbf16> to vector<8x128xbf16>
    %42 = tpu.concatenate %33, %34, %35, %36, %37, %38, %39, %40, %41 in 0 : vector<8x128xbf16>, vector<8x128xbf16>, vector<8x128xbf16>, vector<8x128xbf16>, vector<8x128xbf16>, vector<8x128xbf16>, vector<8x128xbf16>, vector<8x128xbf16>, vector<8x128xbf16> -> vector<72x128xbf16>
    %43 = vector.extract_strided_slice %12 {offsets = [24, 0], sizes = [8, 128], strides = [1, 1]} : vector<512x128xbf16> to vector<8x128xbf16>
    %44 = vector.extract_strided_slice %12 {offsets = [40, 0], sizes = [8, 128], strides = [1, 1]} : vector<512x128xbf16> to vector<8x128xbf16>
    %45 = vector.extract_strided_slice %12 {offsets = [56, 0], sizes = [8, 128], strides = [1, 1]} : vector<512x128xbf16> to vector<8x128xbf16>
    %46 = vector.extract_strided_slice %12 {offsets = [152, 0], sizes = [8, 128], strides = [1, 1]} : vector<512x128xbf16> to vector<8x128xbf16>
    %47 = vector.extract_strided_slice %12 {offsets = [168, 0], sizes = [8, 128], strides = [1, 1]} : vector<512x128xbf16> to vector<8x128xbf16>
    %48 = vector.extract_strided_slice %12 {offsets = [184, 0], sizes = [8, 128], strides = [1, 1]} : vector<512x128xbf16> to vector<8x128xbf16>
    %49 = vector.extract_strided_slice %12 {offsets = [280, 0], sizes = [8, 128], strides = [1, 1]} : vector<512x128xbf16> to vector<8x128xbf16>
    %50 = vector.extract_strided_slice %12 {offsets = [296, 0], sizes = [8, 128], strides = [1, 1]} : vector<512x128xbf16> to vector<8x128xbf16>
    %51 = vector.extract_strided_slice %12 {offsets = [312, 0], sizes = [8, 128], strides = [1, 1]} : vector<512x128xbf16> to vector<8x128xbf16>
    %52 = tpu.concatenate %43, %44, %45, %46, %47, %48, %49, %50, %51 in 0 : vector<8x128xbf16>, vector<8x128xbf16>, vector<8x128xbf16>, vector<8x128xbf16>, vector<8x128xbf16>, vector<8x128xbf16>, vector<8x128xbf16>, vector<8x128xbf16>, vector<8x128xbf16> -> vector<72x128xbf16>
    %53 = vector.extract_strided_slice %12 {offsets = [64, 0], sizes = [8, 128], strides = [1, 1]} : vector<512x128xbf16> to vector<8x128xbf16>
    %54 = vector.extract_strided_slice %12 {offsets = [80, 0], sizes = [8, 128], strides = [1, 1]} : vector<512x128xbf16> to vector<8x128xbf16>
    %55 = vector.extract_strided_slice %12 {offsets = [96, 0], sizes = [8, 128], strides = [1, 1]} : vector<512x128xbf16> to vector<8x128xbf16>
    %56 = vector.extract_strided_slice %12 {offsets = [192, 0], sizes = [8, 128], strides = [1, 1]} : vector<512x128xbf16> to vector<8x128xbf16>
    %57 = vector.extract_strided_slice %12 {offsets = [208, 0], sizes = [8, 128], strides = [1, 1]} : vector<512x128xbf16> to vector<8x128xbf16>
    %58 = vector.extract_strided_slice %12 {offsets = [224, 0], sizes = [8, 128], strides = [1, 1]} : vector<512x128xbf16> to vector<8x128xbf16>
    %59 = vector.extract_strided_slice %12 {offsets = [320, 0], sizes = [8, 128], strides = [1, 1]} : vector<512x128xbf16> to vector<8x128xbf16>
    %60 = vector.extract_strided_slice %12 {offsets = [336, 0], sizes = [8, 128], strides = [1, 1]} : vector<512x128xbf16> to vector<8x128xbf16>
    %61 = vector.extract_strided_slice %12 {offsets = [352, 0], sizes = [8, 128], strides = [1, 1]} : vector<512x128xbf16> to vector<8x128xbf16>
    %62 = tpu.concatenate %53, %54, %55, %56, %57, %58, %59, %60, %61 in 0 : vector<8x128xbf16>, vector<8x128xbf16>, vector<8x128xbf16>, vector<8x128xbf16>, vector<8x128xbf16>, vector<8x128xbf16>, vector<8x128xbf16>, vector<8x128xbf16>, vector<8x128xbf16> -> vector<72x128xbf16>
    %63 = vector.extract_strided_slice %12 {offsets = [72, 0], sizes = [8, 128], strides = [1, 1]} : vector<512x128xbf16> to vector<8x128xbf16>
    %64 = vector.extract_strided_slice %12 {offsets = [88, 0], sizes = [8, 128], strides = [1, 1]} : vector<512x128xbf16> to vector<8x128xbf16>
    %65 = vector.extract_strided_slice %12 {offsets = [104, 0], sizes = [8, 128], strides = [1, 1]} : vector<512x128xbf16> to vector<8x128xbf16>
    %66 = vector.extract_strided_slice %12 {offsets = [200, 0], sizes = [8, 128], strides = [1, 1]} : vector<512x128xbf16> to vector<8x128xbf16>
    %67 = vector.extract_strided_slice %12 {offsets = [216, 0], sizes = [8, 128], strides = [1, 1]} : vector<512x128xbf16> to vector<8x128xbf16>
    %68 = vector.extract_strided_slice %12 {offsets = [232, 0], sizes = [8, 128], strides = [1, 1]} : vector<512x128xbf16> to vector<8x128xbf16>
    %69 = vector.extract_strided_slice %12 {offsets = [328, 0], sizes = [8, 128], strides = [1, 1]} : vector<512x128xbf16> to vector<8x128xbf16>
    %70 = vector.extract_strided_slice %12 {offsets = [344, 0], sizes = [8, 128], strides = [1, 1]} : vector<512x128xbf16> to vector<8x128xbf16>
    %71 = vector.extract_strided_slice %12 {offsets = [360, 0], sizes = [8, 128], strides = [1, 1]} : vector<512x128xbf16> to vector<8x128xbf16>
    %72 = tpu.concatenate %63, %64, %65, %66, %67, %68, %69, %70, %71 in 0 : vector<8x128xbf16>, vector<8x128xbf16>, vector<8x128xbf16>, vector<8x128xbf16>, vector<8x128xbf16>, vector<8x128xbf16>, vector<8x128xbf16>, vector<8x128xbf16>, vector<8x128xbf16> -> vector<72x128xbf16>
    %73 = vector.extract_strided_slice %12 {offsets = [80, 0], sizes = [8, 128], strides = [1, 1]} : vector<512x128xbf16> to vector<8x128xbf16>
    %74 = vector.extract_strided_slice %12 {offsets = [96, 0], sizes = [8, 128], strides = [1, 1]} : vector<512x128xbf16> to vector<8x128xbf16>
    %75 = vector.extract_strided_slice %12 {offsets = [112, 0], sizes = [8, 128], strides = [1, 1]} : vector<512x128xbf16> to vector<8x128xbf16>
    %76 = vector.extract_strided_slice %12 {offsets = [208, 0], sizes = [8, 128], strides = [1, 1]} : vector<512x128xbf16> to vector<8x128xbf16>
    %77 = vector.extract_strided_slice %12 {offsets = [224, 0], sizes = [8, 128], strides = [1, 1]} : vector<512x128xbf16> to vector<8x128xbf16>
    %78 = vector.extract_strided_slice %12 {offsets = [240, 0], sizes = [8, 128], strides = [1, 1]} : vector<512x128xbf16> to vector<8x128xbf16>
    %79 = vector.extract_strided_slice %12 {offsets = [336, 0], sizes = [8, 128], strides = [1, 1]} : vector<512x128xbf16> to vector<8x128xbf16>
    %80 = vector.extract_strided_slice %12 {offsets = [352, 0], sizes = [8, 128], strides = [1, 1]} : vector<512x128xbf16> to vector<8x128xbf16>
    %81 = vector.extract_strided_slice %12 {offsets = [368, 0], sizes = [8, 128], strides = [1, 1]} : vector<512x128xbf16> to vector<8x128xbf16>
    %82 = tpu.concatenate %73, %74, %75, %76, %77, %78, %79, %80, %81 in 0 : vector<8x128xbf16>, vector<8x128xbf16>, vector<8x128xbf16>, vector<8x128xbf16>, vector<8x128xbf16>, vector<8x128xbf16>, vector<8x128xbf16>, vector<8x128xbf16>, vector<8x128xbf16> -> vector<72x128xbf16>
    %83 = vector.extract_strided_slice %12 {offsets = [88, 0], sizes = [8, 128], strides = [1, 1]} : vector<512x128xbf16> to vector<8x128xbf16>
    %84 = vector.extract_strided_slice %12 {offsets = [104, 0], sizes = [8, 128], strides = [1, 1]} : vector<512x128xbf16> to vector<8x128xbf16>
    %85 = vector.extract_strided_slice %12 {offsets = [120, 0], sizes = [8, 128], strides = [1, 1]} : vector<512x128xbf16> to vector<8x128xbf16>
    %86 = vector.extract_strided_slice %12 {offsets = [216, 0], sizes = [8, 128], strides = [1, 1]} : vector<512x128xbf16> to vector<8x128xbf16>
    %87 = vector.extract_strided_slice %12 {offsets = [232, 0], sizes = [8, 128], strides = [1, 1]} : vector<512x128xbf16> to vector<8x128xbf16>
    %88 = vector.extract_strided_slice %12 {offsets = [248, 0], sizes = [8, 128], strides = [1, 1]} : vector<512x128xbf16> to vector<8x128xbf16>
    %89 = vector.extract_strided_slice %12 {offsets = [344, 0], sizes = [8, 128], strides = [1, 1]} : vector<512x128xbf16> to vector<8x128xbf16>
    %90 = vector.extract_strided_slice %12 {offsets = [360, 0], sizes = [8, 128], strides = [1, 1]} : vector<512x128xbf16> to vector<8x128xbf16>
    %91 = vector.extract_strided_slice %12 {offsets = [376, 0], sizes = [8, 128], strides = [1, 1]} : vector<512x128xbf16> to vector<8x128xbf16>
    %92 = tpu.concatenate %83, %84, %85, %86, %87, %88, %89, %90, %91 in 0 : vector<8x128xbf16>, vector<8x128xbf16>, vector<8x128xbf16>, vector<8x128xbf16>, vector<8x128xbf16>, vector<8x128xbf16>, vector<8x128xbf16>, vector<8x128xbf16>, vector<8x128xbf16> -> vector<72x128xbf16>
    %93 = vector.extract_strided_slice %12 {offsets = [128, 0], sizes = [8, 128], strides = [1, 1]} : vector<512x128xbf16> to vector<8x128xbf16>
    %94 = vector.extract_strided_slice %12 {offsets = [144, 0], sizes = [8, 128], strides = [1, 1]} : vector<512x128xbf16> to vector<8x128xbf16>
    %95 = vector.extract_strided_slice %12 {offsets = [160, 0], sizes = [8, 128], strides = [1, 1]} : vector<512x128xbf16> to vector<8x128xbf16>
    %96 = vector.extract_strided_slice %12 {offsets = [256, 0], sizes = [8, 128], strides = [1, 1]} : vector<512x128xbf16> to vector<8x128xbf16>
    %97 = vector.extract_strided_slice %12 {offsets = [272, 0], sizes = [8, 128], strides = [1, 1]} : vector<512x128xbf16> to vector<8x128xbf16>
    %98 = vector.extract_strided_slice %12 {offsets = [288, 0], sizes = [8, 128], strides = [1, 1]} : vector<512x128xbf16> to vector<8x128xbf16>
    %99 = vector.extract_strided_slice %12 {offsets = [384, 0], sizes = [8, 128], strides = [1, 1]} : vector<512x128xbf16> to vector<8x128xbf16>
    %100 = vector.extract_strided_slice %12 {offsets = [400, 0], sizes = [8, 128], strides = [1, 1]} : vector<512x128xbf16> to vector<8x128xbf16>
    %101 = vector.extract_strided_slice %12 {offsets = [416, 0], sizes = [8, 128], strides = [1, 1]} : vector<512x128xbf16> to vector<8x128xbf16>
    %102 = tpu.concatenate %93, %94, %95, %96, %97, %98, %99, %100, %101 in 0 : vector<8x128xbf16>, vector<8x128xbf16>, vector<8x128xbf16>, vector<8x128xbf16>, vector<8x128xbf16>, vector<8x128xbf16>, vector<8x128xbf16>, vector<8x128xbf16>, vector<8x128xbf16> -> vector<72x128xbf16>
    %103 = vector.extract_strided_slice %12 {offsets = [136, 0], sizes = [8, 128], strides = [1, 1]} : vector<512x128xbf16> to vector<8x128xbf16>
    %104 = vector.extract_strided_slice %12 {offsets = [152, 0], sizes = [8, 128], strides = [1, 1]} : vector<512x128xbf16> to vector<8x128xbf16>
    %105 = vector.extract_strided_slice %12 {offsets = [168, 0], sizes = [8, 128], strides = [1, 1]} : vector<512x128xbf16> to vector<8x128xbf16>
    %106 = vector.extract_strided_slice %12 {offsets = [264, 0], sizes = [8, 128], strides = [1, 1]} : vector<512x128xbf16> to vector<8x128xbf16>
    %107 = vector.extract_strided_slice %12 {offsets = [280, 0], sizes = [8, 128], strides = [1, 1]} : vector<512x128xbf16> to vector<8x128xbf16>
    %108 = vector.extract_strided_slice %12 {offsets = [296, 0], sizes = [8, 128], strides = [1, 1]} : vector<512x128xbf16> to vector<8x128xbf16>
    %109 = vector.extract_strided_slice %12 {offsets = [392, 0], sizes = [8, 128], strides = [1, 1]} : vector<512x128xbf16> to vector<8x128xbf16>
    %110 = vector.extract_strided_slice %12 {offsets = [408, 0], sizes = [8, 128], strides = [1, 1]} : vector<512x128xbf16> to vector<8x128xbf16>
    %111 = vector.extract_strided_slice %12 {offsets = [424, 0], sizes = [8, 128], strides = [1, 1]} : vector<512x128xbf16> to vector<8x128xbf16>
    %112 = tpu.concatenate %103, %104, %105, %106, %107, %108, %109, %110, %111 in 0 : vector<8x128xbf16>, vector<8x128xbf16>, vector<8x128xbf16>, vector<8x128xbf16>, vector<8x128xbf16>, vector<8x128xbf16>, vector<8x128xbf16>, vector<8x128xbf16>, vector<8x128xbf16> -> vector<72x128xbf16>
    %113 = vector.extract_strided_slice %12 {offsets = [144, 0], sizes = [8, 128], strides = [1, 1]} : vector<512x128xbf16> to vector<8x128xbf16>
    %114 = vector.extract_strided_slice %12 {offsets = [160, 0], sizes = [8, 128], strides = [1, 1]} : vector<512x128xbf16> to vector<8x128xbf16>
    %115 = vector.extract_strided_slice %12 {offsets = [176, 0], sizes = [8, 128], strides = [1, 1]} : vector<512x128xbf16> to vector<8x128xbf16>
    %116 = vector.extract_strided_slice %12 {offsets = [272, 0], sizes = [8, 128], strides = [1, 1]} : vector<512x128xbf16> to vector<8x128xbf16>
    %117 = vector.extract_strided_slice %12 {offsets = [288, 0], sizes = [8, 128], strides = [1, 1]} : vector<512x128xbf16> to vector<8x128xbf16>
    %118 = vector.extract_strided_slice %12 {offsets = [304, 0], sizes = [8, 128], strides = [1, 1]} : vector<512x128xbf16> to vector<8x128xbf16>
    %119 = vector.extract_strided_slice %12 {offsets = [400, 0], sizes = [8, 128], strides = [1, 1]} : vector<512x128xbf16> to vector<8x128xbf16>
    %120 = vector.extract_strided_slice %12 {offsets = [416, 0], sizes = [8, 128], strides = [1, 1]} : vector<512x128xbf16> to vector<8x128xbf16>
    %121 = vector.extract_strided_slice %12 {offsets = [432, 0], sizes = [8, 128], strides = [1, 1]} : vector<512x128xbf16> to vector<8x128xbf16>
    %122 = tpu.concatenate %113, %114, %115, %116, %117, %118, %119, %120, %121 in 0 : vector<8x128xbf16>, vector<8x128xbf16>, vector<8x128xbf16>, vector<8x128xbf16>, vector<8x128xbf16>, vector<8x128xbf16>, vector<8x128xbf16>, vector<8x128xbf16>, vector<8x128xbf16> -> vector<72x128xbf16>
    %123 = vector.extract_strided_slice %12 {offsets = [152, 0], sizes = [8, 128], strides = [1, 1]} : vector<512x128xbf16> to vector<8x128xbf16>
    %124 = vector.extract_strided_slice %12 {offsets = [168, 0], sizes = [8, 128], strides = [1, 1]} : vector<512x128xbf16> to vector<8x128xbf16>
    %125 = vector.extract_strided_slice %12 {offsets = [184, 0], sizes = [8, 128], strides = [1, 1]} : vector<512x128xbf16> to vector<8x128xbf16>
    %126 = vector.extract_strided_slice %12 {offsets = [280, 0], sizes = [8, 128], strides = [1, 1]} : vector<512x128xbf16> to vector<8x128xbf16>
    %127 = vector.extract_strided_slice %12 {offsets = [296, 0], sizes = [8, 128], strides = [1, 1]} : vector<512x128xbf16> to vector<8x128xbf16>
    %128 = vector.extract_strided_slice %12 {offsets = [312, 0], sizes = [8, 128], strides = [1, 1]} : vector<512x128xbf16> to vector<8x128xbf16>
    %129 = vector.extract_strided_slice %12 {offsets = [408, 0], sizes = [8, 128], strides = [1, 1]} : vector<512x128xbf16> to vector<8x128xbf16>
    %130 = vector.extract_strided_slice %12 {offsets = [424, 0], sizes = [8, 128], strides = [1, 1]} : vector<512x128xbf16> to vector<8x128xbf16>
    %131 = vector.extract_strided_slice %12 {offsets = [440, 0], sizes = [8, 128], strides = [1, 1]} : vector<512x128xbf16> to vector<8x128xbf16>
    %132 = tpu.concatenate %123, %124, %125, %126, %127, %128, %129, %130, %131 in 0 : vector<8x128xbf16>, vector<8x128xbf16>, vector<8x128xbf16>, vector<8x128xbf16>, vector<8x128xbf16>, vector<8x128xbf16>, vector<8x128xbf16>, vector<8x128xbf16>, vector<8x128xbf16> -> vector<72x128xbf16>
    %133 = vector.extract_strided_slice %12 {offsets = [192, 0], sizes = [8, 128], strides = [1, 1]} : vector<512x128xbf16> to vector<8x128xbf16>
    %134 = vector.extract_strided_slice %12 {offsets = [208, 0], sizes = [8, 128], strides = [1, 1]} : vector<512x128xbf16> to vector<8x128xbf16>
    %135 = vector.extract_strided_slice %12 {offsets = [224, 0], sizes = [8, 128], strides = [1, 1]} : vector<512x128xbf16> to vector<8x128xbf16>
    %136 = vector.extract_strided_slice %12 {offsets = [320, 0], sizes = [8, 128], strides = [1, 1]} : vector<512x128xbf16> to vector<8x128xbf16>
    %137 = vector.extract_strided_slice %12 {offsets = [336, 0], sizes = [8, 128], strides = [1, 1]} : vector<512x128xbf16> to vector<8x128xbf16>
    %138 = vector.extract_strided_slice %12 {offsets = [352, 0], sizes = [8, 128], strides = [1, 1]} : vector<512x128xbf16> to vector<8x128xbf16>
    %139 = vector.extract_strided_slice %12 {offsets = [448, 0], sizes = [8, 128], strides = [1, 1]} : vector<512x128xbf16> to vector<8x128xbf16>
    %140 = vector.extract_strided_slice %12 {offsets = [464, 0], sizes = [8, 128], strides = [1, 1]} : vector<512x128xbf16> to vector<8x128xbf16>
    %141 = vector.extract_strided_slice %12 {offsets = [480, 0], sizes = [8, 128], strides = [1, 1]} : vector<512x128xbf16> to vector<8x128xbf16>
    %142 = tpu.concatenate %133, %134, %135, %136, %137, %138, %139, %140, %141 in 0 : vector<8x128xbf16>, vector<8x128xbf16>, vector<8x128xbf16>, vector<8x128xbf16>, vector<8x128xbf16>, vector<8x128xbf16>, vector<8x128xbf16>, vector<8x128xbf16>, vector<8x128xbf16> -> vector<72x128xbf16>
    %143 = vector.extract_strided_slice %12 {offsets = [200, 0], sizes = [8, 128], strides = [1, 1]} : vector<512x128xbf16> to vector<8x128xbf16>
    %144 = vector.extract_strided_slice %12 {offsets = [216, 0], sizes = [8, 128], strides = [1, 1]} : vector<512x128xbf16> to vector<8x128xbf16>
    %145 = vector.extract_strided_slice %12 {offsets = [232, 0], sizes = [8, 128], strides = [1, 1]} : vector<512x128xbf16> to vector<8x128xbf16>
    %146 = vector.extract_strided_slice %12 {offsets = [328, 0], sizes = [8, 128], strides = [1, 1]} : vector<512x128xbf16> to vector<8x128xbf16>
    %147 = vector.extract_strided_slice %12 {offsets = [344, 0], sizes = [8, 128], strides = [1, 1]} : vector<512x128xbf16> to vector<8x128xbf16>
    %148 = vector.extract_strided_slice %12 {offsets = [360, 0], sizes = [8, 128], strides = [1, 1]} : vector<512x128xbf16> to vector<8x128xbf16>
    %149 = vector.extract_strided_slice %12 {offsets = [456, 0], sizes = [8, 128], strides = [1, 1]} : vector<512x128xbf16> to vector<8x128xbf16>
    %150 = vector.extract_strided_slice %12 {offsets = [472, 0], sizes = [8, 128], strides = [1, 1]} : vector<512x128xbf16> to vector<8x128xbf16>
    %151 = vector.extract_strided_slice %12 {offsets = [488, 0], sizes = [8, 128], strides = [1, 1]} : vector<512x128xbf16> to vector<8x128xbf16>
    %152 = tpu.concatenate %143, %144, %145, %146, %147, %148, %149, %150, %151 in 0 : vector<8x128xbf16>, vector<8x128xbf16>, vector<8x128xbf16>, vector<8x128xbf16>, vector<8x128xbf16>, vector<8x128xbf16>, vector<8x128xbf16>, vector<8x128xbf16>, vector<8x128xbf16> -> vector<72x128xbf16>
    %153 = vector.extract_strided_slice %12 {offsets = [208, 0], sizes = [8, 128], strides = [1, 1]} : vector<512x128xbf16> to vector<8x128xbf16>
    %154 = vector.extract_strided_slice %12 {offsets = [224, 0], sizes = [8, 128], strides = [1, 1]} : vector<512x128xbf16> to vector<8x128xbf16>
    %155 = vector.extract_strided_slice %12 {offsets = [240, 0], sizes = [8, 128], strides = [1, 1]} : vector<512x128xbf16> to vector<8x128xbf16>
    %156 = vector.extract_strided_slice %12 {offsets = [336, 0], sizes = [8, 128], strides = [1, 1]} : vector<512x128xbf16> to vector<8x128xbf16>
    %157 = vector.extract_strided_slice %12 {offsets = [352, 0], sizes = [8, 128], strides = [1, 1]} : vector<512x128xbf16> to vector<8x128xbf16>
    %158 = vector.extract_strided_slice %12 {offsets = [368, 0], sizes = [8, 128], strides = [1, 1]} : vector<512x128xbf16> to vector<8x128xbf16>
    %159 = vector.extract_strided_slice %12 {offsets = [464, 0], sizes = [8, 128], strides = [1, 1]} : vector<512x128xbf16> to vector<8x128xbf16>
    %160 = vector.extract_strided_slice %12 {offsets = [480, 0], sizes = [8, 128], strides = [1, 1]} : vector<512x128xbf16> to vector<8x128xbf16>
    %161 = vector.extract_strided_slice %12 {offsets = [496, 0], sizes = [8, 128], strides = [1, 1]} : vector<512x128xbf16> to vector<8x128xbf16>
    %162 = tpu.concatenate %153, %154, %155, %156, %157, %158, %159, %160, %161 in 0 : vector<8x128xbf16>, vector<8x128xbf16>, vector<8x128xbf16>, vector<8x128xbf16>, vector<8x128xbf16>, vector<8x128xbf16>, vector<8x128xbf16>, vector<8x128xbf16>, vector<8x128xbf16> -> vector<72x128xbf16>
    %163 = vector.extract_strided_slice %12 {offsets = [216, 0], sizes = [8, 128], strides = [1, 1]} : vector<512x128xbf16> to vector<8x128xbf16>
    %164 = vector.extract_strided_slice %12 {offsets = [232, 0], sizes = [8, 128], strides = [1, 1]} : vector<512x128xbf16> to vector<8x128xbf16>
    %165 = vector.extract_strided_slice %12 {offsets = [248, 0], sizes = [8, 128], strides = [1, 1]} : vector<512x128xbf16> to vector<8x128xbf16>
    %166 = vector.extract_strided_slice %12 {offsets = [344, 0], sizes = [8, 128], strides = [1, 1]} : vector<512x128xbf16> to vector<8x128xbf16>
    %167 = vector.extract_strided_slice %12 {offsets = [360, 0], sizes = [8, 128], strides = [1, 1]} : vector<512x128xbf16> to vector<8x128xbf16>
    %168 = vector.extract_strided_slice %12 {offsets = [376, 0], sizes = [8, 128], strides = [1, 1]} : vector<512x128xbf16> to vector<8x128xbf16>
    %169 = vector.extract_strided_slice %12 {offsets = [472, 0], sizes = [8, 128], strides = [1, 1]} : vector<512x128xbf16> to vector<8x128xbf16>
    %170 = vector.extract_strided_slice %12 {offsets = [488, 0], sizes = [8, 128], strides = [1, 1]} : vector<512x128xbf16> to vector<8x128xbf16>
    %171 = vector.extract_strided_slice %12 {offsets = [504, 0], sizes = [8, 128], strides = [1, 1]} : vector<512x128xbf16> to vector<8x128xbf16>
    %172 = tpu.concatenate %163, %164, %165, %166, %167, %168, %169, %170, %171 in 0 : vector<8x128xbf16>, vector<8x128xbf16>, vector<8x128xbf16>, vector<8x128xbf16>, vector<8x128xbf16>, vector<8x128xbf16>, vector<8x128xbf16>, vector<8x128xbf16>, vector<8x128xbf16> -> vector<72x128xbf16>
    %173 = tpu.concatenate %22, %32, %42, %52, %62, %72, %82, %92, %102, %112, %122, %132, %142, %152, %162, %172 in 1 : vector<72x128xbf16>, vector<72x128xbf16>, vector<72x128xbf16>, vector<72x128xbf16>, vector<72x128xbf16>, vector<72x128xbf16>, vector<72x128xbf16>, vector<72x128xbf16>, vector<72x128xbf16>, vector<72x128xbf16>, vector<72x128xbf16>, vector<72x128xbf16>, vector<72x128xbf16>, vector<72x128xbf16>, vector<72x128xbf16>, vector<72x128xbf16> -> vector<72x2048xbf16>
    %c0_10 = arith.constant 0 : index
    %c0_11 = arith.constant 0 : index
    %174 = vector.load %arg2[%c0_10, %c0_11] : memref<2048x128xbf16, #tpu.memory_space<vmem>>, vector<2048x128xbf16>
    %cst_12 = arith.constant dense<0.000000e+00> : vector<72x128xf32>
    %175 = tpu.matmul %173, %174, %cst_12 {dimension_numbers = #tpu.dot_dimension_numbers<[1], [0], [0], [1], [0, 0, 1, 1], [], []>} : vector<72x2048xbf16>, vector<2048x128xbf16>, vector<72x128xf32> -> vector<72x128xf32>
    %176 = vector.broadcast %1 : vector<1x128xf32> to vector<72x128xf32>
    %177 = arith.addf %175, %176 : vector<72x128xf32>
    %cst_13 = arith.constant 0.000000e+00 : f32
    %178 = vector.broadcast %cst_13 : f32 to vector<72x128xf32>
    %179 = arith.maximumf %177, %178 : vector<72x128xf32>
    %180 = arith.truncf %179 : vector<72x128xf32> to vector<72x128xbf16>
    %181 = vector.extract_strided_slice %180 {offsets = [0, 0], sizes = [8, 128], strides = [1, 1]} : vector<72x128xbf16> to vector<8x128xbf16>
    %182 = vector.extract_strided_slice %180 {offsets = [8, 0], sizes = [8, 128], strides = [1, 1]} : vector<72x128xbf16> to vector<8x128xbf16>
    %183 = vector.extract_strided_slice %180 {offsets = [16, 0], sizes = [8, 128], strides = [1, 1]} : vector<72x128xbf16> to vector<8x128xbf16>
    %184 = vector.extract_strided_slice %180 {offsets = [24, 0], sizes = [8, 128], strides = [1, 1]} : vector<72x128xbf16> to vector<8x128xbf16>
    %185 = vector.extract_strided_slice %180 {offsets = [32, 0], sizes = [8, 128], strides = [1, 1]} : vector<72x128xbf16> to vector<8x128xbf16>
    %186 = vector.extract_strided_slice %180 {offsets = [40, 0], sizes = [8, 128], strides = [1, 1]} : vector<72x128xbf16> to vector<8x128xbf16>
    %187 = vector.extract_strided_slice %180 {offsets = [48, 0], sizes = [8, 128], strides = [1, 1]} : vector<72x128xbf16> to vector<8x128xbf16>
    %188 = vector.extract_strided_slice %180 {offsets = [56, 0], sizes = [8, 128], strides = [1, 1]} : vector<72x128xbf16> to vector<8x128xbf16>
    %189 = vector.extract_strided_slice %180 {offsets = [64, 0], sizes = [8, 128], strides = [1, 1]} : vector<72x128xbf16> to vector<8x128xbf16>
    %190 = tpu.concatenate %181, %182, %183, %184, %185, %186, %187, %188, %189 in 1 : vector<8x128xbf16>, vector<8x128xbf16>, vector<8x128xbf16>, vector<8x128xbf16>, vector<8x128xbf16>, vector<8x128xbf16>, vector<8x128xbf16>, vector<8x128xbf16>, vector<8x128xbf16> -> vector<8x1152xbf16>
    %c0_14 = arith.constant 0 : index
    %c0_15 = arith.constant 0 : index
    %191 = vector.load %arg3[%c0_14, %c0_15] : memref<1152x128xbf16, #tpu.memory_space<vmem>>, vector<1152x128xbf16>
    %cst_16 = arith.constant dense<0.000000e+00> : vector<8x128xf32>
    %192 = tpu.matmul %190, %191, %cst_16 {dimension_numbers = #tpu.dot_dimension_numbers<[1], [0], [0], [1], [0, 0, 1, 1], [], []>} : vector<8x1152xbf16>, vector<1152x128xbf16>, vector<8x128xf32> -> vector<8x128xf32>
    %193 = vector.broadcast %2 : vector<1x128xf32> to vector<8x128xf32>
    %194 = arith.addf %192, %193 : vector<8x128xf32>
    %cst_17 = arith.constant 0.000000e+00 : f32
    %195 = vector.broadcast %cst_17 : f32 to vector<8x128xf32>
    %196 = arith.maximumf %194, %195 : vector<8x128xf32>
    %197 = arith.truncf %196 : vector<8x128xf32> to vector<8x128xbf16>
    %c0_18 = arith.constant 0 : index
    %c0_19 = arith.constant 0 : index
    %198 = vector.load %arg4[%c0_18, %c0_19] : memref<128x512xbf16, #tpu.memory_space<vmem>>, vector<128x512xbf16>
    %cst_20 = arith.constant dense<0.000000e+00> : vector<8x512xf32>
    %199 = tpu.matmul %197, %198, %cst_20 {dimension_numbers = #tpu.dot_dimension_numbers<[1], [0], [0], [1], [0, 0, 1, 1], [], []>} : vector<8x128xbf16>, vector<128x512xbf16>, vector<8x512xf32> -> vector<8x512xf32>
    %200 = vector.broadcast %3 : vector<1x512xf32> to vector<8x512xf32>
    %201 = arith.addf %199, %200 : vector<8x512xf32>
    %cst_21 = arith.constant 0.000000e+00 : f32
    %202 = vector.broadcast %cst_21 : f32 to vector<8x512xf32>
    %203 = arith.maximumf %201, %202 : vector<8x512xf32>
    %204 = arith.truncf %203 : vector<8x512xf32> to vector<8x512xbf16>
    %c0_22 = arith.constant 0 : index
    %c0_23 = arith.constant 0 : index
    %205 = vector.load %arg5[%c0_22, %c0_23] : memref<512x128xbf16, #tpu.memory_space<vmem>>, vector<512x128xbf16>
    %cst_24 = arith.constant dense<0.000000e+00> : vector<8x128xf32>
    %206 = tpu.matmul %204, %205, %cst_24 {dimension_numbers = #tpu.dot_dimension_numbers<[1], [0], [0], [1], [0, 0, 1, 1], [], []>} : vector<8x512xbf16>, vector<512x128xbf16>, vector<8x128xf32> -> vector<8x128xf32>
    %207 = vector.broadcast %4 : vector<1x128xf32> to vector<8x128xf32>
    %208 = arith.addf %206, %207 : vector<8x128xf32>
    %c0_25 = arith.constant 0 : index
    %c0_26 = arith.constant 0 : index
    %209 = vector.load %arg7[%c0_25, %c0_26] : memref<8x128xf32, #tpu.memory_space<vmem>>, vector<8x128xf32>
    tpu.vector_store %arg7[%c0_25, %c0_26], %208 {strides = array<i32>} : memref<8x128xf32, #tpu.memory_space<vmem>>, vector<8x128xf32>,
    return
  }
}

</mosaic_0001>

<bundles_post_ra>
// kernel: dqn_forward.1
= control target key start
LH: loop header
LB: loop body
LE: loop exit
PB: predicated region body
PF: predicated region fallthrough
CT: control target
= control target key end

     0   :  { %v5493_v0 = vmov 0   ;;  %vm938_vm0 = vcmask 1043456   ;;  %vm5495_vm1 = vmmov 0   ;;  %s7188_s1 = inlined_call_operand.vmem [shape: bf16[256,128], index: 1, kind: input, shape index: {}]   ;;  %s7189_s0 = inlined_call_operand.vmem [shape: bf16[512,256], index: 0, kind: input, shape index: {}]   ;;  %s7190_s2 = inlined_call_operand.vmem [shape: bf16[2048,128], index: 2, kind: input, shape index: {}]   ;;  %s7191_s6 = inlined_call_operand.vmem [shape: f32[8,512], index: 6, kind: input, shape index: {}]   ;;  %s7192_s3 = inlined_call_operand.vmem [shape: bf16[1152,128], index: 3, kind: input, shape index: {}]   ;;  %s7193_s4 = inlined_call_operand.vmem [shape: bf16[128,512], index: 4, kind: input, shape index: {}]   ;;  %s7194_s5 = inlined_call_operand.vmem [shape: bf16[512,128], index: 5, kind: input, shape index: {}]   ;;  %s7195_s7 = inlined_call_operand.vmem [shape: f32[8,128], index: 7, kind: output, shape index: {}]  }
   0x1   :  { %545 = vmatprep.subr.bf16.mxu0 %v5493_v0  ;;  %v5100_v1 = vld [vmem:[%s7188_s1 + $0x38] sm:$0xff]   ;;  %v5101_v2 = vld [vmem:[%s7188_s1 + $0x30] sm:$0xff]   ;;  %v5102_v3 = vld [vmem:[%s7188_s1 + $0x28] sm:$0xff]  }
   0x2   :  { %546 = vmatpush1.bf16.msra.mxu0 %v5100_v1  ;;  %v5103_v4 = vld [vmem:[%s7188_s1 + $0x20] sm:$0xff]   ;;  %v5104_v5 = vld [vmem:[%s7188_s1 + $0x18] sm:$0xff]   ;;  %v5105_v7 = vld [vmem:[%s7188_s1 + $0x10] sm:$0xff]  }
   0x3   :  { %547 = vmatprep.subr.bf16.mxu0 %v5493_v0  ;;  %v5118_v6 = vld [vmem:[%s7189_s0 + $0x4] ss:$8 sps:$4 sm:$0xff]   ;;  %v5108_v10 = vld [vmem:[%s7188_s1 + $0x78] sm:$0xff]   ;;  %v5109_v11 = vld [vmem:[%s7188_s1 + $0x70] sm:$0xff]  }
   0x4   :  { %577 = vmatprep.mubr.bf16.mxu0 %v5118_v6  ;;  %v5106_v8 = vld [vmem:[%s7188_s1 + $0x8] sm:$0xff]   ;;  %v5107_v9 = vld [vmem:[%s7188_s1] sm:$0xff]   ;;  %v5112_v14 = vld [vmem:[%s7188_s1 + $0x58] sm:$0xff]  }
   0x5   :  { %v5110_v12 = vld [vmem:[%s7188_s1 + $0x68] sm:$0xff]   ;;  %v5111_v13 = vld [vmem:[%s7188_s1 + $0x60] sm:$0xff]   ;;  %v5113_v15 = vld [vmem:[%s7188_s1 + $0x50] sm:$0xff]  }
   0x6   :  { %548 = vmatpush1.bf16.msra.mxu0 %v5101_v2  ;;  %v5114_v16 = vld [vmem:[%s7188_s1 + $0x48] sm:$0xff]   ;;  %v5115_v17 = vld [vmem:[%s7188_s1 + $0x40] sm:$0xff]   ;;  %v5119_v19 = vld [vmem:[%s7189_s0 + $0x14] ss:$8 sps:$4 sm:$0xff]  }
   0x7   :  { %549 = vmatprep.subr.bf16.mxu0 %v5493_v0  ;;  %v5116_v18 = vld [vmem:[%s7189_s0] ss:$8 sps:$4 sm:$0xff]   ;;  %v5121_v20 = vld [vmem:[%s7189_s0 + $0x10] ss:$8 sps:$4 sm:$0xff]   ;;  %v5122_v21 = vld [vmem:[%s7189_s0 + $0x24] ss:$8 sps:$4 sm:$0xff]  }
   0x8   :  { %v5124_v22 = vld [vmem:[%s7189_s0 + $0x20] ss:$8 sps:$4 sm:$0xff]   ;;  %v5125_v23 = vld [vmem:[%s7189_s0 + $0x34] ss:$8 sps:$4 sm:$0xff]   ;;  %v5127_v24 = vld [vmem:[%s7189_s0 + $0x30] ss:$8 sps:$4 sm:$0xff]  }
   0x9   :  { %v5128_v25 = vld [vmem:[%s7189_s0 + $0x44] ss:$8 sps:$4 sm:$0xff]   ;;  %v5130_v26 = vld [vmem:[%s7189_s0 + $0x40] ss:$8 sps:$4 sm:$0xff]   ;;  %v5131_v27 = vld [vmem:[%s7189_s0 + $0x54] ss:$8 sps:$4 sm:$0xff]  }
   0xa   :  { %550 = vmatpush1.bf16.msra.mxu0 %v5102_v3  ;;  %v5133_v28 = vld [vmem:[%s7189_s0 + $0x50] ss:$8 sps:$4 sm:$0xff]   ;;  %v5134_v29 = vld [vmem:[%s7189_s0 + $0x64] ss:$8 sps:$4 sm:$0xff]   ;;  %v5136_v31 = vld [vmem:[%s7189_s0 + $0x60] ss:$8 sps:$4 sm:$0xff]  }
   0xb   :  { %551 = vmatprep.subr.bf16.mxu0 %v5493_v0  ;;  %v5182_v30 = vld [vmem:[%s7190_s2 + $0x78] sm:$0xff]   ;;  %v5184_v34 = vld [vmem:[%s7190_s2 + $0x70] sm:$0xff]   ;;  %v5186_v36 = vld [vmem:[%s7190_s2 + $0x68] sm:$0xff]  }
   0xc   :  { %v5183_v32 = vld [vmem:[%s7190_s2 + $0x38] sm:$0xff]   ;;  %4568 = vmatprep.subr.bf16.mxu1 %v5182_v30  ;;  %v5185_v35 = vld [vmem:[%s7190_s2 + $0x30] sm:$0xff]   ;;  %v5187_v37 = vld [vmem:[%s7190_s2 + $0x28] sm:$0xff]  }
   0xd   :  { %v5137_v33 = vld [vmem:[%s7189_s0 + $0x74] ss:$8 sps:$4 sm:$0xff]   ;;  %4569 = vmatpush3.bf16.msra.mxu1 %v5183_v32  ;;  %v5139_v38 = vld [vmem:[%s7189_s0 + $0x70] ss:$8 sps:$4 sm:$0xff]   ;;  %v5140_v39 = vld [vmem:[%s7189_s0 + $0x84] ss:$8 sps:$4 sm:$0xff]  }
   0xe   :  { %552 = vmatpush1.bf16.msra.mxu0 %v5103_v4  ;;  %4570 = vmatprep.subr.bf16.mxu1 %v5184_v34  ;;  %v5142_v40 = vld [vmem:[%s7189_s0 + $0x80] ss:$8 sps:$4 sm:$0xff]   ;;  %v5143_v41 = vld [vmem:[%s7189_s0 + $0x94] ss:$8 sps:$4 sm:$0xff]   ;;  %v5145_v44 = vld [vmem:[%s7189_s0 + $0x90] ss:$8 sps:$4 sm:$0xff]  }
   0xf   :  { %553 = vmatprep.subr.bf16.mxu0 %v5493_v0  ;;  %v5188_v42 = vld [vmem:[%s7190_s2 + $0x60] sm:$0xff]   ;;  %v5190_v46 = vld [vmem:[%s7190_s2 + $0x58] sm:$0xff]   ;;  %v5192_v48 = vld [vmem:[%s7190_s2 + $0x50] sm:$0xff]  }
  0x10   :  { %v5189_v43 = vld [vmem:[%s7190_s2 + $0x20] sm:$0xff]   ;;  %v5191_v47 = vld [vmem:[%s7190_s2 + $0x18] sm:$0xff]   ;;  %v5193_v49 = vld [vmem:[%s7190_s2 + $0x10] sm:$0xff]  }
  0x11   :  { %4571 = vmatpush3.bf16.msra.mxu1 %v5185_v35  ;;  %v5146_v45 = vld [vmem:[%s7189_s0 + $0xa4] ss:$8 sps:$4 sm:$0xff]   ;;  %v5148_v50 = vld [vmem:[%s7189_s0 + $0xa0] ss:$8 sps:$4 sm:$0xff]   ;;  %v5149_v51 = vld [vmem:[%s7189_s0 + $0xb4] ss:$8 sps:$4 sm:$0xff]  }
  0x12   :  { %554 = vmatpush1.bf16.msra.mxu0 %v5104_v5  ;;  %4572 = vmatprep.subr.bf16.mxu1 %v5186_v36  ;;  %v5194_v52 = vld [vmem:[%s7190_s2 + $0x48] sm:$0xff]   ;;  %v5199_v54 = vld [vmem:[%s7190_s2 + $0x40] sm:$0xff]   ;;  %v5151_v56 = vld [vmem:[%s7189_s0 + $0xb0] ss:$8 sps:$4 sm:$0xff]  }
  0x13   :  { %555 = vmatprep.subr.bf16.mxu0 %v5493_v0  ;;  %v5195_v53 = vld [vmem:[%s7190_s2 + $0x8] sm:$0xff]   ;;  %v5200_v55 = vld [vmem:[%s7190_s2] sm:$0xff]   ;;  %v5155_v59 = vld [vmem:[%s7189_s0 + $0xd4] ss:$8 sps:$4 sm:$0xff]  }
  0x14   :  { %v5152_v57 = vld [vmem:[%s7189_s0 + $0xc4] ss:$8 sps:$4 sm:$0xff]   ;;  %v5154_v58 = vld [vmem:[%s7189_s0 + $0xc0] ss:$8 sps:$4 sm:$0xff]   ;;  %v5157_v60 = vld [vmem:[%s7189_s0 + $0xd0] ss:$8 sps:$4 sm:$0xff]  }
  0x15   :  { %4573 = vmatpush3.bf16.msra.mxu1 %v5187_v37  ;;  %v5158_v61 = vld [vmem:[%s7189_s0 + $0xe4] ss:$8 sps:$4 sm:$0xff]   ;;  %v5160_v62 = vld [vmem:[%s7189_s0 + $0xe0] ss:$8 sps:$4 sm:$0xff]   ;;  %v5161_v63 = vld [vmem:[%s7189_s0 + $0xf4] ss:$8 sps:$4 sm:$0xff]  }
  0x16   :  { %556 = vmatpush1.bf16.msra.mxu0 %v5105_v7  ;;  %4574 = vmatprep.subr.bf16.mxu1 %v5188_v42  ;;  %v5163_v1 = vld [vmem:[%s7189_s0 + $0xf0] ss:$8 sps:$4 sm:$0xff]   ;;  %v5164_v2 = vld [vmem:[%s7189_s0 + $0x104] ss:$8 sps:$4 sm:$0xff]   ;;  %v5166_v3 = vld [vmem:[%s7189_s0 + $0x100] ss:$8 sps:$4 sm:$0xff]  }
  0x17   :  { %557 = vmatprep.subr.bf16.mxu0 %v5493_v0  ;;  %v5167_v4 = vld [vmem:[%s7189_s0 + $0x114] ss:$8 sps:$4 sm:$0xff]   ;;  %v5169_v5 = vld [vmem:[%s7189_s0 + $0x110] ss:$8 sps:$4 sm:$0xff]   ;;  %v5170_v6 = vld [vmem:[%s7189_s0 + $0x124] ss:$8 sps:$4 sm:$0xff]  }
  0x18   :  { %v5172_v7 = vld [vmem:[%s7189_s0 + $0x120] ss:$8 sps:$4 sm:$0xff]  }
  0x19   :  { %4575 = vmatpush3.bf16.msra.mxu1 %v5189_v43  ;;  %v5212_v37 = vld [vmem:[%s7189_s0 + $0x1a0] ss:$8 sps:$4 sm:$0xff]   ;;  %v5221_v43 = vld [vmem:[%s7189_s0 + $0x1b4] ss:$8 sps:$4 sm:$0xff]  }
  0x1a   :  { %558 = vmatpush1.bf16.msra.mxu0 %v5106_v8  ;;  %4576 = vmatprep.subr.bf16.mxu1 %v5190_v46  ;;  %v5173_v8 = vld [vmem:[%s7189_s0 + $0x134] ss:$8 sps:$4 sm:$0xff]  }
  0x1b   :  { %559 = vmatprep.subr.bf16.mxu0 %v5493_v0 }
  0x1d   :  { %4577 = vmatpush3.bf16.msra.mxu1 %v5191_v47 }
  0x1e   :  { %560 = vmatpush1.bf16.msra.mxu0 %v5107_v9  ;;  %4578 = vmatprep.subr.bf16.mxu1 %v5192_v48  ;;  %v5175_v9 = vld [vmem:[%s7189_s0 + $0x130] ss:$8 sps:$4 sm:$0xff]  }
  0x1f   :  { %561 = vmatprep.subr.bf16.mxu0 %v5493_v0 }
  0x21   :  { %4579 = vmatpush3.bf16.msra.mxu1 %v5193_v49 }
  0x22   :  { %562 = vmatpush2.bf16.msra.mxu0 %v5108_v10  ;;  %4580 = vmatprep.subr.bf16.mxu1 %v5194_v52  ;;  %v5176_v10 = vld [vmem:[%s7189_s0 + $0x144] ss:$8 sps:$4 sm:$0xff]  }
  0x23   :  { %563 = vmatprep.subr.bf16.mxu0 %v5493_v0 }
  0x25   :  { %4581 = vmatpush3.bf16.msra.mxu1 %v5195_v53  ;;  %v5215_v53 = vld [vmem:[%s7190_s2 + $0xf0] sm:$0xff]  }
  0x26   :  { %564 = vmatpush2.bf16.msra.mxu0 %v5109_v11  ;;  %4582 = vmatprep.subr.bf16.mxu1 %v5199_v54  ;;  %v5178_v11 = vld [vmem:[%s7189_s0 + $0x140] ss:$8 sps:$4 sm:$0xff]   ;;  %v5224_v54 = vld [vmem:[%s7189_s0 + $0x1b0] ss:$8 sps:$4 sm:$0xff]  }
  0x27   :  { %565 = vmatprep.subr.bf16.mxu0 %v5493_v0 }
  0x29   :  { %4583 = vmatpush3.bf16.msra.mxu1 %v5200_v55 }
  0x2a   :  { %566 = vmatpush2.bf16.msra.mxu0 %v5110_v12  ;;  %v5179_v12 = vld [vmem:[%s7189_s0 + $0x154] ss:$8 sps:$4 sm:$0xff]  }
  0x2b   :  { %567 = vmatprep.subr.bf16.mxu0 %v5493_v0 }
  0x2e   :  { %568 = vmatpush2.bf16.msra.mxu0 %v5111_v13  ;;  %v5181_v13 = vld [vmem:[%s7189_s0 + $0x150] ss:$8 sps:$4 sm:$0xff]  }
  0x2f   :  { %569 = vmatprep.subr.bf16.mxu0 %v5493_v0 }
  0x32   :  { %570 = vmatpush2.bf16.msra.mxu0 %v5112_v14  ;;  %v5196_v14 = vld [vmem:[%s7189_s0 + $0x164] ss:$8 sps:$4 sm:$0xff]  }
  0x33   :  { %571 = vmatprep.subr.bf16.mxu0 %v5493_v0 }
  0x36   :  { %572 = vmatpush2.bf16.msra.mxu0 %v5113_v15  ;;  %v5198_v15 = vld [vmem:[%s7189_s0 + $0x160] ss:$8 sps:$4 sm:$0xff]  }
  0x37   :  { %573 = vmatprep.subr.bf16.mxu0 %v5493_v0 }
  0x3a   :  { %574 = vmatpush2.bf16.msra.mxu0 %v5114_v16  ;;  %v5201_v16 = vld [vmem:[%s7189_s0 + $0x174] ss:$8 sps:$4 sm:$0xff]  }
  0x3b   :  { %575 = vmatprep.subr.bf16.mxu0 %v5493_v0 }
  0x3e   :  { %576 = vmatpush2.bf16.msra.mxu0 %v5115_v17  ;;  %v5203_v17 = vld [vmem:[%s7189_s0 + $0x170] ss:$8 sps:$4 sm:$0xff]  }
  0x41   :  { %578 = vmatmul.mubr.bf16.vlgmr.msra.gmra.mxu0 %v5116_v18  ;;  %v5204_v18 = vld [vmem:[%s7189_s0 + $0x184] ss:$8 sps:$4 sm:$0xff]  }
  0x42   :  { %585 = vmatprep.mubr.bf16.mxu0 %v5119_v19  ;;  %v5206_v19 = vld [vmem:[%s7189_s0 + $0x180] ss:$8 sps:$4 sm:$0xff]  }
  0x49   :  { %586 = vmatmul.mubr.bf16.gmra.mxu0 %v5121_v20  ;;  %v5207_v20 = vld [vmem:[%s7189_s0 + $0x194] ss:$8 sps:$4 sm:$0xff]  }
  0x4a   :  { %593 = vmatprep.mubr.bf16.mxu0 %v5122_v21 }
  0x51   :  { %594 = vmatmul.mubr.bf16.gmra.mxu0 %v5124_v22  ;;  %v5213_v22 = vld [vmem:[%s7190_s2 + $0xf8] sm:$0xff]  }
  0x52   :  { %601 = vmatprep.mubr.bf16.mxu0 %v5125_v23  ;;  %4614 = vmatprep.subr.bf16.mxu1 %v5213_v22 }
  0x59   :  { %602 = vmatmul.mubr.bf16.gmra.mxu0 %v5127_v24  ;;  %v5807_v24 = vld [vmem:[%s7191_s6] ss:$0 sm:$0xff] }
  0x5a   :  { %609 = vmatprep.mubr.bf16.mxu0 %v5128_v25 }
  0x61   :  { %610 = vmatmul.mubr.bf16.gmra.mxu0 %v5130_v26  ;;  %v5209_v26 = vld [vmem:[%s7189_s0 + $0x190] ss:$8 sps:$4 sm:$0xff]  }
  0x62   :  { %617 = vmatprep.mubr.bf16.mxu0 %v5131_v27 }
  0x69   :  { %618 = vmatmul.mubr.bf16.gmra.mxu0 %v5133_v28  ;;  %v5210_v28 = vld [vmem:[%s7189_s0 + $0x1a4] ss:$8 sps:$4 sm:$0xff]  }
  0x6a   :  { %625 = vmatprep.mubr.bf16.mxu0 %v5134_v29 }
  0x71   :  { %626 = vmatmul.mubr.bf16.gmra.mxu0 %v5136_v31 }
  0x72   :  { %633 = vmatprep.mubr.bf16.mxu0 %v5137_v33 }
  0x79   :  { %634 = vmatmul.mubr.bf16.gmra.mxu0 %v5139_v38 }
  0x7a   :  { %641 = vmatprep.mubr.bf16.mxu0 %v5140_v39 }
  0x81   :  { %642 = vmatmul.mubr.bf16.gmra.mxu0 %v5142_v40 }
  0x82   :  { %649 = vmatprep.mubr.bf16.mxu0 %v5143_v41 }
  0x89   :  { %650 = vmatmul.mubr.bf16.gmra.mxu0 %v5145_v44 }
  0x8a   :  { %657 = vmatprep.mubr.bf16.mxu0 %v5146_v45 }
  0x91   :  { %658 = vmatmul.mubr.bf16.gmra.mxu0 %v5148_v50 }
  0x92   :  { %665 = vmatprep.mubr.bf16.mxu0 %v5149_v51  ;;  %v5214_v51 = vld [vmem:[%s7190_s2 + $0xb8] sm:$0xff]  }
  0x99   :  { %666 = vmatmul.mubr.bf16.gmra.mxu0 %v5151_v56 }
  0x9a   :  { %673 = vmatprep.mubr.bf16.mxu0 %v5152_v57 }
  0xa1   :  { %674 = vmatmul.mubr.bf16.gmra.mxu0 %v5154_v58 }
  0xa2   :  { %681 = vmatprep.mubr.bf16.mxu0 %v5155_v59 }
  0xa9   :  { %682 = vmatmul.mubr.bf16.gmra.mxu0 %v5157_v60  ;;  %v5216_v60 = vld [vmem:[%s7190_s2 + $0xb0] sm:$0xff]  }
  0xaa   :  { %689 = vmatprep.mubr.bf16.mxu0 %v5158_v61 }
  0xb1   :  { %690 = vmatmul.mubr.bf16.gmra.mxu0 %v5160_v62  ;;  %v5217_v62 = vld [vmem:[%s7190_s2 + $0xe8] sm:$0xff]  }
  0xb2   :  { %697 = vmatprep.mubr.bf16.mxu0 %v5161_v63 }
  0xb9   :  { %698 = vmatmul.mubr.bf16.gmra.mxu0 %v5163_v1 }
  0xba   :  { %705 = vmatprep.mubr.bf16.mxu0 %v5164_v2 }
  0xc1   :  { %706 = vmatmul.mubr.bf16.gmra.mxu0 %v5166_v3 }
  0xc2   :  { %713 = vmatprep.mubr.bf16.mxu0 %v5167_v4  ;;  %v5218_v4 = vld [vmem:[%s7190_s2 + $0xa8] sm:$0xff]  }
  0xc9   :  { %714 = vmatmul.mubr.bf16.gmra.mxu0 %v5169_v5 }
  0xca   :  { %721 = vmatprep.mubr.bf16.mxu0 %v5170_v6 }
  0xd1   :  { %722 = vmatmul.mubr.bf16.gmra.mxu0 %v5172_v7  ;;  %v5219_v7 = vld [vmem:[%s7190_s2 + $0xe0] sm:$0xff]  }
  0xd2   :  { %729 = vmatprep.mubr.bf16.mxu0 %v5173_v8 }
  0xd9   :  { %730 = vmatmul.mubr.bf16.gmra.mxu0 %v5175_v9 }
  0xda   :  { %737 = vmatprep.mubr.bf16.mxu0 %v5176_v10 }
  0xe1   :  { %738 = vmatmul.mubr.bf16.gmra.mxu0 %v5178_v11 }
  0xe2   :  { %745 = vmatprep.mubr.bf16.mxu0 %v5179_v12 }
  0xe9   :  { %746 = vmatmul.mubr.bf16.gmra.mxu0 %v5181_v13  ;;  %v5220_v13 = vld [vmem:[%s7190_s2 + $0xa0] sm:$0xff]  }
  0xea   :  { %753 = vmatprep.mubr.bf16.mxu0 %v5196_v14  ;;  %v5233_v14 = vld [vmem:[%s7189_s0 + $0x1c4] ss:$8 sps:$4 sm:$0xff]  }
  0xf1   :  { %754 = vmatmul.mubr.bf16.gmra.mxu0 %v5198_v15 }
  0xf2   :  { %761 = vmatprep.mubr.bf16.mxu0 %v5201_v16  ;;  %v5223_v16 = vld [vmem:[%s7190_s2 + $0xd8] sm:$0xff]  }
  0xf9   :  { %762 = vmatmul.mubr.bf16.gmra.mxu0 %v5203_v17  ;;  %v5231_v17 = vld [vmem:[%s7189_s0 + $0x1c0] ss:$8 sps:$4 sm:$0xff]  }
  0xfa   :  { %769 = vmatprep.mubr.bf16.mxu0 %v5204_v18 }
 0x101   :  { %v579_v21 = vpop.f32.mrf.mxu0  ;;  %770 = vmatmul.mubr.bf16.gmra.mxu0 %v5206_v19 }
 0x102   :  { %777 = vmatprep.mubr.bf16.mxu0 %v5207_v20  ;;  %v580_v30 = vadd.f32 %v579_v21, %v5807_v24  ;;  %v5225_v21 = vld [vmem:[%s7190_s2 + $0x98] sm:$0xff]  }
 0x103   :  { %v581_v23 = vpop.f32.mrf.mxu0 }
 0x104   :  { %v834_v34 = vmax.f32 %v580_v30, 0.0  ;;  %v5226_v23 = vld [vmem:[%s7190_s2 + $0xd0] sm:$0xff]  }
 0x105   :  { %v582_v25 = vpop.f32.mrf.mxu0  ;;  %v5239_v30 = vld [vmem:[%s7189_s0 + $0x1d4] ss:$8 sps:$4 sm:$0xff]  }
 0x106   :  { %v583_v27 = vadd.f32 %v582_v25, %v5807_v24 }
 0x107   :  { %v584_v29 = vpop.f32.mrf.mxu0 }
 0x108   :  { %v835_v32 = vmax.f32 %v583_v27, 0.0  ;;  %v5227_v29 = vld [vmem:[%s7190_s2 + $0x90] sm:$0xff]  }
 0x109   :  { %v587_v31 = vpop.f32.mrf.mxu0  ;;  %778 = vmatmul.mubr.bf16.gmra.mxu0 %v5209_v26 }
 0x10a   :  { %785 = vmatprep.mubr.bf16.mxu0 %v5210_v28  ;;  %v588_v35 = vadd.f32 %v587_v31, %v5807_v24  ;;  %v898_v38 = vpack.c.bf16 %v835_v32, %v834_v34  ;;  %v5228_v32 = vld [vmem:[%s7190_s2 + $0xc8] sm:$0xff]  }
 0x10b   :  { %v589_v33 = vpop.f32.mrf.mxu0 }
 0x10c   :  { %v836_v41 = vmax.f32 %v588_v35, 0.0  ;;  %v956_v46 = vrot.slane %v898_v38, 4  ;;  %v5237_v33 = vld [vmem:[%s7189_s0 + $0x1d0] ss:$8 sps:$4 sm:$0xff]  }
 0x10d   :  { %v590_v36 = vpop.f32.mrf.mxu0 }
 0x10e   :  { %v591_v39 = vadd.f32 %v590_v36, %v5807_v24 }
 0x10f   :  { %v592_v40 = vpop.f32.mrf.mxu0 }
 0x110   :  { %v837_v42 = vmax.f32 %v591_v39, 0.0  ;;  %v5230_v39 = vld [vmem:[%s7190_s2 + $0xc0] sm:$0xff]  }
 0x111   :  { %v595_v44 = vpop.f32.mrf.mxu0  ;;  %786 = vmatmul.mubr.bf16.gmra.mxu0 %v5212_v37  ;;  %v5229_v37 = vld [vmem:[%s7190_s2 + $0x88] sm:$0xff]  }
 0x112   :  { %v899_v45 = vpack.c.bf16 %v837_v42, %v836_v41  ;;  %793 = vmatprep.mubr.bf16.mxu0 %v5221_v43  ;;  %v596_v48 = vadd.f32 %v595_v44, %v5807_v24  ;;  %v5234_v44 = vld [vmem:[%s7190_s2 + $0x80] sm:$0xff]  }
 0x113   :  { %v597_v47 = vpop.f32.mrf.mxu0 }
 0x114   :  { %v968_v49 = vsel %vm938_vm0, %v956_v46, %v899_v45  ;;  %v931_v50 = vrot.slane %v899_v45, 4  ;;  %v838_v58 = vmax.f32 %v596_v48, 0.0  ;;  %v5235_v47 = vld [vmem:[%s7190_s2 + $0x178] sm:$0xff]   ;;  %v5244_v48 = vld [vmem:[%s7189_s0 + $0x1e0] ss:$8 sps:$4 sm:$0xff]  }
 0x115   :  { %v598_v52 = vpop.f32.mrf.mxu0  ;;  %2231 = vmatprep.mubr.bf16.mxu1 %v968_v49 }
 0x116   :  { %v599_v55 = vadd.f32 %v598_v52, %v5807_v24  ;;  %v941_v56 = vsel %vm938_vm0, %v898_v38, %v931_v50 }
 0x117   :  { %v600_v57 = vpop.f32.mrf.mxu0  ;;  %2232 = vmatmul.mubr.bf16.vlgmr.msra.gmra.mxu1 %v941_v56 }
 0x118   :  { %v839_v59 = vmax.f32 %v599_v55, 0.0  ;;  %4615 = vmatpush3.bf16.msra.mxu1 %v5214_v51 }
 0x119   :  { %v603_v61 = vpop.f32.mrf.mxu0  ;;  %4616 = vmatprep.subr.bf16.mxu1 %v5215_v53  ;;  %794 = vmatmul.mubr.bf16.gmra.mxu0 %v5224_v54 }
 0x11a   :  { %v5844_v63 = vpack.c.bf16 %v839_v59, %v838_v58  ;;  %v604_v2 = vadd.f32 %v603_v61, %v5807_v24  ;;  %801 = vmatprep.mubr.bf16.mxu0 %v5233_v14 }
 0x11b   :  { %v605_v1 = vpop.f32.mrf.mxu0 }
 0x11c   :  { %v958_v3 = vrot.slane %v5844_v63, 4  ;;  %4617 = vmatpush3.bf16.msra.mxu1 %v5216_v60  ;;  %v5853_v5 = vsel %vm938_vm0, %v931_v50, %v5844_v63  ;;  %v840_v11 = vmax.f32 %v604_v2, 0.0 }
 0x11d   :  { %v606_v6 = vpop.f32.mrf.mxu0  ;;  %4618 = vmatprep.subr.bf16.mxu1 %v5217_v62 }
 0x11e   :  { %v607_v8 = vadd.f32 %v606_v6, %v5807_v24  ;;  %v5862_v9 = vsel %vm938_vm0, %v899_v45, %v958_v3  ;;  %v5246_v45 = vld [vmem:[%s7189_s0 + $0x1e4] ss:$8 sps:$4 sm:$0xff]  }
 0x11f   :  { %v608_v10 = vpop.f32.mrf.mxu0 }
 0x120   :  { %v841_v12 = vmax.f32 %v607_v8, 0.0  ;;  %4619 = vmatpush3.bf16.msra.mxu1 %v5218_v4 }
 0x121   :  { %v611_v15 = vpop.f32.mrf.mxu0  ;;  %4620 = vmatprep.subr.bf16.mxu1 %v5219_v7  ;;  %802 = vmatmul.mubr.bf16.gmra.mxu0 %v5231_v17 }
 0x122   :  { %v5876_v18 = vpack.c.bf16 %v841_v12, %v840_v11  ;;  %v612_v20 = vadd.f32 %v611_v15, %v5807_v24  ;;  %809 = vmatprep.mubr.bf16.mxu0 %v5239_v30 }
 0x123   :  { %v613_v19 = vpop.f32.mrf.mxu0 }
 0x124   :  { %4621 = vmatpush3.bf16.msra.mxu1 %v5220_v13  ;;  %v842_v27 = vmax.f32 %v612_v20, 0.0 }
 0x125   :  { %v614_v22 = vpop.f32.mrf.mxu0  ;;  %4622 = vmatprep.subr.bf16.mxu1 %v5223_v16 }
 0x126   :  { %v615_v25 = vadd.f32 %v614_v22, %v5807_v24 }
 0x127   :  { %v616_v26 = vpop.f32.mrf.mxu0 }
 0x128   :  { %v843_v28 = vmax.f32 %v615_v25, 0.0  ;;  %4623 = vmatpush3.bf16.msra.mxu1 %v5225_v21 }
 0x129   :  { %v619_v31 = vpop.f32.mrf.mxu0  ;;  %4624 = vmatprep.subr.bf16.mxu1 %v5226_v23  ;;  %810 = vmatmul.mubr.bf16.gmra.mxu0 %v5237_v33 }
 0x12a   :  { %v902_v34 = vpack.c.bf16 %v843_v28, %v842_v27  ;;  %v620_v36 = vadd.f32 %v619_v31, %v5807_v24  ;;  %817 = vmatprep.mubr.bf16.mxu0 %v5246_v45 }
 0x12b   :  { %v621_v35 = vpop.f32.mrf.mxu0 }
 0x12c   :  { %4625 = vmatpush3.bf16.msra.mxu1 %v5227_v29  ;;  %v844_v42 = vmax.f32 %v620_v36, 0.0  ;;  %v1036_v49 = vrot.slane %v902_v34, 4 }
 0x12d   :  { %v622_v38 = vpop.f32.mrf.mxu0  ;;  %4626 = vmatprep.subr.bf16.mxu1 %v5228_v32 }
 0x12e   :  { %v623_v40 = vadd.f32 %v622_v38, %v5807_v24  ;;  %v996_v38 = vrot.slane %v5876_v18, 4 }
 0x12f   :  { %v624_v41 = vpop.f32.mrf.mxu0 }
 0x130   :  { %v845_v43 = vmax.f32 %v623_v40, 0.0  ;;  %4627 = vmatpush3.bf16.msra.mxu1 %v5229_v37 }
 0x131   :  { %v627_v46 = vpop.f32.mrf.mxu0  ;;  %4628 = vmatprep.subr.bf16.mxu1 %v5230_v39  ;;  %818 = vmatmul.mubr.bf16.gmra.mxu0 %v5244_v48 }
 0x132   :  { %v903_v50 = vpack.c.bf16 %v845_v43, %v844_v42  ;;  %v628_v53 = vadd.f32 %v627_v46, %v5807_v24 }
 0x133   :  { %v629_v51 = vpop.f32.mrf.mxu0 }
 0x134   :  { %v1012_v52 = vrot.slane %v903_v50, 4  ;;  %4629 = vmatpush3.bf16.msra.mxu1 %v5234_v44  ;;  %v5920_v54 = vsel %vm938_vm0, %v1036_v49, %v903_v50  ;;  %v846_v59 = vmax.f32 %v628_v53, 0.0 }
 0x135   :  { %v630_v55 = vpop.f32.mrf.mxu0  ;;  %4660 = vmatprep.subr.bf16.mxu1 %v5235_v47 }
 0x136   :  { %v631_v56 = vadd.f32 %v630_v55, %v5807_v24  ;;  %v5924_v57 = vsel %vm938_vm0, %v902_v34, %v1012_v52 }
 0x137   :  { %v632_v58 = vpop.f32.mrf.mxu0 }
 0x138   :  { %v847_v60 = vmax.f32 %v631_v56, 0.0 }
 0x139   :  { %v635_v61 = vpop.f32.mrf.mxu0 }
 0x13a   :  { %v5926_v62 = vpack.c.bf16 %v847_v60, %v846_v59  ;;  %v636_v2 = vadd.f32 %v635_v61, %v5807_v24 }
 0x13b   :  { %v637_v1 = vpop.f32.mrf.mxu0 }
 0x13c   :  { %v1038_v4 = vrot.slane %v5926_v62, 4  ;;  %v5932_v6 = vsel %vm938_vm0, %v1012_v52, %v5926_v62  ;;  %v848_v12 = vmax.f32 %v636_v2, 0.0 }
 0x13d   :  { %v638_v7 = vpop.f32.mrf.mxu0 }
 0x13e   :  { %v639_v8 = vadd.f32 %v638_v7, %v5807_v24  ;;  %v5938_v10 = vsel %vm938_vm0, %v903_v50, %v1038_v4 }
 0x13f   :  { %v640_v11 = vpop.f32.mrf.mxu0 }
 0x140   :  { %v849_v13 = vmax.f32 %v639_v8, 0.0 }
 0x141   :  { %v643_v14 = vpop.f32.mrf.mxu0 }
 0x142   :  { %v5940_v15 = vpack.c.bf16 %v849_v13, %v848_v12  ;;  %v644_v17 = vadd.f32 %v643_v14, %v5807_v24 }
 0x143   :  { %v645_v16 = vpop.f32.mrf.mxu0 }
 0x144   :  { %v850_v22 = vmax.f32 %v644_v17, 0.0 }
 0x145   :  { %v646_v19 = vpop.f32.mrf.mxu0 }
 0x146   :  { %v647_v20 = vadd.f32 %v646_v19, %v5807_v24  ;;  %v5270_v19 = vld [vmem:[%s7189_s0 + $0x1f4] ss:$8 sps:$4 sm:$0xff]  }
 0x147   :  { %v648_v21 = vpop.f32.mrf.mxu0  ;;  %825 = vmatprep.mubr.bf16.mxu0 %v5270_v19 }
 0x148   :  { %v851_v23 = vmax.f32 %v647_v20, 0.0  ;;  %v5268_v21 = vld [vmem:[%s7189_s0 + $0x1f0] ss:$8 sps:$4 sm:$0xff]  }
 0x149   :  { %v651_v25 = vpop.f32.mrf.mxu0  ;;  %826 = vmatmul.mubr.bf16.gmra.mxu0 %v5268_v21 }
 0x14a   :  { %v906_v26 = vpack.c.bf16 %v851_v23, %v850_v22  ;;  %v652_v28 = vadd.f32 %v651_v25, %v5807_v24 }
 0x14b   :  { %v653_v27 = vpop.f32.mrf.mxu0 }
 0x14c   :  { %v972_v29 = vsel %vm938_vm0, %v958_v3, %v906_v26  ;;  %v933_v30 = vrot.slane %v906_v26, 4  ;;  %v852_v35 = vmax.f32 %v652_v28, 0.0 }
 0x14d   :  { %v654_v31 = vpop.f32.mrf.mxu0  ;;  %2239 = vmatprep.mubr.bf16.mxu1 %v972_v29 }
 0x14e   :  { %v655_v32 = vadd.f32 %v654_v31, %v5807_v24  ;;  %v945_v33 = vsel %vm938_vm0, %v5844_v63, %v933_v30 }
 0x14f   :  { %v656_v34 = vpop.f32.mrf.mxu0  ;;  %2240 = vmatmul.mubr.bf16.gmra.mxu1 %v945_v33 }
 0x150   :  { %v853_v36 = vmax.f32 %v655_v32, 0.0 }
 0x151   :  { %v659_v37 = vpop.f32.mrf.mxu0 }
 0x152   :  { %v907_v39 = vpack.c.bf16 %v853_v36, %v852_v35  ;;  %v660_v41 = vadd.f32 %v659_v37, %v5807_v24 }
 0x153   :  { %v661_v40 = vpop.f32.mrf.mxu0 }
 0x154   :  { %v960_v3 = vrot.slane %v907_v39, 4  ;;  %v5954_v42 = vsel %vm938_vm0, %v996_v38, %v907_v39  ;;  %v5957_v43 = vsel %vm938_vm0, %v933_v30, %v907_v39  ;;  %v854_v48 = vmax.f32 %v660_v41, 0.0 }
 0x155   :  { %v662_v44 = vpop.f32.mrf.mxu0  ;;  %v1076_v38 = vrot.slane %v5940_v15, 4 }
 0x156   :  { %v663_v63 = vadd.f32 %v662_v44, %v5807_v24  ;;  %v5962_v45 = vsel %vm938_vm0, %v5876_v18, %v960_v3  ;;  %v5965_v46 = vsel %vm938_vm0, %v906_v26, %v960_v3 }
 0x157   :  { %v664_v47 = vpop.f32.mrf.mxu0 }
 0x158   :  { %v855_v49 = vmax.f32 %v663_v63, 0.0 }
 0x159   :  { %v667_v50 = vpop.f32.mrf.mxu0 }
 0x15a   :  { %v5967_v51 = vpack.c.bf16 %v855_v49, %v854_v48  ;;  %v668_v53 = vadd.f32 %v667_v50, %v5807_v24 }
 0x15b   :  { %v669_v52 = vpop.f32.mrf.mxu0 }
 0x15c   :  { %v5972_v55 = vsel %vm938_vm0, %v960_v3, %v5967_v51  ;;  %v5975_v56 = vrot.slane %v5967_v51, 4  ;;  %v856_v61 = vmax.f32 %v668_v53, 0.0 }
 0x15d   :  { %v670_v18 = vpop.f32.mrf.mxu0  ;;  %2247 = vmatprep.mubr.bf16.mxu1 %v5972_v55 }
 0x15e   :  { %v671_v58 = vadd.f32 %v670_v18, %v5807_v24  ;;  %v5981_v59 = vsel %vm938_vm0, %v907_v39, %v5975_v56 }
 0x15f   :  { %v672_v60 = vpop.f32.mrf.mxu0  ;;  %2248 = vmatmul.mubr.bf16.gmra.mxu1 %v5981_v59 }
 0x160   :  { %v857_v1 = vmax.f32 %v671_v58, 0.0 }
 0x161   :  { %v675_v2 = vpop.f32.mrf.mxu0 }
 0x162   :  { %v5984_v7 = vpack.c.bf16 %v857_v1, %v856_v61  ;;  %v676_v11 = vadd.f32 %v675_v2, %v5807_v24 }
 0x163   :  { %v677_v8 = vpop.f32.mrf.mxu0 }
 0x164   :  { %v5990_v12 = vsel %vm938_vm0, %v5975_v56, %v5984_v7  ;;  %v983_v13 = vrot.slane %v5984_v7, 4  ;;  %v858_v22 = vmax.f32 %v676_v11, 0.0 }
 0x165   :  { %v678_v14 = vpop.f32.mrf.mxu0 }
 0x166   :  { %v679_v16 = vadd.f32 %v678_v14, %v5807_v24  ;;  %v5998_v17 = vsel %vm938_vm0, %v5967_v51, %v983_v13 }
 0x167   :  { %v680_v20 = vpop.f32.mrf.mxu0 }
 0x168   :  { %v859_v23 = vmax.f32 %v679_v16, 0.0 }
 0x169   :  { %v683_v25 = vpop.f32.mrf.mxu0 }
 0x16a   :  { %v910_v26 = vpack.c.bf16 %v859_v23, %v858_v22  ;;  %v684_v28 = vadd.f32 %v683_v25, %v5807_v24 }
 0x16b   :  { %v685_v27 = vpop.f32.mrf.mxu0 }
 0x16c   :  { %v6010_v29 = vsel %vm938_vm0, %v1038_v4, %v910_v26  ;;  %v1014_v30 = vrot.slane %v910_v26, 4  ;;  %v860_v35 = vmax.f32 %v684_v28, 0.0 }
 0x16d   :  { %v686_v31 = vpop.f32.mrf.mxu0 }
 0x16e   :  { %v687_v32 = vadd.f32 %v686_v31, %v5807_v24  ;;  %v6015_v33 = vsel %vm938_vm0, %v5926_v62, %v1014_v30 }
 0x16f   :  { %v688_v34 = vpop.f32.mrf.mxu0 }
 0x170   :  { %v861_v36 = vmax.f32 %v687_v32, 0.0 }
 0x171   :  { %v691_v37 = vpop.f32.mrf.mxu0 }
 0x172   :  { %v911_v39 = vpack.c.bf16 %v861_v36, %v860_v35  ;;  %v692_v41 = vadd.f32 %v691_v37, %v5807_v24 }
 0x173   :  { %v693_v40 = vpop.f32.mrf.mxu0 }
 0x174   :  { %v1040_v4 = vrot.slane %v911_v39, 4  ;;  %v6020_v3 = vsel %vm938_vm0, %v1076_v38, %v911_v39  ;;  %v6023_v44 = vsel %vm938_vm0, %v1014_v30, %v911_v39  ;;  %v862_v50 = vmax.f32 %v692_v41, 0.0 }
 0x175   :  { %v694_v63 = vpop.f32.mrf.mxu0 }
 0x176   :  { %v695_v62 = vadd.f32 %v694_v63, %v5807_v24  ;;  %v6028_v47 = vsel %vm938_vm0, %v5940_v15, %v1040_v4  ;;  %v6031_v48 = vsel %vm938_vm0, %v910_v26, %v1040_v4 }
 0x177   :  { %v696_v49 = vpop.f32.mrf.mxu0 }
 0x178   :  { %v863_v52 = vmax.f32 %v695_v62, 0.0 }
 0x179   :  { %v699_v53 = vpop.f32.mrf.mxu0 }
 0x17a   :  { %v6033_v18 = vpack.c.bf16 %v863_v52, %v862_v50  ;;  %v700_v60 = vadd.f32 %v699_v53, %v5807_v24 }
 0x17b   :  { %v701_v58 = vpop.f32.mrf.mxu0 }
 0x17c   :  { %v6038_v61 = vsel %vm938_vm0, %v1040_v4, %v6033_v18  ;;  %v6041_v1 = vrot.slane %v6033_v18, 4  ;;  %v864_v14 = vmax.f32 %v700_v60, 0.0 }
 0x17d   :  { %v702_v15 = vpop.f32.mrf.mxu0 }
 0x17e   :  { %v703_v2 = vadd.f32 %v702_v15, %v5807_v24  ;;  %v6046_v8 = vsel %vm938_vm0, %v911_v39, %v6041_v1 }
 0x17f   :  { %v704_v11 = vpop.f32.mrf.mxu0 }
 0x180   :  { %v865_v16 = vmax.f32 %v703_v2, 0.0 }
 0x181   :  { %v707_v19 = vpop.f32.mrf.mxu0 }
 0x182   :  { %v6048_v20 = vpack.c.bf16 %v865_v16, %v864_v14  ;;  %v708_v22 = vadd.f32 %v707_v19, %v5807_v24 }
 0x183   :  { %v709_v21 = vpop.f32.mrf.mxu0 }
 0x184   :  { %v6054_v23 = vsel %vm938_vm0, %v6041_v1, %v6048_v20  ;;  %v1063_v25 = vrot.slane %v6048_v20, 4  ;;  %v866_v31 = vmax.f32 %v708_v22, 0.0 }
 0x185   :  { %v710_v26 = vpop.f32.mrf.mxu0 }
 0x186   :  { %v711_v27 = vadd.f32 %v710_v26, %v5807_v24  ;;  %v6062_v28 = vsel %vm938_vm0, %v6033_v18, %v1063_v25 }
 0x187   :  { %v712_v30 = vpop.f32.mrf.mxu0 }
 0x188   :  { %v867_v32 = vmax.f32 %v711_v27, 0.0 }
 0x189   :  { %v715_v34 = vpop.f32.mrf.mxu0 }
 0x18a   :  { %v914_v35 = vpack.c.bf16 %v867_v32, %v866_v31  ;;  %v716_v37 = vadd.f32 %v715_v34, %v5807_v24 }
 0x18b   :  { %v717_v36 = vpop.f32.mrf.mxu0 }
 0x18c   :  { %v962_v38 = vrot.slane %v914_v35, 4  ;;  %v6067_v39 = vsel %vm938_vm0, %v5975_v56, %v914_v35  ;;  %v868_v62 = vmax.f32 %v716_v37, 0.0 }
 0x18d   :  { %v718_v40 = vpop.f32.mrf.mxu0 }
 0x18e   :  { %v719_v41 = vadd.f32 %v718_v40, %v5807_v24  ;;  %v6072_v4 = vsel %vm938_vm0, %v5967_v51, %v962_v38 }
 0x18f   :  { %v720_v63 = vpop.f32.mrf.mxu0 }
 0x190   :  { %v869_v49 = vmax.f32 %v719_v41, 0.0  ;;  %v5236_v41 = vld [vmem:[%s7190_s2 + $0x138] sm:$0xff]  }
 0x191   :  { %v723_v50 = vpop.f32.mrf.mxu0 }
 0x192   :  { %v6074_v52 = vpack.c.bf16 %v869_v49, %v868_v62  ;;  %v724_v58 = vadd.f32 %v723_v50, %v5807_v24 }
 0x193   :  { %v725_v53 = vpop.f32.mrf.mxu0 }
 0x194   :  { %v980_v56 = vsel %vm938_vm0, %v962_v38, %v6074_v52  ;;  %v6080_v60 = vrot.slane %v6074_v52, 4  ;;  %v6086_v51 = vsel %vm938_vm0, %v983_v13, %v6074_v52  ;;  %v870_v19 = vmax.f32 %v724_v58, 0.0 }
 0x195   :  { %v726_v15 = vpop.f32.mrf.mxu0  ;;  %2255 = vmatprep.mubr.bf16.mxu1 %v980_v56 }
 0x196   :  { %v727_v2 = vadd.f32 %v726_v15, %v5807_v24  ;;  %v953_v11 = vsel %vm938_vm0, %v914_v35, %v6080_v60  ;;  %v6094_v14 = vsel %vm938_vm0, %v5984_v7, %v6080_v60 }
 0x197   :  { %v728_v16 = vpop.f32.mrf.mxu0  ;;  %2256 = vmatmul.mubr.bf16.gmra.mxu1 %v953_v11 }
 0x198   :  { %v871_v21 = vmax.f32 %v727_v2, 0.0  ;;  %v5241_v2 = vld [vmem:[%s7190_s2 + $0x130] sm:$0xff]   ;;  %v5242_v16 = vld [vmem:[%s7190_s2 + $0x168] sm:$0xff]  }
 0x199   :  { %v731_v22 = vpop.f32.mrf.mxu0 }
 0x19a   :  { %v6096_v26 = vpack.c.bf16 %v871_v21, %v870_v19  ;;  %v732_v13 = vadd.f32 %v731_v22, %v5807_v24 }
 0x19b   :  { %v733_v27 = vpop.f32.mrf.mxu0 }
 0x19c   :  { %v6100_v30 = vrot.slane %v6096_v26, 4  ;;  %v872_v32 = vmax.f32 %v732_v13, 0.0 }
 0x19d   :  { %v734_v31 = vpop.f32.mrf.mxu0 }
 0x19e   :  { %v735_v34 = vadd.f32 %v734_v31, %v5807_v24  ;;  %2263 = vmatprep.mubr.bf16.mxu1 %v6100_v30  ;;  %v5247_v31 = vld [vmem:[%s7190_s2 + $0x160] sm:$0xff]  }
 0x19f   :  { %v736_v7 = vpop.f32.mrf.mxu0  ;;  %2264 = vmatmul.mubr.bf16.gmra.mxu1 %v6096_v26 }
 0x1a0   :  { %v873_v35 = vmax.f32 %v735_v34, 0.0  ;;  %2303 = vmatprep.mubr.bf16.mxu1 %v5853_v5  ;;  %v5240_v5 = vld [vmem:[%s7190_s2 + $0x170] sm:$0xff]  }
 0x1a1   :  { %v739_v36 = vpop.f32.mrf.mxu0 }
 0x1a2   :  { %v6106_v37 = vpack.c.bf16 %v873_v35, %v872_v32  ;;  %v740_v38 = vadd.f32 %v739_v36, %v5807_v24  ;;  %v5248_v36 = vld [vmem:[%s7190_s2 + $0x120] sm:$0xff]  }
 0x1a3   :  { %v741_v40 = vpop.f32.mrf.mxu0 }
 0x1a4   :  { %v998_v63 = vrot.slane %v6106_v37, 4  ;;  %v6116_v62 = vsel %vm938_vm0, %v6100_v30, %v6106_v37  ;;  %v874_v50 = vmax.f32 %v740_v38, 0.0  ;;  %v5249_v38 = vld [vmem:[%s7190_s2 + $0x158] sm:$0xff]  }
 0x1a5   :  { %v742_v49 = vpop.f32.mrf.mxu0 }
 0x1a6   :  { %v743_v53 = vadd.f32 %v742_v49, %v5807_v24  ;;  %v6126_v58 = vsel %vm938_vm0, %v6096_v26, %v998_v63 }
 0x1a7   :  { %v744_v56 = vpop.f32.mrf.mxu0  ;;  %2304 = vmatmul.mubr.bf16.vlgmr.msra.gmra.mxu1 %v5862_v9  ;;  %v5243_v9 = vld [vmem:[%s7190_s2 + $0x128] sm:$0xff]  }
 0x1a8   :  { %v875_v15 = vmax.f32 %v743_v53, 0.0  ;;  %4661 = vmatpush3.bf16.msra.mxu1 %v5236_v41  ;;  %2311 = vmatprep.mubr.bf16.mxu1 %v5954_v42  ;;  %v6196_v56 = vsel %vm938_vm0, %v6080_v60, %v6096_v26  ;;  %v5254_v60 = vld [vmem:[%s7190_s2 + $0x108] sm:$0xff]   ;;  %v5255_v26 = vld [vmem:[%s7190_s2 + $0x140] sm:$0xff]  }
 0x1a9   :  { %v747_v11 = vpop.f32.mrf.mxu0  ;;  %4662 = vmatprep.subr.bf16.mxu1 %v5240_v5  ;;  %v5251_v5 = vld [vmem:[%s7190_s2 + $0x150] sm:$0xff]  }
 0x1aa   :  { %v6136_v19 = vpack.c.bf16 %v875_v15, %v874_v50  ;;  %v748_v21 = vadd.f32 %v747_v11, %v5807_v24  ;;  %v5252_v15 = vld [vmem:[%s7190_s2 + $0x110] sm:$0xff]  }
 0x1ab   :  { %v749_v22 = vpop.f32.mrf.mxu0 }
 0x1ac   :  { %4663 = vmatpush3.bf16.msra.mxu1 %v5241_v2  ;;  %v1042_v42 = vrot.slane %v6136_v19, 4  ;;  %v6146_v13 = vsel %vm938_vm0, %v6041_v1, %v6136_v19  ;;  %v876_v32 = vmax.f32 %v748_v21, 0.0  ;;  %v6215_v21 = vsel %vm938_vm0, %v6074_v52, %v6100_v30  ;;  %v5257_v52 = vld [vmem:[%s7190_s2 + $0x1f8] sm:$0xff]  }
 0x1ad   :  { %v750_v27 = vpop.f32.mrf.mxu0  ;;  %4664 = vmatprep.subr.bf16.mxu1 %v5242_v16 }
 0x1ae   :  { %v751_v34 = vadd.f32 %v750_v27, %v5807_v24  ;;  %v6156_v7 = vsel %vm938_vm0, %v6033_v18, %v1042_v42 }
 0x1af   :  { %2312 = vmatmul.mubr.bf16.gmra.mxu1 %v5962_v45  ;;  %v752_v35 = vpop.f32.mrf.mxu0  ;;  %v5250_v45 = vld [vmem:[%s7190_s2 + $0x118] sm:$0xff]  }
 0x1b0   :  { %v877_v1 = vmax.f32 %v751_v34, 0.0  ;;  %2319 = vmatprep.mubr.bf16.mxu1 %v5990_v12  ;;  %4665 = vmatpush3.bf16.msra.mxu1 %v5243_v9 }
 0x1b1   :  { %4666 = vmatprep.subr.bf16.mxu1 %v5247_v31  ;;  %v6166_v40 = vpop.f32.mrf.mxu0  ;;  %v5256_v31 = vld [vmem:[%s7190_s2 + $0x100] sm:$0xff]  }
 0x1b2   :  { %v6168_v18 = vpack.c.bf16 %v877_v1, %v876_v32 }
 0x1b3   :  { %v757_v41 = vpop.f32.mrf.mxu0 }
 0x1b4   :  { %4667 = vmatpush3.bf16.msra.mxu1 %v5248_v36  ;;  %v6174_v12 = vrot.slane %v6168_v18, 4  ;;  %v6180_v49 = vsel %vm938_vm0, %v1063_v25, %v6168_v18 }
 0x1b5   :  { %4668 = vmatprep.subr.bf16.mxu1 %v5249_v38  ;;  %v6185_v50 = vpop.f32.mrf.mxu0 }
 0x1b6   :  { %v6190_v53 = vsel %vm938_vm0, %v6048_v20, %v6174_v12  ;;  %v5253_v20 = vld [vmem:[%s7190_s2 + $0x148] sm:$0xff]  }
 0x1b7   :  { %2320 = vmatmul.mubr.bf16.gmra.mxu1 %v5998_v17  ;;  %v760_v25 = vpop.f32.mrf.mxu0 }
 0x1b8   :  { %2327 = vmatprep.mubr.bf16.mxu1 %v6196_v56  ;;  %4669 = vmatpush3.bf16.msra.mxu1 %v5250_v45 }
 0x1b9   :  { %4670 = vmatprep.subr.bf16.mxu1 %v5251_v5  ;;  %v763_v2 = vpop.f32.mrf.mxu0 }
 0x1ba   :  { %v764_v17 = vadd.f32 %v763_v2, %v5807_v24  ;;  %v5258_v2 = vld [vmem:[%s7190_s2 + $0x1b8] sm:$0xff]  }
 0x1bb   :  { %v765_v11 = vpop.f32.mrf.mxu0 }
 0x1bc   :  { %4671 = vmatpush3.bf16.msra.mxu1 %v5252_v15  ;;  %v880_v22 = vmax.f32 %v764_v17, 0.0  ;;  %v5259_v17 = vld [vmem:[%s7190_s2 + $0x1f0] sm:$0xff]  }
 0x1bd   :  { %4672 = vmatprep.subr.bf16.mxu1 %v5253_v20  ;;  %v766_v16 = vpop.f32.mrf.mxu0 }
 0x1be   :  { %v767_v9 = vadd.f32 %v766_v16, %v5807_v24 }
 0x1bf   :  { %2328 = vmatmul.mubr.bf16.gmra.mxu1 %v6215_v21  ;;  %v768_v27 = vpop.f32.mrf.mxu0 }
 0x1c0   :  { %2335 = vmatprep.mubr.bf16.mxu1 %v998_v63  ;;  %4673 = vmatpush3.bf16.msra.mxu1 %v5254_v60  ;;  %v881_v32 = vmax.f32 %v767_v9, 0.0  ;;  %v5261_v9 = vld [vmem:[%s7190_s2 + $0x1e8] sm:$0xff]  }
 0x1c1   :  { %4674 = vmatprep.subr.bf16.mxu1 %v5255_v26  ;;  %v771_v30 = vpop.f32.mrf.mxu0  ;;  %v5260_v26 = vld [vmem:[%s7190_s2 + $0x1b0] sm:$0xff]  }
 0x1c2   :  { %v6227_v34 = vpack.c.bf16 %v881_v32, %v880_v22  ;;  %v772_v35 = vadd.f32 %v771_v30, %v5807_v24 }
 0x1c3   :  { %v773_v1 = vpop.f32.mrf.mxu0 }
 0x1c4   :  { %4675 = vmatpush3.bf16.msra.mxu1 %v5256_v31  ;;  %v882_v36 = vmax.f32 %v772_v35, 0.0  ;;  %v5263_v35 = vld [vmem:[%s7190_s2 + $0x1e0] sm:$0xff]  }
 0x1c5   :  { %4706 = vmatprep.subr.bf16.mxu1 %v5257_v52  ;;  %v774_v63 = vpop.f32.mrf.mxu0 }
 0x1c6   :  { %v775_v38 = vadd.f32 %v774_v63, %v5807_v24 }
 0x1c7   :  { %2336 = vmatmul.mubr.bf16.gmra.mxu1 %v6106_v37  ;;  %v776_v41 = vpop.f32.mrf.mxu0 }
 0x1c8   :  { %2375 = vmatprep.mubr.bf16.mxu1 %v5920_v54  ;;  %v883_v45 = vmax.f32 %v775_v38, 0.0 }
 0x1c9   :  { %v779_v5 = vpop.f32.mrf.mxu0 }
 0x1ca   :  { %v922_v25 = vpack.c.bf16 %v883_v45, %v882_v36  ;;  %v780_v15 = vadd.f32 %v779_v5, %v5807_v24  ;;  %v5264_v5 = vld [vmem:[%s7190_s2 + $0x1a0] sm:$0xff]  }
 0x1cb   :  { %v781_v20 = vpop.f32.mrf.mxu0 }
 0x1cc   :  { %v884_v60 = vmax.f32 %v780_v15, 0.0  ;;  %v1102_v16 = vrot.slane %v922_v25, 4  ;;  %v756_v20 = vadd.f32 %v6166_v40, %v5807_v24  ;;  %v5266_v40 = vld [vmem:[%s7190_s2 + $0x198] sm:$0xff]  }
 0x1cd   :  { %v782_v11 = vpop.f32.mrf.mxu0 }
 0x1ce   :  { %v783_v37 = vadd.f32 %v782_v11, %v5807_v24 }
 0x1cf   :  { %2376 = vmatmul.mubr.bf16.vlgmr.msra.gmra.mxu1 %v5924_v57  ;;  %v784_v54 = vpop.f32.mrf.mxu0 }
 0x1d0   :  { %4707 = vmatpush3.bf16.msra.mxu1 %v5258_v2  ;;  %2383 = vmatprep.mubr.bf16.mxu1 %v6010_v29  ;;  %v885_v22 = vmax.f32 %v783_v37, 0.0  ;;  %v5262_v29 = vld [vmem:[%s7190_s2 + $0x1a8] sm:$0xff]  }
 0x1d1   :  { %4708 = vmatprep.subr.bf16.mxu1 %v5259_v17  ;;  %v787_v27 = vpop.f32.mrf.mxu0 }
 0x1d2   :  { %v923_v31 = vpack.c.bf16 %v885_v22, %v884_v60  ;;  %v788_v32 = vadd.f32 %v787_v27, %v5807_v24  ;;  %v878_v22 = vmax.f32 %v756_v20, 0.0 }
 0x1d3   :  { %v789_v57 = vpop.f32.mrf.mxu0 }
 0x1d4   :  { %4709 = vmatpush3.bf16.msra.mxu1 %v5260_v26  ;;  %v6254_v52 = vsel %vm938_vm0, %v1102_v16, %v923_v31  ;;  %v1092_v30 = vrot.slane %v923_v31, 4  ;;  %v886_v63 = vmax.f32 %v788_v32, 0.0 }
 0x1d5   :  { %4710 = vmatprep.subr.bf16.mxu1 %v5261_v9  ;;  %v790_v1 = vpop.f32.mrf.mxu0 }
 0x1d6   :  { %v791_v36 = vadd.f32 %v790_v1, %v5807_v24  ;;  %v6261_v38 = vsel %vm938_vm0, %v922_v25, %v1092_v30  ;;  %v5265_v25 = vld [vmem:[%s7190_s2 + $0x1d8] sm:$0xff]   ;;  %v5271_v1 = vld [vmem:[%s7190_s2 + $0x190] sm:$0xff]  }
 0x1d7   :  { %v4584_v41 = vpop.f32.mrf.mxu1  ;;  %2384 = vmatmul.mubr.bf16.gmra.mxu1 %v6015_v33  ;;  %v792_v45 = vpop.f32.mrf.mxu0  ;;  %v759_v33 = vadd.f32 %v6185_v50, %v5807_v24  ;;  %v5267_v50 = vld [vmem:[%s7190_s2 + $0x1d0] sm:$0xff]  }
 0x1d8   :  { %2391 = vmatprep.mubr.bf16.mxu1 %v6038_v61  ;;  %4711 = vmatpush3.bf16.msra.mxu1 %v5262_v29  ;;  %v887_v15 = vmax.f32 %v791_v36, 0.0 }
 0x1d9   :  { %v4585_v2 = vpop.f32.mrf.mxu1  ;;  %4712 = vmatprep.subr.bf16.mxu1 %v5263_v35  ;;  %v795_v17 = vpop.f32.mrf.mxu0  ;;  %v879_v27 = vmax.f32 %v759_v33, 0.0  ;;  %v5275_v33 = vld [vmem:[%s7190_s2 + $0x180] sm:$0xff]  }
 0x1da   :  { %v6275_v11 = vadd.f32 %v4585_v2, %v4584_v41  ;;  %v6277_v60 = vpack.c.bf16 %v887_v15, %v886_v63  ;;  %v796_v37 = vadd.f32 %v795_v17, %v5807_v24  ;;  %v5274_v15 = vld [vmem:[%s7190_s2 + $0x1c0] sm:$0xff]   ;;  %v1033_v2 = vsel %vm938_vm0, %v6136_v19, %v6174_v12  ;;  %v5322_v19 = vld [vmem:[%s7192_s3 + $0x78] sm:$0xff]  }
 0x1db   :  { %v797_v54 = vpop.f32.mrf.mxu0  ;;  %v6308_v36 = vpack.c.bf16 %v879_v27, %v878_v22  ;;  %4936 = vmatprep.subr.bf16.mxu0 %v5322_v19 }
 0x1dc   :  { %4713 = vmatpush3.bf16.msra.mxu1 %v5264_v5  ;;  %v1104_v26 = vrot.slane %v6277_v60, 4  ;;  %v6286_v16 = vsel %vm938_vm0, %v1092_v30, %v6277_v60  ;;  %v888_v32 = vmax.f32 %v796_v37, 0.0  ;;  %v1060_v30 = vsel %vm938_vm0, %v1042_v42, %v6168_v18  ;;  %v5273_v42 = vld [vmem:[%s7190_s2 + $0x188] sm:$0xff]   ;;  %v5276_v37 = vld [vmem:[%s7190_s2 + $0x278] sm:$0xff]  }
 0x1dd   :  { %4714 = vmatprep.subr.bf16.mxu1 %v5265_v25  ;;  %v798_v9 = vpop.f32.mrf.mxu0  ;;  %v6323_v25 = vrot.slane %v6308_v36, 4 }
 0x1de   :  { %v799_v57 = vadd.f32 %v798_v9, %v5807_v24  ;;  %v6295_v29 = vsel %vm938_vm0, %v923_v31, %v1104_v26  ;;  %v5272_v31 = vld [vmem:[%s7190_s2 + $0x1c8] sm:$0xff]  }
 0x1df   :  { %2392 = vmatmul.mubr.bf16.gmra.mxu1 %v6046_v8  ;;  %v800_v35 = vpop.f32.mrf.mxu0 }
 0x1e0   :  { %2399 = vmatprep.mubr.bf16.mxu1 %v1060_v30  ;;  %4715 = vmatpush3.bf16.msra.mxu1 %v5266_v40  ;;  %v889_v63 = vmax.f32 %v799_v57, 0.0 }
 0x1e1   :  { %4716 = vmatprep.subr.bf16.mxu1 %v5267_v50  ;;  %v803_v45 = vpop.f32.mrf.mxu0 }
 0x1e2   :  { %v6310_v41 = vpack.c.bf16 %v889_v63, %v888_v32  ;;  %v804_v5 = vadd.f32 %v803_v45, %v5807_v24  ;;  %v5324_v32 = vld [vmem:[%s7192_s3 + $0x38] sm:$0xff]   ;;  %v6345_v63 = vld [vmem:[%s7191_s6] ss:$0 sm:$0xff] }
 0x1e3   :  { %v805_v20 = vpop.f32.mrf.mxu0  ;;  %4937 = vmatpush3.bf16.msra.mxu0 %v5324_v32 }
 0x1e4   :  { %4717 = vmatpush3.bf16.msra.mxu1 %v5271_v1  ;;  %v890_v54 = vmax.f32 %v804_v5, 0.0 }
 0x1e5   :  { %4718 = vmatprep.subr.bf16.mxu1 %v5272_v31  ;;  %v806_v17 = vpop.f32.mrf.mxu0 }
 0x1e6   :  { %v807_v40 = vadd.f32 %v806_v17, %v5807_v24  ;;  %v5279_v17 = vld [vmem:[%s7190_s2 + $0x230] sm:$0xff]  }
 0x1e7   :  { %2400 = vmatmul.mubr.bf16.gmra.mxu1 %v1033_v2  ;;  %v808_v22 = vpop.f32.mrf.mxu0 }
 0x1e8   :  { %2407 = vmatprep.mubr.bf16.mxu1 %v6323_v25  ;;  %4719 = vmatpush3.bf16.msra.mxu1 %v5273_v42  ;;  %v891_v50 = vmax.f32 %v807_v40, 0.0  ;;  %v5280_v40 = vld [vmem:[%s7190_s2 + $0x268] sm:$0xff]  }
 0x1e9   :  { %4720 = vmatprep.subr.bf16.mxu1 %v5274_v15  ;;  %v811_v9 = vpop.f32.mrf.mxu0  ;;  %v5278_v15 = vld [vmem:[%s7190_s2 + $0x270] sm:$0xff]  }
 0x1ea   :  { %v926_v27 = vpack.c.bf16 %v891_v50, %v890_v54  ;;  %v812_v57 = vadd.f32 %v811_v9, %v5807_v24  ;;  %v5277_v24 = vld [vmem:[%s7190_s2 + $0x238] sm:$0xff]  }
 0x1eb   :  { %v813_v30 = vpop.f32.mrf.mxu0 }
 0x1ec   :  { %4721 = vmatpush3.bf16.msra.mxu1 %v5275_v33  ;;  %v892_v1 = vmax.f32 %v812_v57, 0.0  ;;  %v1144_v33 = vrot.slane %v926_v27, 4 }
 0x1ed   :  { %4752 = vmatprep.subr.bf16.mxu1 %v5276_v37  ;;  %v814_v35 = vpop.f32.mrf.mxu0 }
 0x1ee   :  { %v815_v31 = vadd.f32 %v6345_v63, %v814_v35  ;;  %v5283_v35 = vld [vmem:[%s7190_s2 + $0x220] sm:$0xff]  }
 0x1ef   :  { %2408 = vmatmul.mubr.bf16.gmra.mxu1 %v6308_v36  ;;  %v816_v45 = vpop.f32.mrf.mxu0 }
 0x1f0   :  { %2447 = vmatprep.mubr.bf16.mxu1 %v5932_v6  ;;  %v893_v42 = vmax.f32 %v815_v31, 0.0  ;;  %v5286_v45 = vld [vmem:[%s7190_s2 + $0x250] sm:$0xff]  }
 0x1f1   :  { %v819_v5 = vpop.f32.mrf.mxu0 }
 0x1f2   :  { %v927_v6 = vpack.c.bf16 %v893_v42, %v892_v1  ;;  %v820_v20 = vadd.f32 %v6345_v63, %v819_v5  ;;  %v5284_v1 = vld [vmem:[%s7190_s2 + $0x258] sm:$0xff]   ;;  %v6406_v42 = vsel %vm938_vm0, %v6174_v12, %v6308_v36  ;;  %v5287_v5 = vld [vmem:[%s7190_s2 + $0x210] sm:$0xff]   ;;  %v5289_v12 = vld [vmem:[%s7190_s2 + $0x208] sm:$0xff]  }
 0x1f3   :  { %v821_v2 = vpop.f32.mrf.mxu0 }
 0x1f4   :  { %v1134_v37 = vrot.slane %v927_v6, 4  ;;  %v894_v19 = vmax.f32 %v820_v20, 0.0  ;;  %v6371_v57 = vsel %vm938_vm0, %v1144_v33, %v927_v6  ;;  %v1078_v2 = vrot.slane %v6227_v34, 4 }
 0x1f5   :  { %v822_v54 = vpop.f32.mrf.mxu0  ;;  %v6435_v33 = vsel %vm938_vm0, %v6168_v18, %v6323_v25 }
 0x1f6   :  { %v823_v22 = vadd.f32 %v6345_v63, %v822_v54  ;;  %v6365_v50 = vsel %vm938_vm0, %v926_v27, %v1134_v37 }
 0x1f7   :  { %2448 = vmatmul.mubr.bf16.vlgmr.msra.gmra.mxu1 %v5938_v10  ;;  %v824_v9 = vpop.f32.mrf.mxu0  ;;  %v5281_v10 = vld [vmem:[%s7190_s2 + $0x228] sm:$0xff]  }
 0x1f8   :  { %4753 = vmatpush3.bf16.msra.mxu1 %v5277_v24  ;;  %2455 = vmatprep.mubr.bf16.mxu1 %v6020_v3  ;;  %v895_v32 = vmax.f32 %v823_v22, 0.0  ;;  %v5282_v3 = vld [vmem:[%s7190_s2 + $0x260] sm:$0xff]   ;;  %v5288_v24 = vld [vmem:[%s7190_s2 + $0x248] sm:$0xff]   ;;  %v5293_v9 = vld [vmem:[%s7190_s2 + $0x2b8] sm:$0xff]  }
 0x1f9   :  { %4754 = vmatprep.subr.bf16.mxu1 %v5278_v15  ;;  %v6418_v15 = vpop.f32.mrf.mxu1 }
 0x1fa   :  { %v6376_v30 = vpack.c.bf16 %v895_v32, %v894_v19  ;;  %v5292_v19 = vld [vmem:[%s7190_s2 + $0x2f8] sm:$0xff]  }
 0x1fb   :  { %v6426_v20 = vpop.f32.mrf.mxu1 }
 0x1fc   :  { %4755 = vmatpush3.bf16.msra.mxu1 %v5279_v17  ;;  %v1146_v27 = vrot.slane %v6376_v30, 4  ;;  %v5290_v17 = vld [vmem:[%s7190_s2 + $0x240] sm:$0xff]  }
 0x1fd   :  { %4756 = vmatprep.subr.bf16.mxu1 %v5280_v40 }
 0x1fe   :  { %v6390_v31 = vsel %vm938_vm0, %v927_v6, %v1146_v27  ;;  %v5339_v6 = vld [vmem:[%s7192_s3 + $0x30] sm:$0xff]  }
 0x1ff   :  { %2456 = vmatmul.mubr.bf16.gmra.mxu1 %v6028_v47  ;;  %v6394_v47 = vsel %vm938_vm0, %v1134_v37, %v6376_v30  ;;  %v5291_v37 = vld [vmem:[%s7190_s2 + $0x200] sm:$0xff]  }
 0x200   :  { %2463 = vmatprep.mubr.bf16.mxu1 %v6054_v23  ;;  %4757 = vmatpush3.bf16.msra.mxu1 %v5281_v10  ;;  %v5285_v23 = vld [vmem:[%s7190_s2 + $0x218] sm:$0xff]   ;;  %v5294_v10 = vld [vmem:[%s7190_s2 + $0x2f0] sm:$0xff]  }
 0x201   :  { %4758 = vmatprep.subr.bf16.mxu1 %v5282_v3  ;;  %v5295_v3 = vld [vmem:[%s7190_s2 + $0x2b0] sm:$0xff]  }
 0x204   :  { %4759 = vmatpush3.bf16.msra.mxu1 %v5283_v35 }
 0x205   :  { %4760 = vmatprep.subr.bf16.mxu1 %v5284_v1 }
 0x207   :  { %2464 = vmatmul.mubr.bf16.gmra.mxu1 %v6062_v28  ;;  %v5338_v28 = vld [vmem:[%s7192_s3 + $0x70] sm:$0xff]  }
 0x208   :  { %2471 = vmatprep.mubr.bf16.mxu1 %v6406_v42  ;;  %4761 = vmatpush3.bf16.msra.mxu1 %v5285_v23 }
 0x209   :  { %4762 = vmatprep.subr.bf16.mxu1 %v5286_v45  ;;  %4938 = vmatprep.subr.bf16.mxu0 %v5338_v28  ;;  %v5297_v45 = vld [vmem:[%s7190_s2 + $0x2a8] sm:$0xff]   ;;  %v827_v28 = vpop.f32.mrf.mxu0 }
 0x20a   :  { %4939 = vmatpush3.bf16.msra.mxu0 %v5339_v6  ;;  %v5345_v6 = vld [vmem:[%s7192_s3 + $0x28] sm:$0xff]  }
 0x20c   :  { %4763 = vmatpush3.bf16.msra.mxu1 %v5287_v5  ;;  %v5344_v5 = vld [vmem:[%s7192_s3 + $0x68] sm:$0xff]  }
 0x20d   :  { %4764 = vmatprep.subr.bf16.mxu1 %v5288_v24  ;;  %v5300_v24 = vld [vmem:[%s7190_s2 + $0x2d8] sm:$0xff]   ;;  %4940 = vmatprep.subr.bf16.mxu0 %v5344_v5 }
 0x20e   :  { %4941 = vmatpush3.bf16.msra.mxu0 %v5345_v6  ;;  %v5316_v5 = vld [vmem:[%s7190_s2 + $0x358] sm:$0xff]  }
 0x20f   :  { %v4590_v54 = vpop.f32.mrf.mxu1  ;;  %2472 = vmatmul.mubr.bf16.gmra.mxu1 %v6435_v33 }
 0x210   :  { %2479 = vmatprep.mubr.bf16.mxu1 %v1078_v2  ;;  %4765 = vmatpush3.bf16.msra.mxu1 %v5289_v12  ;;  %v829_v12 = vpop.f32.mrf.mxu0 }
 0x211   :  { %v4591_v40 = vpop.f32.mrf.mxu1  ;;  %4766 = vmatprep.subr.bf16.mxu1 %v5290_v17  ;;  %v5302_v17 = vld [vmem:[%s7190_s2 + $0x2d0] sm:$0xff]  }
 0x212   :  { %v6446_v18 = vadd.f32 %v4591_v40, %v4590_v54 }
 0x213   :  { %v6450_v22 = vpop.f32.mrf.mxu1 }
 0x214   :  { %4767 = vmatpush3.bf16.msra.mxu1 %v5291_v37  ;;  %v830_v37 = vpop.f32.mrf.mxu0 }
 0x215   :  { %4798 = vmatprep.subr.bf16.mxu1 %v5292_v19  ;;  %v6458_v32 = vpop.f32.mrf.mxu1  ;;  %v831_v40 = vadd.f32 %v6345_v63, %v830_v37  ;;  %v1123_v37 = vrot.slane %v6310_v41, 4 }
 0x216   :  { %v832_v19 = vpop.f32.mrf.mxu0 }
 0x217   :  { %2480 = vmatmul.mubr.bf16.gmra.mxu1 %v6227_v34 }
 0x218   :  { %2519 = vmatprep.mubr.bf16.mxu1 %v5957_v43  ;;  %v5296_v43 = vld [vmem:[%s7190_s2 + $0x2e8] sm:$0xff]  }
 0x21f   :  { %v4596_v35 = vpop.f32.mrf.mxu1  ;;  %2520 = vmatmul.mubr.bf16.vlgmr.msra.gmra.mxu1 %v5965_v46  ;;  %v5298_v46 = vld [vmem:[%s7190_s2 + $0x2e0] sm:$0xff]  }
 0x220   :  { %4799 = vmatpush3.bf16.msra.mxu1 %v5293_v9  ;;  %2527 = vmatprep.mubr.bf16.mxu1 %v6067_v39  ;;  %v5299_v39 = vld [vmem:[%s7190_s2 + $0x2a0] sm:$0xff]   ;;  %v5303_v9 = vld [vmem:[%s7190_s2 + $0x290] sm:$0xff]  }
 0x221   :  { %v4597_v1 = vpop.f32.mrf.mxu1  ;;  %4800 = vmatprep.subr.bf16.mxu1 %v5294_v10  ;;  %v897_v10 = vmax.f32 %v831_v40, 0.0 }
 0x222   :  { %v6468_v23 = vadd.f32 %v4597_v1, %v4596_v35  ;;  %v5311_v1 = vld [vmem:[%s7190_s2 + $0x330] sm:$0xff]  }
 0x224   :  { %4801 = vmatpush3.bf16.msra.mxu1 %v5295_v3  ;;  %v5304_v3 = vld [vmem:[%s7190_s2 + $0x2c8] sm:$0xff]  }
 0x225   :  { %4802 = vmatprep.subr.bf16.mxu1 %v5296_v43  ;;  %v5308_v43 = vld [vmem:[%s7190_s2 + $0x378] sm:$0xff]  }
 0x227   :  { %2528 = vmatmul.mubr.bf16.gmra.mxu1 %v6072_v4  ;;  %v828_v4 = vadd.f32 %v6345_v63, %v827_v28  ;;  %v5307_v63 = vld [vmem:[%s7190_s2 + $0x280] sm:$0xff]  }
 0x228   :  { %2535 = vmatprep.mubr.bf16.mxu1 %v6196_v56  ;;  %4803 = vmatpush3.bf16.msra.mxu1 %v5297_v45  ;;  %v5301_v56 = vld [vmem:[%s7190_s2 + $0x298] sm:$0xff]   ;;  %v5314_v45 = vld [vmem:[%s7190_s2 + $0x360] sm:$0xff]  }
 0x229   :  { %4804 = vmatprep.subr.bf16.mxu1 %v5298_v46  ;;  %v896_v54 = vmax.f32 %v828_v4, 0.0  ;;  %v5315_v46 = vld [vmem:[%s7190_s2 + $0x320] sm:$0xff]   ;;  %v5319_v4 = vld [vmem:[%s7190_s2 + $0x310] sm:$0xff]  }
 0x22b   :  { %v6506_v35 = vpack.c.bf16 %v897_v10, %v896_v54  ;;  %v5323_v54 = vld [vmem:[%s7190_s2 + $0x340] sm:$0xff]  }
 0x22c   :  { %4805 = vmatpush3.bf16.msra.mxu1 %v5299_v39  ;;  %v6556_v39 = vpop.f32.mrf.mxu1 }
 0x22d   :  { %4806 = vmatprep.subr.bf16.mxu1 %v5300_v24  ;;  %v5317_v24 = vld [vmem:[%s7190_s2 + $0x318] sm:$0xff]  }
 0x22f   :  { %2536 = vmatmul.mubr.bf16.gmra.mxu1 %v6215_v21  ;;  %v5305_v21 = vld [vmem:[%s7190_s2 + $0x288] sm:$0xff]  }
 0x230   :  { %2543 = vmatprep.mubr.bf16.mxu1 %v6254_v52  ;;  %4807 = vmatpush3.bf16.msra.mxu1 %v5301_v56  ;;  %v5306_v52 = vld [vmem:[%s7190_s2 + $0x2c0] sm:$0xff]   ;;  %v5320_v56 = vld [vmem:[%s7190_s2 + $0x348] sm:$0xff]  }
 0x231   :  { %4808 = vmatprep.subr.bf16.mxu1 %v5302_v17 }
 0x234   :  { %4809 = vmatpush3.bf16.msra.mxu1 %v5303_v9  ;;  %v5325_v9 = vld [vmem:[%s7190_s2 + $0x300] sm:$0xff]  }
 0x235   :  { %4810 = vmatprep.subr.bf16.mxu1 %v5304_v3  ;;  %v5326_v3 = vld [vmem:[%s7190_s2 + $0x3f8] sm:$0xff]  }
 0x237   :  { %2544 = vmatmul.mubr.bf16.gmra.mxu1 %v6261_v38  ;;  %v5309_v38 = vld [vmem:[%s7190_s2 + $0x338] sm:$0xff]  }
 0x238   :  { %2551 = vmatprep.mubr.bf16.mxu1 %v1104_v26  ;;  %4811 = vmatpush3.bf16.msra.mxu1 %v5305_v21  ;;  %v5310_v26 = vld [vmem:[%s7190_s2 + $0x370] sm:$0xff]  }
 0x239   :  { %4812 = vmatprep.subr.bf16.mxu1 %v5306_v52 }
 0x23c   :  { %4813 = vmatpush3.bf16.msra.mxu1 %v5307_v63 }
 0x23d   :  { %4844 = vmatprep.subr.bf16.mxu1 %v5308_v43 }
 0x23f   :  { %2552 = vmatmul.mubr.bf16.gmra.mxu1 %v6277_v60  ;;  %v5312_v60 = vld [vmem:[%s7190_s2 + $0x368] sm:$0xff]  }
 0x240   :  { %2591 = vmatprep.mubr.bf16.mxu1 %v5972_v55  ;;  %v5346_v55 = vld [vmem:[%s7192_s3 + $0x60] sm:$0xff]  }
 0x241   :  { %4942 = vmatprep.subr.bf16.mxu0 %v5346_v55  ;;  %v4589_v55 = vadd.f32 %v6426_v20, %v6418_v15 }
 0x247   :  { %2592 = vmatmul.mubr.bf16.vlgmr.msra.gmra.mxu1 %v5981_v59  ;;  %v5313_v59 = vld [vmem:[%s7190_s2 + $0x328] sm:$0xff]  }
 0x248   :  { %4845 = vmatpush3.bf16.msra.mxu1 %v5309_v38  ;;  %2599 = vmatprep.mubr.bf16.mxu1 %v6086_v51  ;;  %v5347_v51 = vld [vmem:[%s7192_s3 + $0x20] sm:$0xff]   ;;  %v5348_v38 = vld [vmem:[%s7192_s3 + $0x58] sm:$0xff]  }
 0x249   :  { %4846 = vmatprep.subr.bf16.mxu1 %v5310_v26  ;;  %4943 = vmatpush3.bf16.msra.mxu0 %v5347_v51 }
 0x24a   :  { %4944 = vmatprep.subr.bf16.mxu0 %v5348_v38  ;;  %v5336_v38 = vld [vmem:[%s7190_s2 + $0x3d0] sm:$0xff]  }
 0x24c   :  { %4847 = vmatpush3.bf16.msra.mxu1 %v5311_v1 }
 0x24d   :  { %4848 = vmatprep.subr.bf16.mxu1 %v5312_v60 }
 0x24f   :  { %2600 = vmatmul.mubr.bf16.gmra.mxu1 %v6094_v14  ;;  %v6564_v14 = vpop.f32.mrf.mxu1 }
 0x250   :  { %2607 = vmatprep.mubr.bf16.mxu1 %v6116_v62  ;;  %4849 = vmatpush3.bf16.msra.mxu1 %v5313_v59  ;;  %v5318_v62 = vld [vmem:[%s7190_s2 + $0x350] sm:$0xff]  }
 0x251   :  { %4850 = vmatprep.subr.bf16.mxu1 %v5314_v45 }
 0x254   :  { %4851 = vmatpush3.bf16.msra.mxu1 %v5315_v46 }
 0x255   :  { %4852 = vmatprep.subr.bf16.mxu1 %v5316_v5 }
 0x257   :  { %v4602_v28 = vpop.f32.mrf.mxu1  ;;  %2608 = vmatmul.mubr.bf16.gmra.mxu1 %v6126_v58  ;;  %v5321_v58 = vld [vmem:[%s7190_s2 + $0x308] sm:$0xff]  }
 0x258   :  { %2615 = vmatprep.mubr.bf16.mxu1 %v6286_v16  ;;  %4853 = vmatpush3.bf16.msra.mxu1 %v5317_v24  ;;  %v5329_v24 = vld [vmem:[%s7190_s2 + $0x3b0] sm:$0xff]  }
 0x259   :  { %v4603_v12 = vpop.f32.mrf.mxu1  ;;  %4854 = vmatprep.subr.bf16.mxu1 %v5318_v62 }
 0x25a   :  { %v6577_v6 = vadd.f32 %v4603_v12, %v4602_v28  ;;  %v5330_v28 = vld [vmem:[%s7190_s2 + $0x3e8] sm:$0xff]  }
 0x25b   :  { %v4605_v17 = vpop.f32.mrf.mxu1 }
 0x25c   :  { %4855 = vmatpush3.bf16.msra.mxu1 %v5319_v4 }
 0x25d   :  { %v4606_v16 = vpop.f32.mrf.mxu1  ;;  %4856 = vmatprep.subr.bf16.mxu1 %v5320_v56 }
 0x25e   :  { %v6586_v40 = vadd.f32 %v4606_v16, %v4605_v17 }
 0x25f   :  { %v4608_v19 = vpop.f32.mrf.mxu1  ;;  %2616 = vmatmul.mubr.bf16.gmra.mxu1 %v6295_v29  ;;  %v6600_v29 = vld [vmem:[%s7191_s6 + $0x1] ss:$0 sm:$0xff] }
 0x260   :  { %2623 = vmatprep.mubr.bf16.mxu1 %v1123_v37  ;;  %4857 = vmatpush3.bf16.msra.mxu1 %v5321_v58  ;;  %v2234_v1 = vadd.f32 %v6275_v11, %v6600_v29  ;;  %v5328_v11 = vld [vmem:[%s7190_s2 + $0x3f0] sm:$0xff]   ;;  %v2237_v15 = vadd.f32 %v4589_v55, %v6600_v29  ;;  %v2242_v4 = vadd.f32 %v6446_v18, %v6600_v29  ;;  %v5332_v58 = vld [vmem:[%s7190_s2 + $0x3e0] sm:$0xff]  }
 0x261   :  { %v4609_v10 = vpop.f32.mrf.mxu1  ;;  %4858 = vmatprep.subr.bf16.mxu1 %v5323_v54 }
 0x262   :  { %v6595_v21 = vadd.f32 %v4609_v10, %v4608_v19  ;;  %v2250_v10 = vadd.f32 %v6468_v23, %v6600_v29 }
 0x263   :  { %v4611_v52 = vpop.f32.mrf.mxu1 }
 0x264   :  { %4859 = vmatpush3.bf16.msra.mxu1 %v5325_v9  ;;  %v5334_v9 = vld [vmem:[%s7190_s2 + $0x3d8] sm:$0xff]  }
 0x265   :  { %v4612_v63 = vpop.f32.mrf.mxu1  ;;  %4890 = vmatprep.subr.bf16.mxu1 %v5326_v3 }
 0x266   :  { %v5335_v63 = vld [vmem:[%s7190_s2 + $0x398] sm:$0xff]  }
 0x267   :  { %v4630_v43 = vpop.f32.mrf.mxu1  ;;  %2624 = vmatmul.mubr.bf16.gmra.mxu1 %v6310_v41  ;;  %v5349_v41 = vld [vmem:[%s7192_s3 + $0x18] sm:$0xff]  }
 0x268   :  { %2663 = vmatprep.mubr.bf16.mxu1 %v6023_v44  ;;  %v5327_v44 = vld [vmem:[%s7190_s2 + $0x3b8] sm:$0xff]   ;;  %4945 = vmatpush3.bf16.msra.mxu0 %v5349_v41 }
 0x269   :  { %v4631_v26 = vpop.f32.mrf.mxu1 }
 0x26a   :  { %v4632_v60 = vadd.f32 %v4631_v26, %v4630_v43 }
 0x26b   :  { %v4633_v59 = vpop.f32.mrf.mxu1 }
 0x26c   :  { %v6611_v51 = vadd.f32 %v4632_v60, %v2234_v1  ;;  %v5340_v60 = vld [vmem:[%s7190_s2 + $0x3c8] sm:$0xff]  }
 0x26d   :  { %v4634_v45 = vpop.f32.mrf.mxu1 }
 0x26e   :  { %v4635_v20 = vadd.f32 %v4634_v45, %v4633_v59  ;;  %v2258_v59 = vadd.f32 %v6577_v6, %v6600_v29 }
 0x26f   :  { %v4636_v46 = vpop.f32.mrf.mxu1  ;;  %2664 = vmatmul.mubr.bf16.vlgmr.msra.gmra.mxu1 %v6031_v48  ;;  %v4595_v48 = vadd.f32 %v6458_v32, %v6450_v22  ;;  %v5333_v32 = vld [vmem:[%s7190_s2 + $0x3a0] sm:$0xff]  }
 0x270   :  { %v6624_v5 = vadd.f32 %v4635_v20, %v2237_v15  ;;  %4891 = vmatpush3.bf16.msra.mxu1 %v5327_v44  ;;  %2671 = vmatprep.mubr.bf16.mxu1 %v6146_v13  ;;  %v5331_v13 = vld [vmem:[%s7190_s2 + $0x3a8] sm:$0xff]   ;;  %v2261_v15 = vadd.f32 %v6586_v40, %v6600_v29 }
 0x271   :  { %v4637_v62 = vpop.f32.mrf.mxu1  ;;  %4892 = vmatprep.subr.bf16.mxu1 %v5328_v11  ;;  %v2245_v18 = vadd.f32 %v4595_v48, %v6600_v29  ;;  %v5342_v11 = vld [vmem:[%s7190_s2 + $0x3c0] sm:$0xff]  }
 0x272   :  { %v4638_v12 = vadd.f32 %v4637_v62, %v4636_v46  ;;  %v5350_v46 = vld [vmem:[%s7192_s3 + $0x50] sm:$0xff]   ;;  %v5343_v62 = vld [vmem:[%s7190_s2 + $0x380] sm:$0xff]  }
 0x273   :  { %v4639_v56 = vpop.f32.mrf.mxu1  ;;  %4946 = vmatprep.subr.bf16.mxu0 %v5350_v46 }
 0x274   :  { %v6637_v17 = vadd.f32 %v4638_v12, %v2242_v4  ;;  %4893 = vmatpush3.bf16.msra.mxu1 %v5329_v24  ;;  %v5351_v12 = vld [vmem:[%s7192_s3 + $0x10] sm:$0xff]  }
 0x275   :  { %v4640_v37 = vpop.f32.mrf.mxu1  ;;  %4894 = vmatprep.subr.bf16.mxu1 %v5330_v28  ;;  %4947 = vmatpush3.bf16.msra.mxu0 %v5351_v12 }
 0x276   :  { %v4641_v16 = vadd.f32 %v4640_v37, %v4639_v56 }
 0x277   :  { %v4642_v54 = vpop.f32.mrf.mxu1  ;;  %2672 = vmatmul.mubr.bf16.gmra.mxu1 %v6156_v7  ;;  %v4601_v7 = vadd.f32 %v6564_v14, %v6556_v39  ;;  %v5337_v14 = vld [vmem:[%s7190_s2 + $0x390] sm:$0xff]  }
 0x278   :  { %v6647_v22 = vadd.f32 %v4641_v16, %v2245_v18  ;;  %2679 = vmatprep.mubr.bf16.mxu1 %v6406_v42  ;;  %4895 = vmatpush3.bf16.msra.mxu1 %v5331_v13 }
 0x279   :  { %v4643_v19 = vpop.f32.mrf.mxu1  ;;  %4896 = vmatprep.subr.bf16.mxu1 %v5332_v58  ;;  %v2253_v23 = vadd.f32 %v4601_v7, %v6600_v29 }
 0x27a   :  { %v4644_v3 = vadd.f32 %v4643_v19, %v4642_v54 }
 0x27b   :  { %v4645_v52 = vpop.f32.mrf.mxu1 }
 0x27c   :  { %v6660_v42 = vadd.f32 %v4644_v3, %v2250_v10  ;;  %4897 = vmatpush3.bf16.msra.mxu1 %v5333_v32 }
 0x27d   :  { %v4646_v43 = vpop.f32.mrf.mxu1  ;;  %4898 = vmatprep.subr.bf16.mxu1 %v5334_v9 }
 0x27e   :  { %v4647_v26 = vadd.f32 %v4646_v43, %v4645_v52 }
 0x27f   :  { %v4648_v1 = vpop.f32.mrf.mxu1  ;;  %2680 = vmatmul.mubr.bf16.gmra.mxu1 %v6435_v33 }
 0x280   :  { %v6670_v39 = vadd.f32 %v4647_v26, %v2253_v23  ;;  %2687 = vmatprep.mubr.bf16.mxu1 %v6371_v57  ;;  %4899 = vmatpush3.bf16.msra.mxu1 %v5335_v63  ;;  %v5341_v57 = vld [vmem:[%s7190_s2 + $0x388] sm:$0xff]  }
 0x281   :  { %v4649_v55 = vpop.f32.mrf.mxu1  ;;  %4900 = vmatprep.subr.bf16.mxu1 %v5336_v38 }
 0x282   :  { %v4650_v44 = vadd.f32 %v4649_v55, %v4648_v1 }
 0x283   :  { %v4651_v33 = vpop.f32.mrf.mxu1 }
 0x284   :  { %v6681_v41 = vadd.f32 %v4650_v44, %v2258_v59  ;;  %4901 = vmatpush3.bf16.msra.mxu1 %v5337_v14 }
 0x285   :  { %v4652_v45 = vpop.f32.mrf.mxu1  ;;  %4902 = vmatprep.subr.bf16.mxu1 %v5340_v60 }
 0x286   :  { %v4653_v20 = vadd.f32 %v4652_v45, %v4651_v33 }
 0x287   :  { %v4654_v6 = vpop.f32.mrf.mxu1  ;;  %2688 = vmatmul.mubr.bf16.gmra.mxu1 %v6365_v50  ;;  %v2266_v50 = vadd.f32 %v6595_v21, %v6600_v29 }
 0x288   :  { %v6695_v24 = vadd.f32 %v4653_v20, %v2261_v15  ;;  %2695 = vmatprep.mubr.bf16.mxu1 %v1146_v27  ;;  %4903 = vmatpush3.bf16.msra.mxu1 %v5341_v57 }
 0x289   :  { %v4655_v28 = vpop.f32.mrf.mxu1  ;;  %4904 = vmatprep.subr.bf16.mxu1 %v5342_v11 }
 0x28a   :  { %v4656_v40 = vadd.f32 %v4655_v28, %v4654_v6 }
 0x28b   :  { %v4657_v4 = vpop.f32.mrf.mxu1 }
 0x28c   :  { %v2338_v48 = vadd.f32 %v4656_v40, %v2266_v50  ;;  %4905 = vmatpush3.bf16.msra.mxu1 %v5343_v62 }
 0x28d   :  { %v4658_v27 = vpop.f32.mrf.mxu1 }
 0x28f   :  { %v4676_v56 = vpop.f32.mrf.mxu1  ;;  %2696 = vmatmul.mubr.bf16.gmra.mxu1 %v6376_v30 }
 0x290   :  { %2735 = vmatprep.mubr.bf16.mxu1 %v6038_v61 }
 0x291   :  { %v4677_v13 = vpop.f32.mrf.mxu1 }
 0x292   :  { %v4678_v37 = vadd.f32 %v4677_v13, %v4676_v56 }
 0x293   :  { %v4679_v58 = vpop.f32.mrf.mxu1 }
 0x294   :  { %v2378_v21 = vadd.f32 %v4678_v37, %v6611_v51  ;;  %v1170_v51 = vsel %vm938_vm0, %v6323_v25, %v6227_v34  ;;  %v5352_v25 = vld [vmem:[%s7192_s3 + $0x48] sm:$0xff]   ;;  %v1165_v34 = vrot.slane %v6506_v35, 4  ;;  %v5355_v37 = vld [vmem:[%s7192_s3] sm:$0xff]  }
 0x295   :  { %v4680_v29 = vpop.f32.mrf.mxu1  ;;  %4948 = vmatprep.subr.bf16.mxu0 %v5352_v25 }
 0x296   :  { %v4681_v18 = vadd.f32 %v4680_v29, %v4679_v58 }
 0x297   :  { %v4682_v16 = vpop.f32.mrf.mxu1  ;;  %2736 = vmatmul.mubr.bf16.vlgmr.msra.gmra.mxu1 %v6046_v8 }
 0x298   :  { %v2381_v54 = vadd.f32 %v4681_v18, %v6624_v5  ;;  %2743 = vmatprep.mubr.bf16.mxu1 %v6180_v49 }
 0x299   :  { %v4683_v32 = vpop.f32.mrf.mxu1 }
 0x29a   :  { %v4684_v19 = vadd.f32 %v4683_v32, %v4682_v16 }
 0x29b   :  { %v4685_v9 = vpop.f32.mrf.mxu1 }
 0x29c   :  { %v2386_v30 = vadd.f32 %v4684_v19, %v6637_v17  ;;  %v1159_v17 = vsel %vm938_vm0, %v6308_v36, %v1078_v2  ;;  %v5353_v36 = vld [vmem:[%s7192_s3 + $0x8] sm:$0xff]  }
 0x29d   :  { %v4686_v61 = vpop.f32.mrf.mxu1  ;;  %4949 = vmatpush3.bf16.msra.mxu0 %v5353_v36 }
 0x29e   :  { %v4687_v10 = vadd.f32 %v4686_v61, %v4685_v9  ;;  %v5356_v61 = vld [vmem:[%s7192_s3 + $0x178] sm:$0xff]  }
 0x29f   :  { %v4688_v7 = vpop.f32.mrf.mxu1  ;;  %2744 = vmatmul.mubr.bf16.gmra.mxu1 %v6190_v53  ;;  %4980 = vmatprep.subr.bf16.mxu1 %v5356_v61 }
 0x2a0   :  { %v2389_v8 = vadd.f32 %v4687_v10, %v6647_v22  ;;  %2751 = vmatprep.mubr.bf16.mxu1 %v1170_v51 }
 0x2a1   :  { %v4689_v5 = vpop.f32.mrf.mxu1 }
 0x2a2   :  { %v4690_v3 = vadd.f32 %v4689_v5, %v4688_v7  ;;  %v5357_v7 = vld [vmem:[%s7192_s3 + $0x138] sm:$0xff]  }
 0x2a3   :  { %v4691_v49 = vpop.f32.mrf.mxu1  ;;  %4981 = vmatpush3.bf16.msra.mxu1 %v5357_v7 }
 0x2a4   :  { %v2394_v52 = vadd.f32 %v4690_v3, %v6660_v42  ;;  %v5358_v3 = vld [vmem:[%s7192_s3 + $0x170] sm:$0xff]  }
 0x2a5   :  { %v4692_v63 = vpop.f32.mrf.mxu1  ;;  %4982 = vmatprep.subr.bf16.mxu1 %v5358_v3 }
 0x2a6   :  { %v4693_v43 = vadd.f32 %v4692_v63, %v4691_v49 }
 0x2a7   :  { %v4694_v53 = vpop.f32.mrf.mxu1  ;;  %2752 = vmatmul.mubr.bf16.gmra.mxu1 %v1159_v17  ;;  %v5360_v17 = vld [vmem:[%s7192_s3 + $0x168] sm:$0xff]  }
 0x2a8   :  { %v2397_v38 = vadd.f32 %v4693_v43, %v6670_v39  ;;  %2759 = vmatprep.mubr.bf16.mxu1 %v6394_v47 }
 0x2a9   :  { %v4695_v22 = vpop.f32.mrf.mxu1 }
 0x2aa   :  { %v4696_v23 = vadd.f32 %v4695_v22, %v4694_v53 }
 0x2ab   :  { %v4697_v42 = vpop.f32.mrf.mxu1 }
 0x2ac   :  { %v2402_v26 = vadd.f32 %v4696_v23, %v6681_v41  ;;  %v5362_v23 = vld [vmem:[%s7192_s3 + $0x160] sm:$0xff]  }
 0x2ad   :  { %v4698_v2 = vpop.f32.mrf.mxu1 }
 0x2ae   :  { %v4699_v1 = vadd.f32 %v4698_v2, %v4697_v42 }
 0x2af   :  { %v4700_v47 = vpop.f32.mrf.mxu1  ;;  %2760 = vmatmul.mubr.bf16.gmra.mxu1 %v6390_v31 }
 0x2b0   :  { %v2405_v39 = vadd.f32 %v4699_v1, %v6695_v24  ;;  %2767 = vmatprep.mubr.bf16.mxu1 %v1165_v34  ;;  %v5364_v1 = vld [vmem:[%s7192_s3 + $0xf8] sm:$0xff]  }
 0x2b1   :  { %v4701_v14 = vpop.f32.mrf.mxu1 }
 0x2b2   :  { %v4702_v55 = vadd.f32 %v4701_v14, %v4700_v47  ;;  %v5365_v47 = vld [vmem:[%s7192_s3 + $0x158] sm:$0xff]  }
 0x2b3   :  { %v4703_v60 = vpop.f32.mrf.mxu1 }
 0x2b4   :  { %v2410_v59 = vadd.f32 %v4702_v55, %v2338_v48  ;;  %v5367_v55 = vld [vmem:[%s7192_s3 + $0x118] sm:$0xff]  }
 0x2b5   :  { %v4704_v44 = vpop.f32.mrf.mxu1 }
 0x2b7   :  { %v4722_v33 = vpop.f32.mrf.mxu1  ;;  %2768 = vmatmul.mubr.bf16.gmra.mxu1 %v6506_v35  ;;  %v5354_v35 = vld [vmem:[%s7192_s3 + $0x40] sm:$0xff]  }
 0x2b8   :  { %4950 = vmatprep.subr.bf16.mxu0 %v5354_v35 }
 0x2b9   :  { %v4723_v41 = vpop.f32.mrf.mxu1  ;;  %4951 = vmatpush3.bf16.msra.mxu0 %v5355_v37 }
 0x2ba   :  { %v4724_v57 = vadd.f32 %v4723_v41, %v4722_v33  ;;  %4958 = vmatprep.subr.bf16.mxu0 %v5364_v1  ;;  %v5369_v33 = vld [vmem:[%s7192_s3 + $0x150] sm:$0xff]  }
 0x2bb   :  { %v4725_v45 = vpop.f32.mrf.mxu1 }
 0x2bc   :  { %v2450_v11 = vadd.f32 %v4724_v57, %v2378_v21  ;;  %v5371_v57 = vld [vmem:[%s7192_s3 + $0x110] sm:$0xff]  }
 0x2bd   :  { %v4726_v15 = vpop.f32.mrf.mxu1 }
 0x2be   :  { %v4727_v20 = vadd.f32 %v4726_v15, %v4725_v45 }
 0x2bf   :  { %v4728_v6 = vpop.f32.mrf.mxu1 }
 0x2c0   :  { %v2453_v46 = vadd.f32 %v4727_v20, %v2381_v54  ;;  %v5373_v20 = vld [vmem:[%s7192_s3 + $0x148] sm:$0xff]  }
 0x2c1   :  { %v4729_v31 = vpop.f32.mrf.mxu1 }
 0x2c2   :  { %v4730_v62 = vadd.f32 %v4729_v31, %v4728_v6 }
 0x2c3   :  { %v4731_v24 = vpop.f32.mrf.mxu1 }
 0x2c4   :  { %v6737_v28 = vadd.f32 %v4730_v62, %v2386_v30 }
 0x2c5   :  { %v4732_v50 = vpop.f32.mrf.mxu1 }
 0x2c6   :  { %v4733_v40 = vadd.f32 %v4732_v50, %v4731_v24 }
 0x2c7   :  { %v4734_v4 = vpop.f32.mrf.mxu1 }
 0x2c8   :  { %v6739_v48 = vadd.f32 %v4733_v40, %v2389_v8  ;;  %v5379_v40 = vld [vmem:[%s7192_s3 + $0x100] sm:$0xff]  }
 0x2c9   :  { %v4735_v12 = vpop.f32.mrf.mxu1 }
 0x2ca   :  { %v4736_v27 = vadd.f32 %v4735_v12, %v4734_v4 }
 0x2cb   :  { %v4737_v56 = vpop.f32.mrf.mxu1 }
 0x2cc   :  { %v6744_v13 = vadd.f32 %v4736_v27, %v2394_v52  ;;  %v5359_v52 = vld [vmem:[%s7192_s3 + $0x130] sm:$0xff]  }
 0x2cd   :  { %v4738_v58 = vpop.f32.mrf.mxu1  ;;  %4983 = vmatpush3.bf16.msra.mxu1 %v5359_v52 }
 0x2ce   :  { %v4739_v21 = vadd.f32 %v4738_v58, %v4737_v56  ;;  %4984 = vmatprep.subr.bf16.mxu1 %v5360_v17  ;;  %v5494_v56 = vmov 0.0  }
 0x2cf   :  { %v4740_v29 = vpop.f32.mrf.mxu1 }
 0x2d0   :  { %v6749_v18 = vadd.f32 %v4739_v21, %v2397_v38  ;;  %v5361_v38 = vld [vmem:[%s7192_s3 + $0x128] sm:$0xff]  }
 0x2d1   :  { %v4741_v16 = vpop.f32.mrf.mxu1  ;;  %4985 = vmatpush3.bf16.msra.mxu1 %v5361_v38 }
 0x2d2   :  { %v4742_v54 = vadd.f32 %v4741_v16, %v4740_v29  ;;  %4986 = vmatprep.subr.bf16.mxu1 %v5362_v23 }
 0x2d3   :  { %v4743_v32 = vpop.f32.mrf.mxu1 }
 0x2d4   :  { %v6751_v19 = vadd.f32 %v4742_v54, %v2402_v26  ;;  %v5363_v26 = vld [vmem:[%s7192_s3 + $0x120] sm:$0xff]  }
 0x2d5   :  { %v4744_v9 = vpop.f32.mrf.mxu1  ;;  %4987 = vmatpush3.bf16.msra.mxu1 %v5363_v26 }
 0x2d6   :  { %v4745_v30 = vadd.f32 %v4744_v9, %v4743_v32  ;;  %4988 = vmatprep.subr.bf16.mxu1 %v5365_v47 }
 0x2d7   :  { %v4746_v10 = vpop.f32.mrf.mxu1 }
 0x2d8   :  { %v6759_v51 = vadd.f32 %v4745_v30, %v2405_v39 }
 0x2d9   :  { %v4747_v8 = vpop.f32.mrf.mxu1  ;;  %4989 = vmatpush3.bf16.msra.mxu1 %v5367_v55 }
 0x2da   :  { %v4748_v5 = vadd.f32 %v4747_v8, %v4746_v10  ;;  %4990 = vmatprep.subr.bf16.mxu1 %v5369_v33 }
 0x2db   :  { %v4749_v49 = vpop.f32.mrf.mxu1 }
 0x2dc   :  { %v6767_v63 = vadd.f32 %v4748_v5, %v2410_v59 }
 0x2dd   :  { %v4750_v43 = vpop.f32.mrf.mxu1  ;;  %4991 = vmatpush3.bf16.msra.mxu1 %v5371_v57 }
 0x2de   :  { %4992 = vmatprep.subr.bf16.mxu1 %v5373_v20 }
 0x2df   :  { %v4768_v53 = vpop.f32.mrf.mxu1 }
 0x2e1   :  { %v4769_v25 = vpop.f32.mrf.mxu1 }
 0x2e2   :  { %v4770_v22 = vadd.f32 %v4769_v25, %v4768_v53 }
 0x2e3   :  { %v4771_v42 = vpop.f32.mrf.mxu1 }
 0x2e4   :  { %v2522_v34 = vadd.f32 %v4770_v22, %v2450_v11 }
 0x2e5   :  { %v4772_v36 = vpop.f32.mrf.mxu1 }
 0x2e6   :  { %v4773_v2 = vadd.f32 %v4772_v36, %v4771_v42 }
 0x2e7   :  { %v4774_v39 = vpop.f32.mrf.mxu1 }
 0x2e8   :  { %v2525_v14 = vadd.f32 %v4773_v2, %v2453_v46  ;;  %v5375_v46 = vld [vmem:[%s7192_s3 + $0x108] sm:$0xff]  }
 0x2e9   :  { %v4775_v60 = vpop.f32.mrf.mxu1  ;;  %4993 = vmatpush3.bf16.msra.mxu1 %v5375_v46 }
 0x2ea   :  { %v4776_v59 = vadd.f32 %v4775_v60, %v4774_v39 }
 0x2eb   :  { %v4777_v44 = vpop.f32.mrf.mxu1 }
 0x2ec   :  { %v2530_v41 = vadd.f32 %v4776_v59, %v6737_v28  ;;  %v5377_v28 = vld [vmem:[%s7192_s3 + $0x140] sm:$0xff]  }
 0x2ed   :  { %v4778_v45 = vpop.f32.mrf.mxu1  ;;  %4994 = vmatprep.subr.bf16.mxu1 %v5377_v28 }
 0x2ee   :  { %v4779_v11 = vadd.f32 %v4778_v45, %v4777_v44  ;;  %4995 = vmatpush3.bf16.msra.mxu1 %v5379_v40 }
 0x2ef   :  { %v4780_v15 = vpop.f32.mrf.mxu1  ;;  %5077 = vmatprep.subr.bf16.mxu1 %v5494_v56 }
 0x2f0   :  { %v2533_v6 = vadd.f32 %v4779_v11, %v6739_v48 }
 0x2f1   :  { %v4781_v31 = vpop.f32.mrf.mxu1 }
 0x2f2   :  { %v4782_v62 = vadd.f32 %v4781_v31, %v4780_v15 }
 0x2f3   :  { %v4783_v24 = vpop.f32.mrf.mxu1 }
 0x2f4   :  { %v2538_v50 = vadd.f32 %v4782_v62, %v6744_v13 }
 0x2f5   :  { %v4784_v4 = vpop.f32.mrf.mxu1 }
 0x2f6   :  { %v4785_v48 = vadd.f32 %v4784_v4, %v4783_v24 }
 0x2f7   :  { %v4786_v35 = vpop.f32.mrf.mxu1 }
 0x2f8   :  { %v2541_v12 = vadd.f32 %v4785_v48, %v6749_v18 }
 0x2f9   :  { %v4787_v27 = vpop.f32.mrf.mxu1 }
 0x2fa   :  { %v4788_v37 = vadd.f32 %v4787_v27, %v4786_v35 }
 0x2fb   :  { %v4789_v58 = vpop.f32.mrf.mxu1 }
 0x2fc   :  { %v2546_v21 = vadd.f32 %v4788_v37, %v6751_v19 }
 0x2fd   :  { %v4790_v13 = vpop.f32.mrf.mxu1 }
 0x2fe   :  { %v4791_v29 = vadd.f32 %v4790_v13, %v4789_v58 }
 0x2ff   :  { %v4792_v16 = vpop.f32.mrf.mxu1 }
 0x300   :  { %v2549_v54 = vadd.f32 %v4791_v29, %v6759_v51 }
 0x301   :  { %v4793_v32 = vpop.f32.mrf.mxu1 }
 0x302   :  { %v4794_v9 = vadd.f32 %v4793_v32, %v4792_v16 }
 0x303   :  { %v4795_v30 = vpop.f32.mrf.mxu1 }
 0x304   :  { %v2554_v61 = vadd.f32 %v4794_v9, %v6767_v63 }
 0x305   :  { %v4796_v10 = vpop.f32.mrf.mxu1 }
 0x307   :  { %v4814_v18 = vpop.f32.mrf.mxu1 }
 0x309   :  { %v4815_v7 = vpop.f32.mrf.mxu1 }
 0x30a   :  { %v4816_v8 = vadd.f32 %v4815_v7, %v4814_v18 }
 0x30b   :  { %v4817_v5 = vpop.f32.mrf.mxu1 }
 0x30c   :  { %v2594_v3 = vadd.f32 %v4816_v8, %v2522_v34 }
 0x30d   :  { %v4818_v49 = vpop.f32.mrf.mxu1 }
 0x30e   :  { %v4819_v52 = vadd.f32 %v4818_v49, %v4817_v5 }
 0x30f   :  { %v4820_v43 = vpop.f32.mrf.mxu1 }
 0x310   :  { %v2597_v19 = vadd.f32 %v4819_v52, %v2525_v14 }
 0x311   :  { %v4821_v17 = vpop.f32.mrf.mxu1 }
 0x312   :  { %v4822_v53 = vadd.f32 %v4821_v17, %v4820_v43 }
 0x313   :  { %v4823_v38 = vpop.f32.mrf.mxu1 }
 0x314   :  { %v6816_v25 = vadd.f32 %v4822_v53, %v2530_v41 }
 0x315   :  { %v4824_v51 = vpop.f32.mrf.mxu1 }
 0x316   :  { %v4825_v22 = vadd.f32 %v4824_v51, %v4823_v38 }
 0x317   :  { %v4826_v23 = vpop.f32.mrf.mxu1 }
 0x318   :  { %v6818_v42 = vadd.f32 %v4825_v22, %v2533_v6 }
 0x319   :  { %v4827_v63 = vpop.f32.mrf.mxu1 }
 0x31a   :  { %v4828_v26 = vadd.f32 %v4827_v63, %v4826_v23 }
 0x31b   :  { %v4829_v36 = vpop.f32.mrf.mxu1 }
 0x31c   :  { %v6820_v2 = vadd.f32 %v4828_v26, %v2538_v50 }
 0x31d   :  { %v4830_v34 = vpop.f32.mrf.mxu1 }
 0x31e   :  { %v4831_v1 = vadd.f32 %v4830_v34, %v4829_v36 }
 0x31f   :  { %v4832_v47 = vpop.f32.mrf.mxu1 }
 0x320   :  { %v6822_v39 = vadd.f32 %v4831_v1, %v2541_v12 }
 0x321   :  { %v4833_v14 = vpop.f32.mrf.mxu1 }
 0x322   :  { %v4834_v55 = vadd.f32 %v4833_v14, %v4832_v47 }
 0x323   :  { %v4835_v60 = vpop.f32.mrf.mxu1 }
 0x324   :  { %v6824_v59 = vadd.f32 %v4834_v55, %v2546_v21 }
 0x325   :  { %v4836_v44 = vpop.f32.mrf.mxu1 }
 0x326   :  { %v4837_v33 = vadd.f32 %v4836_v44, %v4835_v60 }
 0x327   :  { %v4838_v41 = vpop.f32.mrf.mxu1 }
 0x328   :  { %v6826_v57 = vadd.f32 %v4837_v33, %v2549_v54  ;;  %v5366_v33 = vld [vmem:[%s7192_s3 + $0xb8] sm:$0xff]  }
 0x329   :  { %v4839_v45 = vpop.f32.mrf.mxu1 }
 0x32a   :  { %v4840_v11 = vadd.f32 %v4839_v45, %v4838_v41  ;;  %v5368_v45 = vld [vmem:[%s7192_s3 + $0xf0] sm:$0xff]  }
 0x32b   :  { %v4841_v15 = vpop.f32.mrf.mxu1 }
 0x32c   :  { %v2626_v20 = vadd.f32 %v4840_v11, %v2554_v61 }
 0x32d   :  { %v4842_v6 = vpop.f32.mrf.mxu1 }
 0x32f   :  { %v4860_v46 = vpop.f32.mrf.mxu1 }
 0x331   :  { %v4861_v31 = vpop.f32.mrf.mxu1 }
 0x332   :  { %v4862_v10 = vadd.f32 %v4861_v31, %v4860_v46  ;;  %v5370_v31 = vld [vmem:[%s7192_s3 + $0xb0] sm:$0xff]  }
 0x333   :  { %v4863_v62 = vpop.f32.mrf.mxu1 }
 0x334   :  { %v2666_v49 = vadd.f32 %v4862_v10, %v2594_v3 }
 0x335   :  { %v4864_v24 = vpop.f32.mrf.mxu1 }
 0x336   :  { %v4865_v7 = vadd.f32 %v4864_v24, %v4863_v62  ;;  %v5372_v24 = vld [vmem:[%s7192_s3 + $0xe8] sm:$0xff]  }
 0x337   :  { %v4866_v28 = vpop.f32.mrf.mxu1 }
 0x338   :  { %v2669_v43 = vadd.f32 %v4865_v7, %v2597_v19 }
 0x339   :  { %v4867_v50 = vpop.f32.mrf.mxu1 }
 0x33a   :  { %v4868_v51 = vadd.f32 %v4867_v50, %v4866_v28 }
 0x33b   :  { %v4869_v40 = vpop.f32.mrf.mxu1 }
 0x33c   :  { %v2674_v47 = vadd.f32 %v4868_v51, %v6816_v25 }
 0x33d   :  { %v4870_v4 = vpop.f32.mrf.mxu1 }
 0x33e   :  { %v4871_v63 = vadd.f32 %v4870_v4, %v4869_v40 }
 0x33f   :  { %v4872_v48 = vpop.f32.mrf.mxu1 }
 0x340   :  { %v2677_v60 = vadd.f32 %v4871_v63, %v6818_v42  ;;  %v5385_v63 = vld [vmem:[%s7192_s3 + $0x230] sm:$0xff]  }
 0x341   :  { %v4873_v35 = vpop.f32.mrf.mxu1 }
 0x342   :  { %v4874_v11 = vadd.f32 %v4873_v35, %v4872_v48 }
 0x343   :  { %v4875_v12 = vpop.f32.mrf.mxu1 }
 0x344   :  { %v2682_v28 = vadd.f32 %v4874_v11, %v6820_v2  ;;  %v5376_v2 = vld [vmem:[%s7192_s3 + $0xe0] sm:$0xff]   ;;  %v5396_v11 = vld [vmem:[%s7192_s3 + $0x1b0] sm:$0xff]  }
 0x345   :  { %v4876_v27 = vpop.f32.mrf.mxu1 }
 0x347   :  { %v6828_v37 = vpop.f32.mrf.mxu1 }
 0x349   :  { %v6830_v58 = vpop.f32.mrf.mxu1 }
 0x34b   :  { %v6832_v21 = vpop.f32.mrf.mxu1 }
 0x34d   :  { %v6834_v13 = vpop.f32.mrf.mxu1 }
 0x34f   :  { %v4884_v29 = vpop.f32.mrf.mxu1 }
 0x351   :  { %v4885_v16 = vpop.f32.mrf.mxu1 }
 0x352   :  { %v4886_v54 = vadd.f32 %v4885_v16, %v4884_v29  ;;  %v4880_v16 = vadd.f32 %v6830_v58, %v6828_v37  ;;  %v5380_v37 = vld [vmem:[%s7192_s3 + $0xd8] sm:$0xff]  }
 0x353   :  { %v4887_v32 = vpop.f32.mrf.mxu1 }
 0x354   :  { %v6836_v9 = vadd.f32 %v4886_v54, %v2626_v20  ;;  %v4877_v20 = vadd.f32 %v4876_v27, %v4875_v12  ;;  %v5374_v27 = vld [vmem:[%s7192_s3 + $0xa8] sm:$0xff]   ;;  %v4883_v32 = vadd.f32 %v6834_v13, %v6832_v21  ;;  %v2690_v58 = vadd.f32 %v4880_v16, %v6824_v59  ;;  %v5383_v59 = vld [vmem:[%s7192_s3 + $0xd0] sm:$0xff]  }
 0x355   :  { %v4888_v30 = vpop.f32.mrf.mxu1  ;;  %v5415_v16 = vld [vmem:[%s7193_s4 + $0xe8] ss:$16 sps:$4 sm:$0xff]  }
 0x356   :  { %v2685_v4 = vadd.f32 %v4877_v20, %v6822_v39  ;;  %v2693_v21 = vadd.f32 %v4883_v32, %v6826_v57  ;;  %v5418_v32 = vld [vmem:[%s7193_s4 + $0xc0] ss:$16 sps:$4 sm:$0xff]  }
 0x357   :  { %v4906_v61 = vpop.f32.mrf.mxu1 }
 0x359   :  { %v4907_v18 = vpop.f32.mrf.mxu1 }
 0x35a   :  { %v4908_v8 = vadd.f32 %v4907_v18, %v4906_v61  ;;  %v5378_v18 = vld [vmem:[%s7192_s3 + $0xa0] sm:$0xff]  }
 0x35b   :  { %v4909_v5 = vpop.f32.mrf.mxu1 }
 0x35c   :  { %v2738_v17 = vadd.f32 %v4908_v8, %v2666_v49 }
 0x35d   :  { %v4910_v52 = vpop.f32.mrf.mxu1 }
 0x35e   :  { %v4911_v53 = vadd.f32 %v4910_v52, %v4909_v5  ;;  %v2775_v26 = vmax.f32 %v2738_v17, 0.0  ;;  %v5382_v17 = vld [vmem:[%s7192_s3 + $0x238] sm:$0xff]  }
 0x35f   :  { %v4912_v38 = vpop.f32.mrf.mxu1 }
 0x360   :  { %v2741_v22 = vadd.f32 %v4911_v53, %v2669_v43  ;;  %v5381_v43 = vld [vmem:[%s7192_s3 + $0x98] sm:$0xff]  }
 0x361   :  { %v4913_v23 = vpop.f32.mrf.mxu1 }
 0x362   :  { %v2776_v36 = vmax.f32 %v2741_v22, 0.0  ;;  %v4914_v34 = vadd.f32 %v4913_v23, %v4912_v38  ;;  %v5384_v23 = vld [vmem:[%s7192_s3 + $0x90] sm:$0xff]  }
 0x363   :  { %v4915_v1 = vpop.f32.mrf.mxu1 }
 0x364   :  { %v2784_v14 = vpack.c.bf16 %v2776_v36, %v2775_v26  ;;  %v2746_v3 = vadd.f32 %v4914_v34, %v2674_v47  ;;  %v5386_v26 = vld [vmem:[%s7192_s3 + $0xc8] sm:$0xff]  }
 0x365   :  { %v4916_v55 = vpop.f32.mrf.mxu1  ;;  %v5387_v47 = vld [vmem:[%s7192_s3 + $0x88] sm:$0xff]  }
 0x366   :  { %v4917_v44 = vadd.f32 %v4916_v55, %v4915_v1  ;;  %v2790_v19 = vrot.slane %v2784_v14, 4  ;;  %v2777_v6 = vmax.f32 %v2746_v3, 0.0  ;;  %v5389_v55 = vld [vmem:[%s7192_s3 + $0xc0] sm:$0xff]  }
 0x367   :  { %v4918_v41 = vpop.f32.mrf.mxu1  ;;  %v5391_v3 = vld [vmem:[%s7192_s3 + $0x220] sm:$0xff]  }
 0x368   :  { %v2749_v15 = vadd.f32 %v4917_v44, %v2677_v60  ;;  %3409 = vmatprep.mubr.bf16.mxu0 %v2790_v19  ;;  %v5390_v60 = vld [vmem:[%s7192_s3 + $0x80] sm:$0xff]   ;;  %v5392_v44 = vld [vmem:[%s7192_s3 + $0x1f8] sm:$0xff]  }
 0x369   :  { %v4919_v25 = vpop.f32.mrf.mxu1  ;;  %3410 = vmatmul.mubr.bf16.vlgmr.msra.gmra.mxu0 %v2784_v14  ;;  %v5388_v14 = vld [vmem:[%s7192_s3 + $0x228] sm:$0xff]   ;;  %v5393_v19 = vld [vmem:[%s7192_s3 + $0x1b8] sm:$0xff]  }
 0x36a   :  { %v2778_v42 = vmax.f32 %v2749_v15, 0.0  ;;  %v4920_v46 = vadd.f32 %v4919_v25, %v4918_v41  ;;  %4959 = vmatpush3.bf16.msra.mxu0 %v5366_v33  ;;  %v5394_v33 = vld [vmem:[%s7192_s3 + $0x218] sm:$0xff]   ;;  %v5395_v41 = vld [vmem:[%s7192_s3 + $0x1f0] sm:$0xff]   ;;  %v5398_v25 = vld [vmem:[%s7192_s3 + $0x1e8] sm:$0xff]  }
 0x36b   :  { %v4921_v62 = vpop.f32.mrf.mxu1  ;;  %4960 = vmatprep.subr.bf16.mxu0 %v5368_v45  ;;  %v5397_v15 = vld [vmem:[%s7192_s3 + $0x210] sm:$0xff]  }
 0x36c   :  { %v6853_v50 = vpack.c.bf16 %v2778_v42, %v2777_v6  ;;  %v2754_v48 = vadd.f32 %v4920_v46, %v2682_v28  ;;  %v5399_v6 = vld [vmem:[%s7192_s3 + $0x1a8] sm:$0xff]   ;;  %v5401_v46 = vld [vmem:[%s7192_s3 + $0x1e0] sm:$0xff]   ;;  %v5404_v28 = vld [vmem:[%s7192_s3 + $0x1d8] sm:$0xff]  }
 0x36d   :  { %v4922_v40 = vpop.f32.mrf.mxu1  ;;  %v5400_v42 = vld [vmem:[%s7192_s3 + $0x208] sm:$0xff]  }
 0x36e   :  { %v4923_v35 = vadd.f32 %v4922_v40, %v4921_v62  ;;  %4961 = vmatpush3.bf16.msra.mxu0 %v5370_v31  ;;  %v2793_v12 = vrot.slane %v6853_v50, 4  ;;  %v2779_v30 = vmax.f32 %v2754_v48, 0.0  ;;  %v5402_v62 = vld [vmem:[%s7192_s3 + $0x1a0] sm:$0xff]   ;;  %v5406_v40 = vld [vmem:[%s7192_s3 + $0x1d0] sm:$0xff]  }
 0x36f   :  { %v4924_v29 = vpop.f32.mrf.mxu1  ;;  %4962 = vmatprep.subr.bf16.mxu0 %v5372_v24  ;;  %v5403_v24 = vld [vmem:[%s7192_s3 + $0x200] sm:$0xff]   ;;  %v5407_v48 = vld [vmem:[%s7192_s3 + $0x190] sm:$0xff]  }
 0x370   :  { %v2757_v54 = vadd.f32 %v4923_v35, %v2685_v4  ;;  %3449 = vmatprep.mubr.bf16.mxu0 %v2793_v12  ;;  %v5409_v35 = vld [vmem:[%s7192_s3 + $0x188] sm:$0xff]   ;;  %v5410_v12 = vld [vmem:[%s7192_s3 + $0x1c0] sm:$0xff]  }
 0x371   :  { %v4925_v39 = vpop.f32.mrf.mxu1 }
 0x372   :  { %v2780_v61 = vmax.f32 %v2757_v54, 0.0  ;;  %v4926_v10 = vadd.f32 %v4925_v39, %v4924_v29  ;;  %4963 = vmatpush3.bf16.msra.mxu0 %v5374_v27  ;;  %v5411_v27 = vld [vmem:[%s7192_s3 + $0x180] sm:$0xff]   ;;  %v5417_v54 = vld [vmem:[%s7193_s4 + $0xec] ss:$16 sps:$4 sm:$0xff]  }
 0x373   :  { %v4927_v7 = vpop.f32.mrf.mxu1  ;;  %4964 = vmatprep.subr.bf16.mxu0 %v5376_v2  ;;  %v5412_v29 = vld [vmem:[%s7193_s4 + $0xe0] ss:$16 sps:$4 sm:$0xff]   ;;  %v5414_v2 = vld [vmem:[%s7193_s4 + $0xe4] ss:$16 sps:$4 sm:$0xff]   ;;  %v5423_v39 = vld [vmem:[%s7193_s4 + $0xcc] ss:$16 sps:$4 sm:$0xff]  }
 0x374   :  { %v2786_v8 = vpack.c.bf16 %v2780_v61, %v2779_v30  ;;  %v2762_v13 = vadd.f32 %v4926_v10, %v2690_v58  ;;  %v5421_v30 = vld [vmem:[%s7193_s4 + $0xc8] ss:$16 sps:$4 sm:$0xff]   ;;  %v5426_v61 = vld [vmem:[%s7193_s4 + $0xa4] ss:$16 sps:$4 sm:$0xff]   ;;  %v5429_v10 = vld [vmem:[%s7193_s4 + $0xac] ss:$16 sps:$4 sm:$0xff]  }
 0x375   :  { %v4928_v5 = vpop.f32.mrf.mxu1  ;;  %v5432_v58 = vld [vmem:[%s7193_s4 + $0x84] ss:$16 sps:$4 sm:$0xff]  }
 0x376   :  { %v4929_v49 = vadd.f32 %v4928_v5, %v4927_v7  ;;  %4965 = vmatpush3.bf16.msra.mxu0 %v5378_v18  ;;  %v2796_v52 = vrot.slane %v2786_v8, 4  ;;  %v2781_v51 = vmax.f32 %v2762_v13, 0.0  ;;  %v5424_v18 = vld [vmem:[%s7193_s4 + $0xa0] ss:$16 sps:$4 sm:$0xff]   ;;  %v5427_v7 = vld [vmem:[%s7193_s4 + $0xa8] ss:$16 sps:$4 sm:$0xff]  }
 0x377   :  { %v4930_v53 = vpop.f32.mrf.mxu1  ;;  %4966 = vmatprep.subr.bf16.mxu0 %v5380_v37  ;;  %v5430_v37 = vld [vmem:[%s7193_s4 + $0x80] ss:$16 sps:$4 sm:$0xff]   ;;  %v5435_v5 = vld [vmem:[%s7193_s4 + $0x8c] ss:$16 sps:$4 sm:$0xff]  }
 0x378   :  { %v2765_v38 = vadd.f32 %v4929_v49, %v2693_v21  ;;  %3489 = vmatprep.mubr.bf16.mxu1 %v2796_v52  ;;  %v5438_v21 = vld [vmem:[%s7193_s4 + $0x64] ss:$16 sps:$4 sm:$0xff]   ;;  %v5441_v13 = vld [vmem:[%s7193_s4 + $0x6c] ss:$16 sps:$4 sm:$0xff]   ;;  %v5436_v49 = vld [vmem:[%s7193_s4 + $0x60] ss:$16 sps:$4 sm:$0xff]  }
 0x379   :  { %v4931_v57 = vpop.f32.mrf.mxu1  ;;  %3490 = vmatmul.mubr.bf16.vlgmr.msra.gmra.mxu1 %v2786_v8  ;;  %v5433_v8 = vld [vmem:[%s7193_s4 + $0x88] ss:$16 sps:$4 sm:$0xff]  }
 0x37a   :  { %v2782_v22 = vmax.f32 %v2765_v38, 0.0  ;;  %4967 = vmatpush3.bf16.msra.mxu0 %v5381_v43  ;;  %5078 = vmatpush3.bf16.msra.mxu1 %v5382_v17  ;;  %v4932_v20 = vadd.f32 %v4931_v57, %v4930_v53  ;;  %v5439_v52 = vld [vmem:[%s7193_s4 + $0x68] ss:$16 sps:$4 sm:$0xff]   ;;  %v5442_v43 = vld [vmem:[%s7193_s4 + $0x40] ss:$16 sps:$4 sm:$0xff]  }
 0x37b   :  { %4968 = vmatprep.subr.bf16.mxu0 %v5383_v59  ;;  %5079 = vmatprep.subr.bf16.mxu1 %v5494_v56  ;;  %v4933_v36 = vpop.f32.mrf.mxu1  ;;  %v5444_v17 = vld [vmem:[%s7193_s4 + $0x44] ss:$16 sps:$4 sm:$0xff]   ;;  %v5445_v53 = vld [vmem:[%s7193_s4 + $0x48] ss:$16 sps:$4 sm:$0xff]   ;;  %v5447_v59 = vld [vmem:[%s7193_s4 + $0x4c] ss:$16 sps:$4 sm:$0xff]  }
 0x37c   :  { %v6894_v34 = vpack.c.bf16 %v2782_v22, %v2781_v51  ;;  %5093 = vmatprep.mubr.msk.bf16.mxu1 %vm5495_vm1, %v5494_v56  ;;  %v2770_v31 = vadd.f32 %v4932_v20, %v6836_v9  ;;  %v5405_v9 = vld [vmem:[%s7192_s3 + $0x198] sm:$0xff]   ;;  %v5450_v38 = vld [vmem:[%s7193_s4 + $0x24] ss:$16 sps:$4 sm:$0xff]   ;;  %v5448_v51 = vld [vmem:[%s7193_s4 + $0x20] ss:$16 sps:$4 sm:$0xff]  }
 0x37d   :  { %v4934_v1 = vpop.f32.mrf.mxu1  ;;  %v5453_v57 = vld [vmem:[%s7193_s4 + $0x2c] ss:$16 sps:$4 sm:$0xff]   ;;  %v5451_v22 = vld [vmem:[%s7193_s4 + $0x28] ss:$16 sps:$4 sm:$0xff]  }
 0x37e   :  { %4969 = vmatpush3.bf16.msra.mxu0 %v5384_v23  ;;  %5080 = vmatpush3.bf16.msra.mxu1 %v5385_v63  ;;  %v2799_v45 = vrot.slane %v6894_v34, 4  ;;  %v5456_v23 = vld [vmem:[%s7193_s4 + $0x4] ss:$16 sps:$4 sm:$0xff]   ;;  %v5459_v63 = vld [vmem:[%s7193_s4 + $0xc] ss:$16 sps:$4 sm:$0xff]  }
 0x37f   :  { %4970 = vmatprep.subr.bf16.mxu0 %v5386_v26  ;;  %5081 = vmatprep.subr.bf16.mxu1 %v5494_v56  ;;  %v5454_v26 = vld [vmem:[%s7193_s4] ss:$16 sps:$4 sm:$0xff]   ;;  %v5457_v36 = vld [vmem:[%s7193_s4 + $0x8] ss:$16 sps:$4 sm:$0xff]  }
 0x380   :  { %v5461_v1 = vld [vmem:[%s7194_s5 + $0xf8] sm:$0xff]  }
 0x382   :  { %4971 = vmatpush3.bf16.msra.mxu0 %v5387_v47  ;;  %5082 = vmatpush3.bf16.msra.mxu1 %v5388_v14 }
 0x383   :  { %4972 = vmatprep.subr.bf16.mxu0 %v5389_v55  ;;  %5083 = vmatprep.subr.bf16.mxu1 %v5494_v56 }
 0x386   :  { %4973 = vmatpush3.bf16.msra.mxu0 %v5390_v60  ;;  %5084 = vmatpush3.bf16.msra.mxu1 %v5391_v3 }
 0x387   :  { %5002 = vmatprep.subr.bf16.mxu0 %v5392_v44  ;;  %5085 = vmatprep.subr.bf16.mxu1 %v5494_v56 }
 0x389   :  { %3450 = vmatmul.mubr.bf16.vlgmr.msra.gmra.mxu0 %v6853_v50  ;;  %v2783_v50 = vmax.f32 %v2770_v31, 0.0  ;;  %v29_v31 = vld [vmem:[%s7191_s6 + $0x2] ss:$0 sm:$0xff] }
 0x38a   :  { %5003 = vmatpush3.bf16.msra.mxu0 %v5393_v19  ;;  %3529 = vmatprep.mubr.bf16.mxu0 %v2799_v45 }
 0x38b   :  { %5086 = vmatpush3.bf16.msra.mxu1 %v5394_v33  ;;  %5004 = vmatprep.subr.bf16.mxu0 %v5395_v41  ;;  %v2788_v4 = vpack.c.bf16 %v2783_v50, %v2783_v50 }
 0x38c   :  { %5087 = vmatprep.subr.bf16.mxu1 %v5494_v56 }
 0x38e   :  { %5005 = vmatpush3.bf16.msra.mxu0 %v5396_v11 }
 0x38f   :  { %5088 = vmatpush3.bf16.msra.mxu1 %v5397_v15  ;;  %5006 = vmatprep.subr.bf16.mxu0 %v5398_v25 }
 0x390   :  { %5089 = vmatprep.subr.bf16.mxu1 %v5494_v56 }
 0x392   :  { %5007 = vmatpush3.bf16.msra.mxu0 %v5399_v6 }
 0x393   :  { %5090 = vmatpush3.bf16.msra.mxu1 %v5400_v42  ;;  %5008 = vmatprep.subr.bf16.mxu0 %v5401_v46 }
 0x394   :  { %5091 = vmatprep.subr.bf16.mxu1 %v5494_v56  ;;  %v5408_v56 = vld [vmem:[%s7192_s3 + $0x1c8] sm:$0xff]  }
 0x396   :  { %5009 = vmatpush3.bf16.msra.mxu0 %v5402_v62 }
 0x397   :  { %5092 = vmatpush3.bf16.msra.mxu1 %v5403_v24  ;;  %5010 = vmatprep.subr.bf16.mxu0 %v5404_v28 }
 0x398   :  { %3833 = vmatprep.subr.bf16.mxu1 %v5417_v54 }
 0x39a   :  { %5094 = vmatmul.mubr.bf16.vlgmr.msra.gmra.mxu1 %v2788_v4  ;;  %5011 = vmatpush3.bf16.msra.mxu0 %v5405_v9 }
 0x39b   :  { %5012 = vmatprep.subr.bf16.mxu0 %v5406_v40  ;;  %3865 = vmatprep.mubr.bf16.mxu1 %v5493_v0 }
 0x39c   :  { %3834 = vmatpush1.bf16.msra.mxu1 %v5415_v16  ;;  %v5463_v16 = vld [vmem:[%s7194_s5 + $0xb8] sm:$0xff]  }
 0x39d   :  { %3835 = vmatprep.subr.bf16.mxu1 %v5423_v39  ;;  %v5465_v39 = vld [vmem:[%s7194_s5 + $0xf0] sm:$0xff]  }
 0x39e   :  { %5013 = vmatpush3.bf16.msra.mxu0 %v5407_v48 }
 0x39f   :  { %5014 = vmatprep.subr.bf16.mxu0 %v5408_v56 }
 0x3a0   :  { %3836 = vmatpush1.bf16.msra.mxu1 %v5421_v30  ;;  %v5467_v30 = vld [vmem:[%s7194_s5 + $0xb0] sm:$0xff]  }
 0x3a1   :  { %3837 = vmatprep.subr.bf16.mxu1 %v5429_v10  ;;  %v5469_v10 = vld [vmem:[%s7194_s5 + $0xe8] sm:$0xff]  }
 0x3a2   :  { %5015 = vmatpush3.bf16.msra.mxu0 %v5409_v35 }
 0x3a3   :  { %5016 = vmatprep.subr.bf16.mxu0 %v5410_v12 }
 0x3a4   :  { %3838 = vmatpush1.bf16.msra.mxu1 %v5427_v7  ;;  %v5471_v7 = vld [vmem:[%s7194_s5 + $0xa8] sm:$0xff]  }
 0x3a5   :  { %3839 = vmatprep.subr.bf16.mxu1 %v5435_v5  ;;  %v5475_v5 = vld [vmem:[%s7194_s5 + $0xa0] sm:$0xff]  }
 0x3a6   :  { %5017 = vmatpush3.bf16.msra.mxu0 %v5411_v27 }
 0x3a7   :  { %3792 = vmatprep.subr.bf16.mxu0 %v5414_v2  ;;  %v5462_v2 = vld [vmem:[%s7194_s5 + $0x38] sm:$0xff]  }
 0x3a8   :  { %3840 = vmatpush1.bf16.msra.mxu1 %v5433_v8  ;;  %v5474_v8 = vld [vmem:[%s7194_s5 + $0x20] sm:$0xff]  }
 0x3a9   :  { %3530 = vmatmul.mubr.bf16.vlgmr.msra.gmra.mxu0 %v6894_v34  ;;  %3841 = vmatprep.subr.bf16.mxu1 %v5441_v13  ;;  %v5460_v34 = vld [vmem:[%s7194_s5 + $0x78] sm:$0xff]  }
 0x3aa   :  { %3824 = vmatprep.mubr.bf16.mxu0 %v5493_v0  ;;  %3793 = vmatpush1.bf16.msra.mxu0 %v5412_v29  ;;  %v5420_v0 = vld [vmem:[%s7193_s4 + $0xc4] ss:$16 sps:$4 sm:$0xff]   ;;  %v5477_v13 = vld [vmem:[%s7194_s5 + $0xd8] sm:$0xff]  }
 0x3ab   :  { %3794 = vmatprep.subr.bf16.mxu0 %v5420_v0  ;;  %v5464_v0 = vld [vmem:[%s7194_s5 + $0x70] sm:$0xff]  }
 0x3ac   :  { %3842 = vmatpush1.bf16.msra.mxu1 %v5439_v52  ;;  %v5479_v52 = vld [vmem:[%s7194_s5 + $0x98] sm:$0xff]  }
 0x3ad   :  { %3843 = vmatprep.subr.bf16.mxu1 %v5447_v59  ;;  %v5483_v59 = vld [vmem:[%s7194_s5 + $0x90] sm:$0xff]  }
 0x3ae   :  { %3795 = vmatpush1.bf16.msra.mxu0 %v5418_v32  ;;  %v5466_v32 = vld [vmem:[%s7194_s5 + $0x30] sm:$0xff]  }
 0x3af   :  { %3796 = vmatprep.subr.bf16.mxu0 %v5426_v61  ;;  %v5468_v61 = vld [vmem:[%s7194_s5 + $0x68] sm:$0xff]  }
 0x3b0   :  { %3844 = vmatpush1.bf16.msra.mxu1 %v5445_v53  ;;  %v5482_v53 = vld [vmem:[%s7194_s5 + $0x10] sm:$0xff]  }
 0x3b1   :  { %3845 = vmatprep.subr.bf16.mxu1 %v5453_v57  ;;  %v5485_v57 = vld [vmem:[%s7194_s5 + $0xc8] sm:$0xff]  }
 0x3b2   :  { %3797 = vmatpush1.bf16.msra.mxu0 %v5424_v18  ;;  %v5470_v18 = vld [vmem:[%s7194_s5 + $0x28] sm:$0xff]  }
 0x3b3   :  { %3798 = vmatprep.subr.bf16.mxu0 %v5432_v58  ;;  %v5473_v58 = vld [vmem:[%s7194_s5 + $0xe0] sm:$0xff]  }
 0x3b4   :  { %3846 = vmatpush1.bf16.msra.mxu1 %v5451_v22  ;;  %v5487_v22 = vld [vmem:[%s7194_s5 + $0x88] sm:$0xff]  }
 0x3b5   :  { %3847 = vmatprep.subr.bf16.mxu1 %v5459_v63  ;;  %v5489_v63 = vld [vmem:[%s7194_s5 + $0xc0] sm:$0xff]  }
 0x3b6   :  { %3799 = vmatpush1.bf16.msra.mxu0 %v5430_v37  ;;  %v5472_v37 = vld [vmem:[%s7194_s5 + $0x60] sm:$0xff]  }
 0x3b7   :  { %3800 = vmatprep.subr.bf16.mxu0 %v5438_v21  ;;  %v5476_v21 = vld [vmem:[%s7194_s5 + $0x58] sm:$0xff]  }
 0x3b8   :  { %3848 = vmatpush1.bf16.msra.mxu1 %v5457_v36  ;;  %v5491_v36 = vld [vmem:[%s7194_s5 + $0x80] sm:$0xff]  }
 0x3b9   :  { %5055 = vmatprep.subr.bf16.mxu1 %v5461_v1 }
 0x3ba   :  { %3801 = vmatpush1.bf16.msra.mxu0 %v5436_v49  ;;  %v5478_v49 = vld [vmem:[%s7194_s5 + $0x18] sm:$0xff]  }
 0x3bb   :  { %3802 = vmatprep.subr.bf16.mxu0 %v5444_v17  ;;  %v5481_v17 = vld [vmem:[%s7194_s5 + $0xd0] sm:$0xff]  }
 0x3be   :  { %3803 = vmatpush1.bf16.msra.mxu0 %v5442_v43  ;;  %v5480_v43 = vld [vmem:[%s7194_s5 + $0x50] sm:$0xff]  }
 0x3bf   :  { %3804 = vmatprep.subr.bf16.mxu0 %v5450_v38  ;;  %v5484_v38 = vld [vmem:[%s7194_s5 + $0x48] sm:$0xff]  }
 0x3c2   :  { %3805 = vmatpush1.bf16.msra.mxu0 %v5448_v51  ;;  %v5486_v51 = vld [vmem:[%s7194_s5 + $0x8] sm:$0xff]  }
 0x3c3   :  { %3806 = vmatprep.subr.bf16.mxu0 %v5456_v23  ;;  %v5488_v23 = vld [vmem:[%s7194_s5 + $0x40] sm:$0xff]  }
 0x3c6   :  { %3807 = vmatpush1.bf16.msra.mxu0 %v5454_v26  ;;  %v5490_v26 = vld [vmem:[%s7194_s5] sm:$0xff]  }
 0x3c7   :  { %5033 = vmatprep.subr.bf16.mxu0 %v5460_v34  ;;  %v3612_v34 = vlaneseq }
 0x3c9   :  { %v3613_v1 = vshrl.u32 %v3612_v34, 7 }
 0x429   :  { %v4952_v47 = vpop.f32.mrf.mxu0 }
 0x42b   :  { %v4953_v14 = vpop.f32.mrf.mxu0 }
 0x42c   :  { %v4954_v46 = vadd.f32 %v4953_v14, %v4952_v47  ;;  %v3614_v47 = vsub.s32 0, %v3613_v1  ;;  %v3622_v14 = vsub.s32 2, %v3613_v1 }
 0x42d   :  { %v4955_v55 = vpop.f32.mrf.mxu0 }
 0x42e   :  { %v3412_v24 = vadd.f32 %v4954_v46, %v29_v31  ;;  %v4223_v55 = vld [vmem:[%s7191_s6 + $0x3] ss:$8 sm:$0xf] }
 0x42f   :  { %v4956_v60 = vpop.f32.mrf.mxu0 }
 0x430   :  { %v3618_v60 = vsub.s32 1, %v3613_v1 }
 0x439   :  { %v4996_v3 = vpop.f32.mrf.mxu1 }
 0x43b   :  { %v4997_v44 = vpop.f32.mrf.mxu1 }
 0x43c   :  { %v4998_v9 = vadd.f32 %v4997_v44, %v4996_v3  ;;  %v3626_v3 = vsub.s32 3, %v3613_v1  ;;  %v3615_v44 = vrot.slane %v4223_v55, %v3614_v47 }
 0x43d   :  { %v4999_v19 = vpop.f32.mrf.mxu1 }
 0x43e   :  { %v3623_v19 = vrot.slane %v4223_v55, %v3622_v14 }
 0x43f   :  { %v5000_v33 = vpop.f32.mrf.mxu1 }
 0x440   :  { %v3619_v33 = vrot.slane %v4223_v55, %v3618_v60 }
 0x449   :  { %v4974_v41 = vpop.f32.mrf.mxu0 }
 0x44b   :  { %v4975_v45 = vpop.f32.mrf.mxu0 }
 0x44c   :  { %v4976_v62 = vadd.f32 %v4975_v45, %v4974_v41  ;;  %v3627_v41 = vrot.slane %v4223_v55, %v3626_v3 }
 0x44d   :  { %v4977_v11 = vpop.f32.mrf.mxu0 }
 0x44e   :  { %v3452_v28 = vadd.f32 %v4976_v62, %v3412_v24 }
 0x44f   :  { %v4978_v15 = vpop.f32.mrf.mxu0 }
 0x450   :  { %v3492_v4 = vadd.f32 %v4998_v9, %v3452_v28 }
 0x45a   :  { %v3571_v25 = vpop.f32.mrf.mxu1 }
 0x45c   :  { %v5095_v20 = vpop.f32.mrf.mxu1 }
 0x45e   :  { %v3574_v6 = vpop.f32.mrf.mxu1 }
 0x460   :  { %v5096_v42 = vpop.f32.mrf.mxu1 }
 0x469   :  { %v5018_v50 = vpop.f32.mrf.mxu0 }
 0x46b   :  { %v5019_v40 = vpop.f32.mrf.mxu0 }
 0x46c   :  { %v5020_v48 = vadd.f32 %v5019_v40, %v5018_v50 }
 0x46d   :  { %v5021_v56 = vpop.f32.mrf.mxu0 }
 0x46e   :  { %v3532_v35 = vadd.f32 %v5020_v48, %v3492_v4 }
 0x46f   :  { %v5022_v12 = vpop.f32.mrf.mxu0 }
 0x470   :  { %v3572_v27 = vadd.f32 %v3571_v25, %v3532_v35 }
 0x472   :  { %v3577_v29 = vmax.f32 %v3572_v27, 0.0 }
 0x474   :  { %v3578_v54 = vpack.c.bf16 %v3577_v29, %v3577_v29 }
 0x476   :  { %3825 = vmatmul.mubr.bf16.vlgmr.msra.gmra.mxu0 %v3578_v54  ;;  %3866 = vmatmul.mubr.bf16.vlgmr.msra.gmra.mxu1 %v3578_v54 }
 0x477   :  { %5034 = vmatpush3.bf16.msra.mxu0 %v5462_v2  ;;  %5056 = vmatpush3.bf16.msra.mxu1 %v5463_v16  ;;  %v32_v2 = vld [vmem:[%s7191_s6 + $0x4] ss:$0 sm:$0xff] }
 0x478   :  { %5035 = vmatprep.subr.bf16.mxu0 %v5464_v0  ;;  %5057 = vmatprep.subr.bf16.mxu1 %v5465_v39 }
 0x47b   :  { %5036 = vmatpush3.bf16.msra.mxu0 %v5466_v32  ;;  %5058 = vmatpush3.bf16.msra.mxu1 %v5467_v30 }
 0x47c   :  { %5037 = vmatprep.subr.bf16.mxu0 %v5468_v61  ;;  %5059 = vmatprep.subr.bf16.mxu1 %v5469_v10 }
 0x47f   :  { %5038 = vmatpush3.bf16.msra.mxu0 %v5470_v18  ;;  %5060 = vmatpush3.bf16.msra.mxu1 %v5471_v7 }
 0x480   :  { %5039 = vmatprep.subr.bf16.mxu0 %v5472_v37  ;;  %5061 = vmatprep.subr.bf16.mxu1 %v5473_v58 }
 0x483   :  { %5040 = vmatpush3.bf16.msra.mxu0 %v5474_v8  ;;  %5062 = vmatpush3.bf16.msra.mxu1 %v5475_v5 }
 0x484   :  { %5041 = vmatprep.subr.bf16.mxu0 %v5476_v21  ;;  %5063 = vmatprep.subr.bf16.mxu1 %v5477_v13 }
 0x487   :  { %5042 = vmatpush3.bf16.msra.mxu0 %v5478_v49  ;;  %5064 = vmatpush3.bf16.msra.mxu1 %v5479_v52 }
 0x488   :  { %5043 = vmatprep.subr.bf16.mxu0 %v5480_v43  ;;  %5065 = vmatprep.subr.bf16.mxu1 %v5481_v17 }
 0x48b   :  { %5044 = vmatpush3.bf16.msra.mxu0 %v5482_v53  ;;  %5066 = vmatpush3.bf16.msra.mxu1 %v5483_v59 }
 0x48c   :  { %5045 = vmatprep.subr.bf16.mxu0 %v5484_v38  ;;  %5067 = vmatprep.subr.bf16.mxu1 %v5485_v57 }
 0x48f   :  { %5046 = vmatpush3.bf16.msra.mxu0 %v5486_v51  ;;  %5068 = vmatpush3.bf16.msra.mxu1 %v5487_v22 }
 0x490   :  { %5047 = vmatprep.subr.bf16.mxu0 %v5488_v23  ;;  %5069 = vmatprep.subr.bf16.mxu1 %v5489_v63 }
 0x493   :  { %5048 = vmatpush3.bf16.msra.mxu0 %v5490_v26  ;;  %5070 = vmatpush3.bf16.msra.mxu1 %v5491_v36 }
 0x536   :  { %v3826_v45 = vpop.f32.mrf.mxu0  ;;  %v3867_v11 = vpop.f32.mrf.mxu1 }
 0x537   :  { %v3827_v15 = vadd.f32 %v3826_v45, %v3615_v44  ;;  %v3868_v25 = vadd.f32 %v3867_v11, %v3623_v19 }
 0x538   :  { %v3828_v20 = vpop.f32.mrf.mxu0  ;;  %v3869_v6 = vpop.f32.mrf.mxu1 }
 0x539   :  { %v3829_v42 = vadd.f32 %v3828_v20, %v3619_v33  ;;  %v3870_v46 = vadd.f32 %v3869_v6, %v3627_v41  ;;  %v3874_v31 = vmax.f32 %v3827_v15, 0.0  ;;  %v3876_v62 = vmax.f32 %v3868_v25, 0.0 }
 0x53a   :  { %v3830_v24 = vpop.f32.mrf.mxu0  ;;  %v3871_v28 = vpop.f32.mrf.mxu1 }
 0x53b   :  { %v3875_v50 = vmax.f32 %v3829_v42, 0.0  ;;  %v3877_v9 = vmax.f32 %v3870_v46, 0.0  ;;  %v3878_v35 = vpack.c.bf16 %v3874_v31, %v3874_v31  ;;  %v3880_v12 = vpack.c.bf16 %v3876_v62, %v3876_v62 }
 0x53c   :  { %v3831_v40 = vpop.f32.mrf.mxu0  ;;  %v3872_v4 = vpop.f32.mrf.mxu1 }
 0x53d   :  { %v3879_v48 = vpack.c.bf16 %v3875_v50, %v3875_v50  ;;  %v3881_v56 = vpack.c.bf16 %v3877_v9, %v3877_v9 }
 0x53f   :  { %4170 = vmatprep.mubr.bf16.mxu0 %v3879_v48  ;;  %4210 = vmatprep.mubr.bf16.mxu1 %v3881_v56 }
 0x540   :  { %4171 = vmatmul.mubr.bf16.vlgmr.msra.gmra.mxu0 %v3878_v35  ;;  %4211 = vmatmul.mubr.bf16.vlgmr.msra.gmra.mxu1 %v3880_v12 }
 0x600   :  { %v5049_v27 = vpop.f32.mrf.mxu0  ;;  %v5071_v29 = vpop.f32.mrf.mxu1 }
 0x602   :  { %v5050_v16 = vpop.f32.mrf.mxu0  ;;  %v5072_v54 = vpop.f32.mrf.mxu1 }
 0x603   :  { %v5051_v0 = vadd.f32 %v5050_v16, %v5049_v27  ;;  %v5073_v61 = vadd.f32 %v5072_v54, %v5071_v29 }
 0x604   :  { %v5052_v39 = vpop.f32.mrf.mxu0  ;;  %v5074_v32 = vpop.f32.mrf.mxu1 }
 0x605   :  { %v4173_v30 = vadd.f32 %v5051_v0, %v32_v2 }
 0x606   :  { %v5053_v10 = vpop.f32.mrf.mxu0  ;;  %v5075_v18 = vpop.f32.mrf.mxu1 }
 0x607   :  { %v4213_v7 = vadd.f32 %v5073_v61, %v4173_v30 }
 0x609   :  { %4218 = vst [vmem:[%s7195_s7] sm:$0xff] %v4213_v7 }

</bundles_post_ra>
